<compile_context>
chip_gen: v7x
topology: tpu7x:2x2x1
jax: 0.10.0
libtpu: 0.0.40
codegen_flags: <defaults>
</compile_context>

<pallas_src>
import functools

import jax
import jax.numpy as jnp
from jax import lax
from jax.experimental import pallas as pl
from jax.experimental.pallas import tpu as pltpu

ANCHOR_SIZES = [10, 30, 60]


# ----------------------------------------------------------------------------
# VMEM budget: v7x has only 64 MiB per TensorCore (v5e/v6e: 128 MiB).
# ----------------------------------------------------------------------------
def _vmem_limit_bytes():
    try:
        cap = pltpu.get_tpu_info().vmem_capacity_bytes
        return int(min(cap * 3 // 4, 96 * 1024 * 1024))
    except Exception:
        return 48 * 1024 * 1024


_VMEM_LIMIT = _vmem_limit_bytes()


# ----------------------------------------------------------------------------
# Kernel 1: fused 3x3x3 conv + folded BN (scale/shift) + residual-add + ReLU.
# Grid = (N, D, 3): kd (depth tap) is the reduction ("arbitrary") axis.
# ----------------------------------------------------------------------------
def _conv3x3_kernel(x_ref, w_ref, scale_ref, shift_ref, res_ref, o_ref,
                    acc_ref, *, H, W, Cin, Cout, relu):
    kd = pl.program_id(2)

    @pl.when(kd == 0)
    def _init():
        acc_ref[...] = jnp.zeros_like(acc_ref)

    acc = acc_ref[...]                                   # (H, W, Cout) f32
    for t in range(9):
        kh, kw = divmod(t, 3)
        a = x_ref[kh:kh + H, kw:kw + W, :]               # (H, W, Cin) bf16
        wk = w_ref[t]                                    # (Cin, Cout) bf16
        wb = jnp.broadcast_to(wk[None], (H, Cin, Cout))
        acc = acc + lax.dot_general(
            a, wb,
            dimension_numbers=(((2,), (1,)), ((0,), (0,))),
            preferred_element_type=jnp.float32)
    acc_ref[...] = acc

    @pl.when(kd == pl.num_programs(2) - 1)
    def _finalize():
        y = acc_ref[...] * scale_ref[...] + shift_ref[...]
        y = y + res_ref[...].astype(jnp.float32)
        if relu:
            y = jnp.maximum(y, 0.0)
        o_ref[...] = y.astype(o_ref.dtype)


@functools.lru_cache(maxsize=None)
def _build_conv3x3(N, D, H, W, Cin, Cout, relu):
    kernel = functools.partial(_conv3x3_kernel, H=H, W=W, Cin=Cin, Cout=Cout,
                               relu=relu)
    return pl.pallas_call(
        kernel,
        out_shape=jax.ShapeDtypeStruct((N, D, H, W, Cout), jnp.bfloat16),
        grid=(N, D, 3),
        in_specs=[
            # one padded depth plane, shifted by the kd grid index
            pl.BlockSpec((None, None, H + 2, W + 2, Cin),
                         lambda n, d, kd: (n, d + kd, 0, 0, 0)),
            # the (9, Cin, Cout) weight slab for depth tap kd
            pl.BlockSpec((None, 9, Cin, Cout), lambda n, d, kd: (kd, 0, 0, 0)),
            pl.BlockSpec((1, 1, Cout), lambda n, d, kd: (0, 0, 0)),
            pl.BlockSpec((1, 1, Cout), lambda n, d, kd: (0, 0, 0)),
            pl.BlockSpec((None, None, H, W, Cout),
                         lambda n, d, kd: (n, d, 0, 0, 0)),
        ],
        out_specs=pl.BlockSpec((None, None, H, W, Cout),
                               lambda n, d, kd: (n, d, 0, 0, 0)),
        scratch_shapes=[pltpu.VMEM((H, W, Cout), jnp.float32)],
        compiler_params=pltpu.CompilerParams(
            dimension_semantics=("parallel", "parallel", "arbitrary"),
            vmem_limit_bytes=_VMEM_LIMIT),
    )


def conv3d_3x3(x, w, scale, shift, relu, residual=None):
    """3x3x3 conv (stride 1, pad 1) with folded BN, fused residual add and
    optional ReLU.  w in torch layout (Cout, Cin, 3, 3, 3)."""
    N, D, H, W, Cin = x.shape
    Cout = w.shape[0]
    x = x.astype(jnp.bfloat16)
    if Cin < 8:                      # first layer (Cin=1): pad contraction dim
        pad_c = 8 - Cin
        x = jnp.pad(x, ((0, 0),) * 4 + ((0, pad_c),))
        w = jnp.pad(w, ((0, 0), (0, pad_c)) + ((0, 0),) * 3)
        Cin = 8
    xp = jnp.pad(x, ((0, 0), (1, 1), (1, 1), (1, 1), (0, 0)))
    wm = jnp.transpose(w, (2, 3, 4, 1, 0)).reshape(3, 9, Cin, Cout)
    if residual is None:
        residual = jnp.zeros((N, D, H, W, Cout), jnp.bfloat16)
    else:
        residual = residual.astype(jnp.bfloat16)
    call = _build_conv3x3(N, D, H, W, Cin, Cout, bool(relu))
    return call(xp, wm.astype(jnp.bfloat16),
                scale.reshape(1, 1, Cout).astype(jnp.float32),
                shift.reshape(1, 1, Cout).astype(jnp.float32),
                residual)


# ----------------------------------------------------------------------------
# Kernel 2: fused matmul (1x1x1 conv / ConvTranspose core) + scale/shift + ReLU
# ----------------------------------------------------------------------------
def _matmul_kernel(a_ref, b_ref, scale_ref, shift_ref, o_ref, *, relu):
    acc = jnp.dot(a_ref[...], b_ref[...], preferred_element_type=jnp.float32)
    acc = acc * scale_ref[...] + shift_ref[...]
    if relu:
        acc = jnp.maximum(acc, 0.0)
    o_ref[...] = acc.astype(o_ref.dtype)


@functools.lru_cache(maxsize=None)
def _build_fused_matmul(Mp, K, Nc, tm, relu, out_dtype):
    kernel = functools.partial(_matmul_kernel, relu=relu)
    return pl.pallas_call(
        kernel,
        out_shape=jax.ShapeDtypeStruct((Mp, Nc), out_dtype),
        grid=(Mp // tm,),
        in_specs=[
            pl.BlockSpec((tm, K), lambda i: (i, 0)),
            pl.BlockSpec((K, Nc), lambda i: (0, 0)),
            pl.BlockSpec((1, Nc), lambda i: (0, 0)),
            pl.BlockSpec((1, Nc), lambda i: (0, 0)),
        ],
        out_specs=pl.BlockSpec((tm, Nc), lambda i: (i, 0)),
        compiler_params=pltpu.CompilerParams(
            dimension_semantics=("parallel",),
            vmem_limit_bytes=_VMEM_LIMIT),
    )


def _pick_tiles(M):
    """Round M to a multiple of 8 and pick the largest tile (<=1024) that
    still yields >= 2 grid blocks (keeps both cores busy when possible)."""
    Mp = ((M + 7) // 8) * 8
    tm = Mp
    for cand in (1024, 512, 256, 128, 64, 32, 16, 8):
        if Mp % cand == 0 and Mp // cand >= 2:
            tm = cand
            break
    return Mp, tm


def fused_matmul(a, b, scale, shift, relu, out_dtype=jnp.bfloat16):
    """out[:M] = maybe_relu((a @ b) * scale + shift); a:(M,K), b:(K,Nc)."""
    M, K = a.shape
    Nc = b.shape[1]
    Mp, tm = _pick_tiles(M)
    a = a.astype(jnp.bfloat16)
    if Mp != M:
        a = jnp.pad(a, ((0, Mp - M), (0, 0)))
    out = _build_fused_matmul(Mp, K, Nc, tm, bool(relu), out_dtype)(
        a, b.astype(jnp.bfloat16),
        scale.reshape(1, Nc).astype(jnp.float32),
        shift.reshape(1, Nc).astype(jnp.float32))
    if Mp != M:
        out = out[:M]
    return out


def conv3d_1x1(x, w, scale, shift, relu, out_dtype=jnp.bfloat16):
    """1x1x1 conv.  w in torch layout (Cout,Cin,1,1,1) or (Cout,Cin)."""
    N, D, H, W, Cin = x.shape
    Cout = w.shape[0]
    wm = jnp.transpose(w.reshape(Cout, Cin))
    out = fused_matmul(x.reshape(-1, Cin), wm, scale, shift, relu, out_dtype)
    return out.reshape(N, D, H, W, Cout)


def deconv2x2x2(x, w, scale, shift, relu):
    """ConvTranspose3d(kernel=2, stride=2).  w in torch layout (Cin,Cout,2,2,2).
    One fused matmul (Cin -> 8*Cout) followed by a depth-to-space reshape."""
    N, D, H, W, Cin = x.shape
    Cout = w.shape[1]
    wm = jnp.transpose(w, (0, 2, 3, 4, 1)).reshape(Cin, 8 * Cout)  # (a,b,c)-major
    scale8 = jnp.tile(scale, 8)
    shift8 = jnp.tile(shift, 8)
    y = fused_matmul(x.reshape(N * D * H * W, Cin), wm, scale8, shift8, relu)
    y = y.reshape(N, D, H, W, 2, 2, 2, Cout)
    y = jnp.transpose(y, (0, 1, 4, 2, 5, 3, 6, 7))
    return y.reshape(N, 2 * D, 2 * H, 2 * W, Cout)


# ----------------------------------------------------------------------------
# Kernel 3: MaxPool3d(kernel=2, stride=2).  The wrapper exposes the pooling
# pairs with a free contiguous reshape; the kernel is three jnp.max reductions.
# ----------------------------------------------------------------------------
def _maxpool_kernel(x_ref, o_ref):
    x = x_ref[...]               # (2, Hout, 2, Wout, 2, C)
    x = jnp.max(x, axis=0)       # depth pair
    x = jnp.max(x, axis=1)       # height pair
    x = jnp.max(x, axis=2)       # width pair
    o_ref[...] = x               # (Hout, Wout, C)


@functools.lru_cache(maxsize=None)
def _build_maxpool(M, Hout, Wout, C):
    return pl.pallas_call(
        _maxpool_kernel,
        out_shape=jax.ShapeDtypeStruct((M, Hout, Wout, C), jnp.bfloat16),
        grid=(M,),
        in_specs=[pl.BlockSpec((None, 2, Hout, 2, Wout, 2, C),
                               lambda i: (i, 0, 0, 0, 0, 0, 0))],
        out_specs=pl.BlockSpec((None, Hout, Wout, C), lambda i: (i, 0, 0, 0)),
        compiler_params=pltpu.CompilerParams(
            dimension_semantics=("parallel",),
            vmem_limit_bytes=_VMEM_LIMIT),
    )


def maxpool2x2x2(x):
    # MaxPool3d(kernel_size=2, stride=2); pooling indices are unused downstream.
    N, D, H, W, C = x.shape
    Do, Ho, Wo = D // 2, H // 2, W // 2
    xr = x.astype(jnp.bfloat16).reshape(N * Do, 2, Ho, 2, Wo, 2, C)
    out = _build_maxpool(N * Do, Ho, Wo, C)(xr)
    return out.reshape(N, Do, Ho, Wo, C)


# ----------------------------------------------------------------------------
# Deterministic parameter initialization (synthetic, no checkpoint)
# ----------------------------------------------------------------------------
_BASE_KEY = jax.random.PRNGKey(0)
_COUNTER = [0]


def _next_key():
    _COUNTER[0] += 1
    return jax.random.fold_in(_BASE_KEY, _COUNTER[0])


def conv_p(cout, cin, k):
    return dict(
        w=0.05 * jax.random.normal(_next_key(), (cout, cin, k, k, k), jnp.float32),
        b=0.05 * jax.random.normal(_next_key(), (cout,), jnp.float32),
    )


def deconv_p(cin, cout, k):
    return dict(
        w=0.05 * jax.random.normal(_next_key(), (cin, cout, k, k, k), jnp.float32),
        b=0.05 * jax.random.normal(_next_key(), (cout,), jnp.float32),
    )


def bn_p(c):
    return dict(
        gamma=1.0 + 0.1 * jax.random.normal(_next_key(), (c,), jnp.float32),
        beta=0.1 * jax.random.normal(_next_key(), (c,), jnp.float32),
        mean=0.1 * jax.random.normal(_next_key(), (c,), jnp.float32),
        var=1.0 + 0.1 * jnp.abs(jax.random.normal(_next_key(), (c,), jnp.float32)),
        eps=1e-5,
    )


def fold_bn(bias, bn):
    # y = gamma * (conv(x)+b - mean)/sqrt(var+eps) + beta  ->  scale, shift
    s = bn["gamma"] / jnp.sqrt(bn["var"] + bn["eps"])
    shift = bn["beta"] + s * (bias - bn["mean"])
    return s, shift


def make_postres(n_in, n_out):
    d = dict(
        conv1=conv_p(n_out, n_in, 3), bn1=bn_p(n_out),
        conv2=conv_p(n_out, n_out, 3), bn2=bn_p(n_out),
    )
    # stride is always 1 in this Net; shortcut only when channels change
    d["shortcut"] = (conv_p(n_out, n_in, 1), bn_p(n_out)) if n_in != n_out else None
    return d


def make_net_params():
    p = {}
    p["pre1"] = (conv_p(24, 1, 3), bn_p(24))
    p["pre2"] = (conv_p(24, 24, 3), bn_p(24))
    featureNum_forw = [24, 32, 64, 64, 64]
    featureNum_back = [128, 64, 64]
    num_blocks_forw = [2, 2, 3, 3]
    num_blocks_back = [3, 3]
    for i in range(len(num_blocks_forw)):
        blocks = []
        for j in range(num_blocks_forw[i]):
            n_in = featureNum_forw[i] if j == 0 else featureNum_forw[i + 1]
            blocks.append(make_postres(n_in, featureNum_forw[i + 1]))
        p["forw%d" % (i + 1)] = blocks
    for i in range(len(num_blocks_back)):
        blocks = []
        for j in range(num_blocks_back[i]):
            if j == 0:
                addition = 3 if i == 0 else 0
                n_in = featureNum_back[i + 1] + featureNum_forw[i + 2] + addition
            else:
                n_in = featureNum_back[i]
            blocks.append(make_postres(n_in, featureNum_back[i]))
        p["back%d" % (i + 2)] = blocks
    p["path1"] = (deconv_p(64, 64, 2), bn_p(64))
    p["path2"] = (deconv_p(64, 64, 2), bn_p(64))
    p["out1"] = conv_p(64, featureNum_back[0], 1)
    p["out2"] = conv_p(5 * len(ANCHOR_SIZES), 64, 1)
    return p


# ----------------------------------------------------------------------------
# Forward pass
# ----------------------------------------------------------------------------
def conv_bn_relu(x, conv, bn, relu):
    s, sh = fold_bn(conv["b"], bn)
    return conv3d_3x3(x, conv["w"], s, sh, relu)


def postres_fwd(pp, x):
    if pp["shortcut"] is not None:
        cw, cbn = pp["shortcut"]
        ss, ssh = fold_bn(cw["b"], cbn)
        residual = conv3d_1x1(x, cw["w"], ss, ssh, relu=False)
    else:
        residual = x
    s1, sh1 = fold_bn(pp["conv1"]["b"], pp["bn1"])
    h = conv3d_3x3(x, pp["conv1"]["w"], s1, sh1, relu=True)
    s2, sh2 = fold_bn(pp["conv2"]["b"], pp["bn2"])
    # conv2 + bn2 + residual-add + ReLU fused in one kernel epilogue
    return conv3d_3x3(h, pp["conv2"]["w"], s2, sh2, relu=True, residual=residual)


def net_forward(p, x_ncdhw, coord_ncdhw):
    # PyTorch NCDHW -> NDHWC, bf16 activations throughout
    x = jnp.transpose(x_ncdhw, (0, 2, 3, 4, 1)).astype(jnp.bfloat16)
    coord = jnp.transpose(coord_ncdhw, (0, 2, 3, 4, 1)).astype(jnp.bfloat16)

    out = conv_bn_relu(x, *p["pre1"], relu=True)
    out = conv_bn_relu(out, *p["pre2"], relu=True)

    out_pool = maxpool2x2x2(out)
    out1 = out_pool
    for blk in p["forw1"]:
        out1 = postres_fwd(blk, out1)
    out1_pool = maxpool2x2x2(out1)
    out2 = out1_pool
    for blk in p["forw2"]:
        out2 = postres_fwd(blk, out2)
    out2_pool = maxpool2x2x2(out2)
    out3 = out2_pool
    for blk in p["forw3"]:
        out3 = postres_fwd(blk, out3)
    out3_pool = maxpool2x2x2(out3)
    out4 = out3_pool
    for blk in p["forw4"]:
        out4 = postres_fwd(blk, out4)

    dcw, dcbn = p["path1"]
    s, sh = fold_bn(dcw["b"], dcbn)
    rev3 = deconv2x2x2(out4, dcw["w"], s, sh, relu=True)
    # TODO(synk): the skip-concats could be replaced by split-Cin partial
    # matmuls into the first back-block; kept as a cheap bf16 channels-last
    # jnp.concatenate for simplicity.
    comb3 = jnp.concatenate([rev3, out3], axis=-1)
    for blk in p["back3"]:
        comb3 = postres_fwd(blk, comb3)

    dcw, dcbn = p["path2"]
    s, sh = fold_bn(dcw["b"], dcbn)
    rev2 = deconv2x2x2(comb3, dcw["w"], s, sh, relu=True)
    comb2 = jnp.concatenate([rev2, out2, coord], axis=-1)
    for blk in p["back2"]:
        comb2 = postres_fwd(blk, comb2)

    # TODO(synk): Dropout3d(p=0.5) is identity here (eval-mode semantics).
    c1, c2 = p["out1"], p["out2"]
    h = conv3d_1x1(comb2, c1["w"], jnp.ones((c1["w"].shape[0],), jnp.float32),
                   c1["b"], relu=True)
    o = conv3d_1x1(h, c2["w"], jnp.ones((c2["w"].shape[0],), jnp.float32),
                   c2["b"], relu=False, out_dtype=jnp.float32)

    # out.view(N, C, -1).transpose(1, 2).view(N, D, H, W, len(ANCHORS), 5):
    # with channels-last data this is a plain channel split into (anchors, 5).
    N, D4, H4, W4, C = o.shape
    return o.reshape(N, D4, H4, W4, len(ANCHOR_SIZES), 5)


# ----------------------------------------------------------------------------

if __name__ == "__main__":
    params = make_net_params()

    key = jax.random.PRNGKey(0)
    kx, kc = jax.random.split(key)
    # Smallest spatial size divisible by 16 (4 maxpool levels): 16^3
    x = jax.random.normal(kx, (2, 1, 16, 16, 16), jnp.float32)        # NCDHW
    coord = jax.random.normal(kc, (2, 3, 4, 4, 4), jnp.float32)       # stride-4 grid

    out = net_forward(params, x, coord)
    out = jax.block_until_ready(out)
    assert out.shape == (2, 4, 4, 4, len(ANCHOR_SIZES), 5), out.shape
    assert bool(jnp.all(jnp.isfinite(out)))
    print("KERNEL_OK")
</pallas_src>

<mosaic_0001>
module attributes {stable_mosaic.version = 11 : i64} {
  func.func @_conv3x3_kernel(%arg0: i32, %arg1: i32, %arg2: i32, %arg3: memref<1x1x18x18x8xbf16, #tpu.memory_space<vmem>>, %arg4: memref<1x9x8x24xbf16, #tpu.memory_space<vmem>>, %arg5: memref<1x1x24xf32, #tpu.memory_space<vmem>>, %arg6: memref<1x1x24xf32, #tpu.memory_space<vmem>>, %arg7: memref<1x1x16x16x24xbf16, #tpu.memory_space<vmem>>, %arg8: memref<1x1x16x16x24xbf16, #tpu.memory_space<vmem>>, %arg9: memref<16x16x24xf32, #tpu.memory_space<vmem>>) attributes {dimension_semantics = [#tpu.dimension_semantics<parallel>, #tpu.dimension_semantics<parallel>, #tpu.dimension_semantics<arbitrary>], iteration_bounds = array<i64: 2, 16, 3>, scalar_prefetch = 0 : i64, scratch_operands = 1 : i64, tpu.core_type = #tpu.core_type<tc>, window_params = [{transform_indices = @transform_0, window_bounds = array<i64: 1, 1, 18, 18, 8>}, {transform_indices = @transform_1, window_bounds = array<i64: 1, 9, 8, 24>}, {pipeline_mode = #tpu.pipeline_mode<synchronous>, transform_indices = @transform_2, window_bounds = array<i64: 1, 1, 24>}, {pipeline_mode = #tpu.pipeline_mode<synchronous>, transform_indices = @transform_3, window_bounds = array<i64: 1, 1, 24>}, {transform_indices = @transform_4, window_bounds = array<i64: 1, 1, 16, 16, 24>}, {transform_indices = @transform_5, window_bounds = array<i64: 1, 1, 16, 16, 24>}]} {
    %c0_i32 = arith.constant 0 : i32
    %0 = arith.cmpi eq, %arg2, %c0_i32 : i32
    %1 = arith.extui %0 : i1 to i32
    %c0_i32_0 = arith.constant 0 : i32
    %2 = arith.cmpi ne, %1, %c0_i32_0 : i32
    scf.if %2 {
      %cst_88 = arith.constant 0.000000e+00 : f32
      %89 = vector.broadcast %cst_88 : f32 to vector<16x16x24xf32>
      %c0_89 = arith.constant 0 : index
      %c0_90 = arith.constant 0 : index
      %c0_91 = arith.constant 0 : index
      %90 = vector.load %arg9[%c0_89, %c0_90, %c0_91] : memref<16x16x24xf32, #tpu.memory_space<vmem>>, vector<16x16x24xf32>
      tpu.vector_store %arg9[%c0_89, %c0_90, %c0_91], %89 {strides = array<i32>} : memref<16x16x24xf32, #tpu.memory_space<vmem>>, vector<16x16x24xf32>,
    } else {
    }
    %c0 = arith.constant 0 : index
    %c0_1 = arith.constant 0 : index
    %c0_2 = arith.constant 0 : index
    %3 = vector.load %arg9[%c0, %c0_1, %c0_2] : memref<16x16x24xf32, #tpu.memory_space<vmem>>, vector<16x16x24xf32>
    %c0_3 = arith.constant 0 : index
    %c0_4 = arith.constant 0 : index
    %c0_5 = arith.constant 0 : index
    %c0_6 = arith.constant 0 : index
    %c0_7 = arith.constant 0 : index
    %4 = vector.load %arg3[%c0_3, %c0_4, %c0_5, %c0_6, %c0_7] : memref<1x1x18x18x8xbf16, #tpu.memory_space<vmem>>, vector<1x1x16x16x8xbf16>
    %5 = vector.shape_cast %4 : vector<1x1x16x16x8xbf16> to vector<16x16x8xbf16>
    %c0_8 = arith.constant 0 : index
    %c0_9 = arith.constant 0 : index
    %c0_10 = arith.constant 0 : index
    %c0_11 = arith.constant 0 : index
    %6 = vector.load %arg4[%c0_8, %c0_9, %c0_10, %c0_11] : memref<1x9x8x24xbf16, #tpu.memory_space<vmem>>, vector<1x1x8x24xbf16>
    %7 = vector.shape_cast %6 : vector<1x1x8x24xbf16> to vector<8x24xbf16>
    %8 = vector.shape_cast %7 : vector<8x24xbf16> to vector<1x8x24xbf16>
    %9 = vector.shape_cast %8 : vector<1x8x24xbf16> to vector<1x8x24xbf16>
    %10 = vector.broadcast %9 : vector<1x8x24xbf16> to vector<16x8x24xbf16>
    %cst = arith.constant dense<0.000000e+00> : vector<16x16x24xf32>
    %11 = tpu.matmul %5, %10, %cst {dimension_numbers = #tpu.dot_dimension_numbers<[2], [1], [1], [2], [0, 0, 0, 1, 1, 2], [0], [0]>} : vector<16x16x8xbf16>, vector<16x8x24xbf16>, vector<16x16x24xf32> -> vector<16x16x24xf32>
    %12 = arith.addf %3, %11 : vector<16x16x24xf32>
    %c0_12 = arith.constant 0 : index
    %c0_13 = arith.constant 0 : index
    %c0_14 = arith.constant 0 : index
    %c1 = arith.constant 1 : index
    %c0_15 = arith.constant 0 : index
    %13 = vector.load %arg3[%c0_12, %c0_13, %c0_14, %c1, %c0_15] : memref<1x1x18x18x8xbf16, #tpu.memory_space<vmem>>, vector<1x1x16x16x8xbf16>
    %14 = vector.shape_cast %13 : vector<1x1x16x16x8xbf16> to vector<16x16x8xbf16>
    %c0_16 = arith.constant 0 : index
    %c1_17 = arith.constant 1 : index
    %c0_18 = arith.constant 0 : index
    %c0_19 = arith.constant 0 : index
    %15 = vector.load %arg4[%c0_16, %c1_17, %c0_18, %c0_19] : memref<1x9x8x24xbf16, #tpu.memory_space<vmem>>, vector<1x1x8x24xbf16>
    %16 = vector.shape_cast %15 : vector<1x1x8x24xbf16> to vector<8x24xbf16>
    %17 = vector.shape_cast %16 : vector<8x24xbf16> to vector<1x8x24xbf16>
    %18 = vector.shape_cast %17 : vector<1x8x24xbf16> to vector<1x8x24xbf16>
    %19 = vector.broadcast %18 : vector<1x8x24xbf16> to vector<16x8x24xbf16>
    %cst_20 = arith.constant dense<0.000000e+00> : vector<16x16x24xf32>
    %20 = tpu.matmul %14, %19, %cst_20 {dimension_numbers = #tpu.dot_dimension_numbers<[2], [1], [1], [2], [0, 0, 0, 1, 1, 2], [0], [0]>} : vector<16x16x8xbf16>, vector<16x8x24xbf16>, vector<16x16x24xf32> -> vector<16x16x24xf32>
    %21 = arith.addf %12, %20 : vector<16x16x24xf32>
    %c0_21 = arith.constant 0 : index
    %c0_22 = arith.constant 0 : index
    %c0_23 = arith.constant 0 : index
    %c2 = arith.constant 2 : index
    %c0_24 = arith.constant 0 : index
    %22 = vector.load %arg3[%c0_21, %c0_22, %c0_23, %c2, %c0_24] : memref<1x1x18x18x8xbf16, #tpu.memory_space<vmem>>, vector<1x1x16x16x8xbf16>
    %23 = vector.shape_cast %22 : vector<1x1x16x16x8xbf16> to vector<16x16x8xbf16>
    %c0_25 = arith.constant 0 : index
    %c2_26 = arith.constant 2 : index
    %c0_27 = arith.constant 0 : index
    %c0_28 = arith.constant 0 : index
    %24 = vector.load %arg4[%c0_25, %c2_26, %c0_27, %c0_28] : memref<1x9x8x24xbf16, #tpu.memory_space<vmem>>, vector<1x1x8x24xbf16>
    %25 = vector.shape_cast %24 : vector<1x1x8x24xbf16> to vector<8x24xbf16>
    %26 = vector.shape_cast %25 : vector<8x24xbf16> to vector<1x8x24xbf16>
    %27 = vector.shape_cast %26 : vector<1x8x24xbf16> to vector<1x8x24xbf16>
    %28 = vector.broadcast %27 : vector<1x8x24xbf16> to vector<16x8x24xbf16>
    %cst_29 = arith.constant dense<0.000000e+00> : vector<16x16x24xf32>
    %29 = tpu.matmul %23, %28, %cst_29 {dimension_numbers = #tpu.dot_dimension_numbers<[2], [1], [1], [2], [0, 0, 0, 1, 1, 2], [0], [0]>} : vector<16x16x8xbf16>, vector<16x8x24xbf16>, vector<16x16x24xf32> -> vector<16x16x24xf32>
    %30 = arith.addf %21, %29 : vector<16x16x24xf32>
    %c0_30 = arith.constant 0 : index
    %c0_31 = arith.constant 0 : index
    %c1_32 = arith.constant 1 : index
    %c0_33 = arith.constant 0 : index
    %c0_34 = arith.constant 0 : index
    %31 = vector.load %arg3[%c0_30, %c0_31, %c1_32, %c0_33, %c0_34] : memref<1x1x18x18x8xbf16, #tpu.memory_space<vmem>>, vector<1x1x16x16x8xbf16>
    %32 = vector.shape_cast %31 : vector<1x1x16x16x8xbf16> to vector<16x16x8xbf16>
    %c0_35 = arith.constant 0 : index
    %c3 = arith.constant 3 : index
    %c0_36 = arith.constant 0 : index
    %c0_37 = arith.constant 0 : index
    %33 = vector.load %arg4[%c0_35, %c3, %c0_36, %c0_37] : memref<1x9x8x24xbf16, #tpu.memory_space<vmem>>, vector<1x1x8x24xbf16>
    %34 = vector.shape_cast %33 : vector<1x1x8x24xbf16> to vector<8x24xbf16>
    %35 = vector.shape_cast %34 : vector<8x24xbf16> to vector<1x8x24xbf16>
    %36 = vector.shape_cast %35 : vector<1x8x24xbf16> to vector<1x8x24xbf16>
    %37 = vector.broadcast %36 : vector<1x8x24xbf16> to vector<16x8x24xbf16>
    %cst_38 = arith.constant dense<0.000000e+00> : vector<16x16x24xf32>
    %38 = tpu.matmul %32, %37, %cst_38 {dimension_numbers = #tpu.dot_dimension_numbers<[2], [1], [1], [2], [0, 0, 0, 1, 1, 2], [0], [0]>} : vector<16x16x8xbf16>, vector<16x8x24xbf16>, vector<16x16x24xf32> -> vector<16x16x24xf32>
    %39 = arith.addf %30, %38 : vector<16x16x24xf32>
    %c0_39 = arith.constant 0 : index
    %c0_40 = arith.constant 0 : index
    %c1_41 = arith.constant 1 : index
    %c1_42 = arith.constant 1 : index
    %c0_43 = arith.constant 0 : index
    %40 = vector.load %arg3[%c0_39, %c0_40, %c1_41, %c1_42, %c0_43] : memref<1x1x18x18x8xbf16, #tpu.memory_space<vmem>>, vector<1x1x16x16x8xbf16>
    %41 = vector.shape_cast %40 : vector<1x1x16x16x8xbf16> to vector<16x16x8xbf16>
    %c0_44 = arith.constant 0 : index
    %c4 = arith.constant 4 : index
    %c0_45 = arith.constant 0 : index
    %c0_46 = arith.constant 0 : index
    %42 = vector.load %arg4[%c0_44, %c4, %c0_45, %c0_46] : memref<1x9x8x24xbf16, #tpu.memory_space<vmem>>, vector<1x1x8x24xbf16>
    %43 = vector.shape_cast %42 : vector<1x1x8x24xbf16> to vector<8x24xbf16>
    %44 = vector.shape_cast %43 : vector<8x24xbf16> to vector<1x8x24xbf16>
    %45 = vector.shape_cast %44 : vector<1x8x24xbf16> to vector<1x8x24xbf16>
    %46 = vector.broadcast %45 : vector<1x8x24xbf16> to vector<16x8x24xbf16>
    %cst_47 = arith.constant dense<0.000000e+00> : vector<16x16x24xf32>
    %47 = tpu.matmul %41, %46, %cst_47 {dimension_numbers = #tpu.dot_dimension_numbers<[2], [1], [1], [2], [0, 0, 0, 1, 1, 2], [0], [0]>} : vector<16x16x8xbf16>, vector<16x8x24xbf16>, vector<16x16x24xf32> -> vector<16x16x24xf32>
    %48 = arith.addf %39, %47 : vector<16x16x24xf32>
    %c0_48 = arith.constant 0 : index
    %c0_49 = arith.constant 0 : index
    %c1_50 = arith.constant 1 : index
    %c2_51 = arith.constant 2 : index
    %c0_52 = arith.constant 0 : index
    %49 = vector.load %arg3[%c0_48, %c0_49, %c1_50, %c2_51, %c0_52] : memref<1x1x18x18x8xbf16, #tpu.memory_space<vmem>>, vector<1x1x16x16x8xbf16>
    %50 = vector.shape_cast %49 : vector<1x1x16x16x8xbf16> to vector<16x16x8xbf16>
    %c0_53 = arith.constant 0 : index
    %c5 = arith.constant 5 : index
    %c0_54 = arith.constant 0 : index
    %c0_55 = arith.constant 0 : index
    %51 = vector.load %arg4[%c0_53, %c5, %c0_54, %c0_55] : memref<1x9x8x24xbf16, #tpu.memory_space<vmem>>, vector<1x1x8x24xbf16>
    %52 = vector.shape_cast %51 : vector<1x1x8x24xbf16> to vector<8x24xbf16>
    %53 = vector.shape_cast %52 : vector<8x24xbf16> to vector<1x8x24xbf16>
    %54 = vector.shape_cast %53 : vector<1x8x24xbf16> to vector<1x8x24xbf16>
    %55 = vector.broadcast %54 : vector<1x8x24xbf16> to vector<16x8x24xbf16>
    %cst_56 = arith.constant dense<0.000000e+00> : vector<16x16x24xf32>
    %56 = tpu.matmul %50, %55, %cst_56 {dimension_numbers = #tpu.dot_dimension_numbers<[2], [1], [1], [2], [0, 0, 0, 1, 1, 2], [0], [0]>} : vector<16x16x8xbf16>, vector<16x8x24xbf16>, vector<16x16x24xf32> -> vector<16x16x24xf32>
    %57 = arith.addf %48, %56 : vector<16x16x24xf32>
    %c0_57 = arith.constant 0 : index
    %c0_58 = arith.constant 0 : index
    %c2_59 = arith.constant 2 : index
    %c0_60 = arith.constant 0 : index
    %c0_61 = arith.constant 0 : index
    %58 = vector.load %arg3[%c0_57, %c0_58, %c2_59, %c0_60, %c0_61] : memref<1x1x18x18x8xbf16, #tpu.memory_space<vmem>>, vector<1x1x16x16x8xbf16>
    %59 = vector.shape_cast %58 : vector<1x1x16x16x8xbf16> to vector<16x16x8xbf16>
    %c0_62 = arith.constant 0 : index
    %c6 = arith.constant 6 : index
    %c0_63 = arith.constant 0 : index
    %c0_64 = arith.constant 0 : index
    %60 = vector.load %arg4[%c0_62, %c6, %c0_63, %c0_64] : memref<1x9x8x24xbf16, #tpu.memory_space<vmem>>, vector<1x1x8x24xbf16>
    %61 = vector.shape_cast %60 : vector<1x1x8x24xbf16> to vector<8x24xbf16>
    %62 = vector.shape_cast %61 : vector<8x24xbf16> to vector<1x8x24xbf16>
    %63 = vector.shape_cast %62 : vector<1x8x24xbf16> to vector<1x8x24xbf16>
    %64 = vector.broadcast %63 : vector<1x8x24xbf16> to vector<16x8x24xbf16>
    %cst_65 = arith.constant dense<0.000000e+00> : vector<16x16x24xf32>
    %65 = tpu.matmul %59, %64, %cst_65 {dimension_numbers = #tpu.dot_dimension_numbers<[2], [1], [1], [2], [0, 0, 0, 1, 1, 2], [0], [0]>} : vector<16x16x8xbf16>, vector<16x8x24xbf16>, vector<16x16x24xf32> -> vector<16x16x24xf32>
    %66 = arith.addf %57, %65 : vector<16x16x24xf32>
    %c0_66 = arith.constant 0 : index
    %c0_67 = arith.constant 0 : index
    %c2_68 = arith.constant 2 : index
    %c1_69 = arith.constant 1 : index
    %c0_70 = arith.constant 0 : index
    %67 = vector.load %arg3[%c0_66, %c0_67, %c2_68, %c1_69, %c0_70] : memref<1x1x18x18x8xbf16, #tpu.memory_space<vmem>>, vector<1x1x16x16x8xbf16>
    %68 = vector.shape_cast %67 : vector<1x1x16x16x8xbf16> to vector<16x16x8xbf16>
    %c0_71 = arith.constant 0 : index
    %c7 = arith.constant 7 : index
    %c0_72 = arith.constant 0 : index
    %c0_73 = arith.constant 0 : index
    %69 = vector.load %arg4[%c0_71, %c7, %c0_72, %c0_73] : memref<1x9x8x24xbf16, #tpu.memory_space<vmem>>, vector<1x1x8x24xbf16>
    %70 = vector.shape_cast %69 : vector<1x1x8x24xbf16> to vector<8x24xbf16>
    %71 = vector.shape_cast %70 : vector<8x24xbf16> to vector<1x8x24xbf16>
    %72 = vector.shape_cast %71 : vector<1x8x24xbf16> to vector<1x8x24xbf16>
    %73 = vector.broadcast %72 : vector<1x8x24xbf16> to vector<16x8x24xbf16>
    %cst_74 = arith.constant dense<0.000000e+00> : vector<16x16x24xf32>
    %74 = tpu.matmul %68, %73, %cst_74 {dimension_numbers = #tpu.dot_dimension_numbers<[2], [1], [1], [2], [0, 0, 0, 1, 1, 2], [0], [0]>} : vector<16x16x8xbf16>, vector<16x8x24xbf16>, vector<16x16x24xf32> -> vector<16x16x24xf32>
    %75 = arith.addf %66, %74 : vector<16x16x24xf32>
    %c0_75 = arith.constant 0 : index
    %c0_76 = arith.constant 0 : index
    %c2_77 = arith.constant 2 : index
    %c2_78 = arith.constant 2 : index
    %c0_79 = arith.constant 0 : index
    %76 = vector.load %arg3[%c0_75, %c0_76, %c2_77, %c2_78, %c0_79] : memref<1x1x18x18x8xbf16, #tpu.memory_space<vmem>>, vector<1x1x16x16x8xbf16>
    %77 = vector.shape_cast %76 : vector<1x1x16x16x8xbf16> to vector<16x16x8xbf16>
    %c0_80 = arith.constant 0 : index
    %c8 = arith.constant 8 : index
    %c0_81 = arith.constant 0 : index
    %c0_82 = arith.constant 0 : index
    %78 = vector.load %arg4[%c0_80, %c8, %c0_81, %c0_82] : memref<1x9x8x24xbf16, #tpu.memory_space<vmem>>, vector<1x1x8x24xbf16>
    %79 = vector.shape_cast %78 : vector<1x1x8x24xbf16> to vector<8x24xbf16>
    %80 = vector.shape_cast %79 : vector<8x24xbf16> to vector<1x8x24xbf16>
    %81 = vector.shape_cast %80 : vector<1x8x24xbf16> to vector<1x8x24xbf16>
    %82 = vector.broadcast %81 : vector<1x8x24xbf16> to vector<16x8x24xbf16>
    %cst_83 = arith.constant dense<0.000000e+00> : vector<16x16x24xf32>
    %83 = tpu.matmul %77, %82, %cst_83 {dimension_numbers = #tpu.dot_dimension_numbers<[2], [1], [1], [2], [0, 0, 0, 1, 1, 2], [0], [0]>} : vector<16x16x8xbf16>, vector<16x8x24xbf16>, vector<16x16x24xf32> -> vector<16x16x24xf32>
    %84 = arith.addf %75, %83 : vector<16x16x24xf32>
    %c0_84 = arith.constant 0 : index
    %c0_85 = arith.constant 0 : index
    %c0_86 = arith.constant 0 : index
    %85 = vector.load %arg9[%c0_84, %c0_85, %c0_86] : memref<16x16x24xf32, #tpu.memory_space<vmem>>, vector<16x16x24xf32>
    tpu.vector_store %arg9[%c0_84, %c0_85, %c0_86], %84 {strides = array<i32>} : memref<16x16x24xf32, #tpu.memory_space<vmem>>, vector<16x16x24xf32>,
    %c2_i32 = arith.constant 2 : i32
    %86 = arith.cmpi eq, %arg2, %c2_i32 : i32
    %87 = arith.extui %86 : i1 to i32
    %c0_i32_87 = arith.constant 0 : i32
    %88 = arith.cmpi ne, %87, %c0_i32_87 : i32
    scf.if %88 {
      %c0_88 = arith.constant 0 : index
      %c0_89 = arith.constant 0 : index
      %c0_90 = arith.constant 0 : index
      %89 = vector.load %arg9[%c0_88, %c0_89, %c0_90] : memref<16x16x24xf32, #tpu.memory_space<vmem>>, vector<16x16x24xf32>
      %c0_91 = arith.constant 0 : index
      %c0_92 = arith.constant 0 : index
      %c0_93 = arith.constant 0 : index
      %90 = vector.load %arg5[%c0_91, %c0_92, %c0_93] : memref<1x1x24xf32, #tpu.memory_space<vmem>>, vector<1x1x24xf32>
      %91 = vector.broadcast %90 : vector<1x1x24xf32> to vector<16x16x24xf32>
      %92 = arith.mulf %89, %91 : vector<16x16x24xf32>
      %c0_94 = arith.constant 0 : index
      %c0_95 = arith.constant 0 : index
      %c0_96 = arith.constant 0 : index
      %93 = vector.load %arg6[%c0_94, %c0_95, %c0_96] : memref<1x1x24xf32, #tpu.memory_space<vmem>>, vector<1x1x24xf32>
      %94 = vector.broadcast %93 : vector<1x1x24xf32> to vector<16x16x24xf32>
      %95 = arith.addf %92, %94 : vector<16x16x24xf32>
      %c0_97 = arith.constant 0 : index
      %c0_98 = arith.constant 0 : index
      %c0_99 = arith.constant 0 : index
      %c0_100 = arith.constant 0 : index
      %c0_101 = arith.constant 0 : index
      %96 = vector.load %arg7[%c0_97, %c0_98, %c0_99, %c0_100, %c0_101] : memref<1x1x16x16x24xbf16, #tpu.memory_space<vmem>>, vector<1x1x16x16x24xbf16>
      %97 = vector.shape_cast %96 : vector<1x1x16x16x24xbf16> to vector<16x16x24xbf16>
      %98 = arith.extf %97 : vector<16x16x24xbf16> to vector<16x16x24xf32>
      %99 = arith.addf %95, %98 : vector<16x16x24xf32>
      %cst_102 = arith.constant 0.000000e+00 : f32
      %100 = vector.broadcast %cst_102 : f32 to vector<16x16x24xf32>
      %101 = arith.maximumf %99, %100 : vector<16x16x24xf32>
      %102 = arith.truncf %101 : vector<16x16x24xf32> to vector<16x16x24xbf16>
      %c0_103 = arith.constant 0 : index
      %c0_104 = arith.constant 0 : index
      %c0_105 = arith.constant 0 : index
      %c0_106 = arith.constant 0 : index
      %c0_107 = arith.constant 0 : index
      %103 = vector.load %arg8[%c0_103, %c0_104, %c0_105, %c0_106, %c0_107] : memref<1x1x16x16x24xbf16, #tpu.memory_space<vmem>>, vector<1x1x16x16x24xbf16>
      %104 = vector.shape_cast %103 : vector<1x1x16x16x24xbf16> to vector<16x16x24xbf16>
      %105 = vector.shape_cast %102 : vector<16x16x24xbf16> to vector<1x1x16x16x24xbf16>
      tpu.vector_store %arg8[%c0_103, %c0_104, %c0_105, %c0_106, %c0_107], %105 {strides = array<i32>} : memref<1x1x16x16x24xbf16, #tpu.memory_space<vmem>>, vector<1x1x16x16x24xbf16>,
    } else {
    }
    return
  }
  func.func @transform_0(%arg0: i32, %arg1: i32, %arg2: i32) -> (i32, i32, i32, i32, i32) {
    %0 = arith.addi %arg1, %arg2 : i32
    %c0_i32 = arith.constant 0 : i32
    %c0_i32_0 = arith.constant 0 : i32
    %c0_i32_1 = arith.constant 0 : i32
    %c0_i32_2 = arith.constant 0 : i32
    return %arg0, %0, %c0_i32, %c0_i32_0, %c0_i32_1 : i32, i32, i32, i32, i32
  }
  func.func @transform_1(%arg0: i32, %arg1: i32, %arg2: i32) -> (i32, i32, i32, i32) {
    %c0_i32 = arith.constant 0 : i32
    %c0_i32_0 = arith.constant 0 : i32
    %c0_i32_1 = arith.constant 0 : i32
    %c0_i32_2 = arith.constant 0 : i32
    return %arg2, %c0_i32, %c0_i32_0, %c0_i32_1 : i32, i32, i32, i32
  }
  func.func @transform_2(%arg0: i32, %arg1: i32, %arg2: i32) -> (i32, i32, i32) {
    %c0_i32 = arith.constant 0 : i32
    %c0_i32_0 = arith.constant 0 : i32
    %c0_i32_1 = arith.constant 0 : i32
    %c0_i32_2 = arith.constant 0 : i32
    return %c0_i32, %c0_i32_0, %c0_i32_1 : i32, i32, i32
  }
  func.func @transform_3(%arg0: i32, %arg1: i32, %arg2: i32) -> (i32, i32, i32) {
    %c0_i32 = arith.constant 0 : i32
    %c0_i32_0 = arith.constant 0 : i32
    %c0_i32_1 = arith.constant 0 : i32
    %c0_i32_2 = arith.constant 0 : i32
    return %c0_i32, %c0_i32_0, %c0_i32_1 : i32, i32, i32
  }
  func.func @transform_4(%arg0: i32, %arg1: i32, %arg2: i32) -> (i32, i32, i32, i32, i32) {
    %c0_i32 = arith.constant 0 : i32
    %c0_i32_0 = arith.constant 0 : i32
    %c0_i32_1 = arith.constant 0 : i32
    %c0_i32_2 = arith.constant 0 : i32
    return %arg0, %arg1, %c0_i32, %c0_i32_0, %c0_i32_1 : i32, i32, i32, i32, i32
  }
  func.func @transform_5(%arg0: i32, %arg1: i32, %arg2: i32) -> (i32, i32, i32, i32, i32) {
    %c0_i32 = arith.constant 0 : i32
    %c0_i32_0 = arith.constant 0 : i32
    %c0_i32_1 = arith.constant 0 : i32
    %c0_i32_2 = arith.constant 0 : i32
    return %arg0, %arg1, %c0_i32, %c0_i32_0, %c0_i32_1 : i32, i32, i32, i32, i32
  }
}

</mosaic_0001>

<bundles_post_ra>
// kernel: tpu_custom_call.1
= control target key start
LH: loop header
LB: loop body
LE: loop exit
PB: predicated region body
PF: predicated region fallthrough
CT: control target
= control target key end

     0   :  { %10 = vsyncpa [#allocation4], 0  ;;  %s14284_s0 = inlined_call_operand.vmem [shape: bf16[2,18,18,18,8], index: 0, kind: input, shape index: {}]   ;;  %s14285_s1 = inlined_call_operand.vmem [shape: bf16[3,9,8,24], index: 1, kind: input, shape index: {}]   ;;  %s14286_s2 = inlined_call_operand.vmem [shape: f32[1,1,24], index: 2, kind: input, shape index: {}]   ;;  %s14287_s3 = inlined_call_operand.vmem [shape: f32[1,1,24], index: 3, kind: input, shape index: {}]   ;;  %s14288_s4 = inlined_call_operand.vmem [shape: bf16[2,16,16,16,24], index: 4, kind: input, shape index: {}]   ;;  %s14289_s5 = inlined_call_operand.hbm [shape: bf16[2,16,16,16,24], index: 5, kind: output, shape index: {}]  }
   0x1   :  { %12 = vsyncpa [#allocation4 + $0x1], 0  ;;  %s12246_s18 = smov 0   ;;  %s12248_s19 = smov 0  }
   0x2   :  { %s12250_s20 = smov 0   ;;  %s12252_s21 = smov 0  }
   0x3   :  { %s12254_s22 = smov 0   ;;  %s12256_s23 = smov 0  }
   0x4   :  { %s12258_s24 = smov 0   ;;  %s12260_s25 = smov 0  }
   0x5   :  { %s12262_s26 = smov 0   ;;  %s12264_s27 = smov 0  }
   0x6 LB: > { %14303 = sst [smem:[#allocation6_spill]] %s12172_s18  ;;  %s9415_s28 = sadd.s32 4294967295, %s12208_s27   ;;  %s12208_s27 = sphi %s12264_s27, %s18_s27   ;;  %s12204_s26 = sphi %s12262_s26, %s14341_s26   ;;  %s12200_s25 = sphi %s12260_s25, %s14340_s25   ;;  %s12196_s24 = sphi %s12258_s24, %s14339_s24   ;;  %s12192_s23 = sphi %s12256_s23, %s14338_s23   ;;  %s12188_s22 = sphi %s12254_s22, %s14337_s22   ;;  %s12184_s21 = sphi %s12252_s21, %s14336_s21   ;;  %s12180_s20 = sphi %s12250_s20, %s14335_s20   ;;  %s12176_s19 = sphi %s12248_s19, %s14343_s19   ;;  %s12172_s18 = sphi %s12246_s18, %s14342_s18  }
   0x7   : > { %14304 = sst [smem:[#allocation7_spill]] %s12180_s20  ;;  %s9416_s29 = sadd.s32 4294967294, %s12208_s27  }
   0x8   : > { %14305 = sst [smem:[#allocation8_spill]] %s12196_s24  ;;  %s30_s30 = sadd.s32 1, %s12196_s24 }
   0x9   : > { %14306 = sst [smem:[#allocation9_spill]] %s12200_s25  ;;  %p31_p0 = scmp.ge.s32.totalorder %s30_s30, 3 }
   0xa   : > { %14307 = sst [smem:[#allocation10_spill]] %s12204_s26  ;;  %s33_s6 = sadd.s32 1, %s12200_s25 }
   0xb   : > { %14308 = sst [smem:[#allocation11_spill]] %s12208_s27  ;;  %s37_s7 = sadd.s32 1, %s12204_s26 }
   0xc   : > { %p182_p1 = scmp.ne.s32.totalorder %s12180_s20, %s12176_s19  ;;  %s14345_s30 = smov (%p31_p0, %s30_s30), 0 }
   0xd   : > { %14309 = sst [smem:[#allocation12_spill]] %s14345_s30  ;;  %s14347_s6 = smov (!%p31_p0, %s33_s6), %s12200_s25 }
   0xe   : > { %p183_p2 = scmp.eq.s32.totalorder %s9415_s28, 95  ;;  %p188_p3 = scmp.ne.s32.totalorder %s12176_s19, %s12172_s18 }
   0xf   : > { %p35_p4 = scmp.ge.s32.totalorder %s14347_s6, 16  ;;  %p189_p5 = scmp.eq.s32.totalorder %s9416_s29, 95 }
  0x10   : > { %p12308_p6 = por %p183_p2, %p182_p1  ;;  %p9419_p8 = scmp.ge.s32.totalorder %s12208_s27, 1 }
  0x11   : > { %s14349_s6 = smov (%p35_p4, %s14347_s6), 0  ;;  %s14351_s7 = smov (!%p35_p4, %s37_s7), %s12204_s26 }
  0x12   : > { %14311 = sst [smem:[#allocation13_spill]] %s14349_s6  ;;  %p12315_p7 = por %p189_p5, %p188_p3 }
  0x13   : > { %p39_p9 = scmp.ge.s32.totalorder %s14351_s7, 2  ;;  %p247_p10 = scmp.lt.s32.totalorder %s12208_s27, 97 }
  0x14   : > { %s14312_s9 = scalar_select %p12315_p7, 1, 0 }
  0x15   : > { %s168_s10 = ssub.s32 %s12200_s25, %s14349_s6  ;;  %s14353_s7 = smov (%p39_p9, %s14351_s7), 0 }
  0x16   : > { %14313 = sst [smem:[#allocation14_spill]] %s14312_s9  ;;  %p248_p11 = pnand %p9419_p8, %p247_p10 }
  0x17   : > { %14314 = sst [smem:[#allocation15_spill]] %s14353_s7  ;;  %s167_s11 = ssub.s32 %s12204_s26, %s14353_s7 }
  0x18   : > { %s169_s12 = sor.u32 %s168_s10, %s167_s11  ;;  %s172_s13 = sadd.s32 1, %s12180_s20 }
  0x19   : > { %p170_p12 = scmp.eq.s32.totalorder %s169_s12, 0  ;;  %251 = sbr.rel (%p248_p11) target bundleno = 915 (0x393), region = 40 }
  0x1b   : > { %s12329_s14 = scalar_select %p170_p12, %s12180_s20, %s172_s13  }
  0x1d   : > { %14315 = sst [smem:[#allocation16_spill]] %s12329_s14 }
  0x20   : > { %s14294_s15 = sand.u32 1, %s12176_s19   ;;  %s294_s16 = sadd.s32 %s12184_s21, %s12188_s22 }
  0x21   : > { %s9420_s17 = sshll.u32 %s14294_s15, 7  ;;  %p295_p13 = scmp.lt.s32.totalorder %s12192_s23, 1 }
  0x22   : > { %p297_p0 = scmp.lt.s32.totalorder %s294_s16, 17  ;;  %p305_p1 = scmp.lt.s32.totalorder %s12184_s21, 2 }
  0x23   : > { %s296_s28 = scalar_select %p295_p13, %s12192_s23, 1 }
  0x24   : > { %s14355_s16 = smov (!%p297_p0, %s294_s16), 17  ;;  %p312_p2 = scmp.lt.s32.totalorder %s12188_s22, 15 }
  0x25   : > { %s11812_s29 = smul.u32 972, %s296_s28  ;;  %s9424_s14 = sshll.u32 %s296_s28, 9 }
  0x26   : > { %s11811_s10 = smul.u32 54, %s14355_s16  ;;  %p9426_p3 = scmp.ne.s32.totalorder %s12184_s21, 0 }
  0x27   : > { %s306_s11 = scalar_select %p305_p1, %s12184_s21, 2 }
  0x28   : > { %s301_s12 = sadd.s32 %s11812_s29, %s11811_s10  ;;  %vm324_vm0 = vcmask (!%p9426_p3), 195584   ;;  %v12210_v0 = vmov (!%p9426_p3), 0.0  }
  0x29   : > { %s9421_s13 = sshll.u32 %s301_s12, 2  ;;  %s11813_s7 = smul.u32 36, %s306_s11  ;;  %325 = vst.msk [vmem:[#allocation2] sm:$0xff] (!%p9426_p3), %vm324_vm0, %v12210_v0  ;;  %326 = vst.msk [vmem:[#allocation2 + $0x8] sm:$0xff] (!%p9426_p3), %vm324_vm0, %v12210_v0 }
  0x2a   : > { %s12344_s26 = scalar_lea.vmem %s14284_s0, %s9421_s13  ;;  %s12357_s11 = scalar_lea.vmem [#allocation3], %s9420_s17  ;;  %327 = vst.msk [vmem:[#allocation2 + $0x10] sm:$0xff] (!%p9426_p3), %vm324_vm0, %v12210_v0  ;;  %328 = vst.msk [vmem:[#allocation2 + $0x18] sm:$0xff] (!%p9426_p3), %vm324_vm0, %v12210_v0 }
  0x2b   : > { %s12349_s24 = scalar_lea.vmem %s14285_s1, %s11813_s7  ;;  %323 = sbr.rel (%p9426_p3) target bundleno = 58 (0x3a), region = 44  ;;  %329 = vst.msk [vmem:[#allocation2 + $0x20] sm:$0xff] (!%p9426_p3), %vm324_vm0, %v12210_v0  ;;  %330 = vst.msk [vmem:[#allocation2 + $0x28] sm:$0xff] (!%p9426_p3), %vm324_vm0, %v12210_v0 }
  0x2c   : > { %s313_s20 = scalar_select %p312_p2, %s12188_s22, 15 }
  0x2d   : > { %331 = vst.msk [vmem:[#allocation2 + $0x30] sm:$0xff] (!%p9426_p3), %vm324_vm0, %v12210_v0  ;;  %332 = vst.msk [vmem:[#allocation2 + $0x38] sm:$0xff] (!%p9426_p3), %vm324_vm0, %v12210_v0 }
  0x2e   : > { %s9423_s9 = sshll.u32 %s313_s20, 5  ;;  %333 = vst.msk [vmem:[#allocation2 + $0x40] sm:$0xff] (!%p9426_p3), %vm324_vm0, %v12210_v0  ;;  %334 = vst.msk [vmem:[#allocation2 + $0x48] sm:$0xff] (!%p9426_p3), %vm324_vm0, %v12210_v0 }
  0x2f   : > { %s316_s18 = sadd.s32 %s9424_s14, %s9423_s9  ;;  %335 = vst.msk [vmem:[#allocation2 + $0x50] sm:$0xff] (!%p9426_p3), %vm324_vm0, %v12210_v0  ;;  %336 = vst.msk [vmem:[#allocation2 + $0x58] sm:$0xff] (!%p9426_p3), %vm324_vm0, %v12210_v0 }
  0x30   : > { %s9425_s16 = sshll.u32 %s316_s18, 2  ;;  %337 = vst.msk [vmem:[#allocation2 + $0x60] sm:$0xff] (!%p9426_p3), %vm324_vm0, %v12210_v0  ;;  %338 = vst.msk [vmem:[#allocation2 + $0x68] sm:$0xff] (!%p9426_p3), %vm324_vm0, %v12210_v0 }
  0x31   : > { %s12355_s10 = scalar_lea.vmem %s14288_s4, %s9425_s16  ;;  %339 = vst.msk [vmem:[#allocation2 + $0x70] sm:$0xff] (!%p9426_p3), %vm324_vm0, %v12210_v0  ;;  %340 = vst.msk [vmem:[#allocation2 + $0x78] sm:$0xff] (!%p9426_p3), %vm324_vm0, %v12210_v0 }
  0x32   : > { %341 = vst.msk [vmem:[#allocation2 + $0x80] sm:$0xff] %vm324_vm0, %v12210_v0  ;;  %342 = vst.msk [vmem:[#allocation2 + $0x88] sm:$0xff] %vm324_vm0, %v12210_v0 }
  0x33   : > { %343 = vst.msk [vmem:[#allocation2 + $0x90] sm:$0xff] %vm324_vm0, %v12210_v0  ;;  %344 = vst.msk [vmem:[#allocation2 + $0x98] sm:$0xff] %vm324_vm0, %v12210_v0 }
  0x34   : > { %345 = vst.msk [vmem:[#allocation2 + $0xa0] sm:$0xff] %vm324_vm0, %v12210_v0  ;;  %346 = vst.msk [vmem:[#allocation2 + $0xa8] sm:$0xff] %vm324_vm0, %v12210_v0 }
  0x35   : > { %347 = vst.msk [vmem:[#allocation2 + $0xb0] sm:$0xff] %vm324_vm0, %v12210_v0  ;;  %348 = vst.msk [vmem:[#allocation2 + $0xb8] sm:$0xff] %vm324_vm0, %v12210_v0 }
  0x36   : > { %349 = vst.msk [vmem:[#allocation2 + $0xc0] sm:$0xff] %vm324_vm0, %v12210_v0  ;;  %350 = vst.msk [vmem:[#allocation2 + $0xc8] sm:$0xff] %vm324_vm0, %v12210_v0 }
  0x37   : > { %351 = vst.msk [vmem:[#allocation2 + $0xd0] sm:$0xff] %vm324_vm0, %v12210_v0  ;;  %352 = vst.msk [vmem:[#allocation2 + $0xd8] sm:$0xff] %vm324_vm0, %v12210_v0 }
  0x38   : > { %353 = vst.msk [vmem:[#allocation2 + $0xe0] sm:$0xff] %vm324_vm0, %v12210_v0  ;;  %354 = vst.msk [vmem:[#allocation2 + $0xe8] sm:$0xff] %vm324_vm0, %v12210_v0 }
  0x39   : > { %355 = vst.msk [vmem:[#allocation2 + $0xf0] sm:$0xff] %vm324_vm0, %v12210_v0  ;;  %356 = vst.msk [vmem:[#allocation2 + $0xf8] sm:$0xff] %vm324_vm0, %v12210_v0 }
  0x3a PF: > { %v421_v1 = vld [vmem:[%s12349_s24] sm:$0xf]  ;;  %vm431_vm1 = vcmask 1043456   ;;  %v14301_v2 = vmov 0.0   ;;  %vm427_vm2 = vcmask 64512   ;;  %v11907_v5 = vld [vmem:[%s12344_s26 + $0xc] sm:$0xff]  }
  0x3b   : > { %10403 = vmatprep.subr.bf16.mxu0 %v14301_v2  ;;  %10409 = vmatprep.subr.bf16.mxu1 %v14301_v2  ;;  %v12396_v3 = vsel %vm431_vm1, %v421_v1, 0  ;;  %v11906_v4 = vld [vmem:[%s12344_s26] sm:$0xff]   ;;  %vm12212_vm3 = vmmov 0   ;;  %v11908_v6 = vld [vmem:[%s12344_s26 + $0x18] sm:$0xff]   ;;  %v11910_v8 = vld [vmem:[%s12344_s26 + $0x30] sm:$0xff]   ;;  %vm2374_vm5 = vcmask 1046528  }
  0x3c   : > { %10404 = vmatpush3.bf16.msra.mxu0 %v12396_v3  ;;  %10410 = vmatpush3.bf16.msra.mxu1 %v12396_v3  ;;  %v11909_v7 = vld [vmem:[%s12344_s26 + $0x24] sm:$0xff]   ;;  %v11911_v9 = vld [vmem:[%s12344_s26 + $0x3c] sm:$0xff]   ;;  %v11913_v11 = vld [vmem:[%s12344_s26 + $0x54] sm:$0xff]   ;;  %vm1301_vm4 = vsmask.f32 7424  ;;  %vm8839_vm6 = vcmask 195584  }
  0x3d   : > { %10405 = vmatprep.mubr.msk.bf16.mxu0 %vm12212_vm3, %v14301_v2  ;;  %10411 = vmatprep.mubr.msk.bf16.mxu1 %vm12212_vm3, %v14301_v2  ;;  %v11912_v10 = vld [vmem:[%s12344_s26 + $0x48] sm:$0xff]   ;;  %v1243_v12 = vld [vmem:[%s12344_s26] sm:$0xf]  ;;  %v12446_v13 = vld [vmem:[%s12344_s26 + $0x4] sm:$0xf]  ;;  %p9963_p4 = scmp.ne.s32.totalorder %s12184_s21, 2 }
  0x3e   : > { %10415 = vmatprep.subr.bf16.mxu0 %v14301_v2  ;;  %10421 = vmatprep.subr.bf16.mxu1 %v14301_v2  ;;  %v1246_v14 = vld [vmem:[%s12344_s26 + $0xc] sm:$0xf]  ;;  %v12452_v15 = vld [vmem:[%s12344_s26 + $0x10] sm:$0xf]  ;;  %v12457_v16 = vcombine.low %v1243_v12, %v12446_v13  ;;  %v11914_v19 = vld [vmem:[%s12344_s26 + $0x60] sm:$0xff]   ;;  %vm9242_vm7 = vcmask (!%p9963_p4), 191488  }
  0x3f   : > { %10406 = vmatmul.mubr.msk.bf16.vlgmr.msra.gmra.mrb[0].mxu0 %vm427_vm2, %v11906_v4  ;;  %10412 = vmatmul.mubr.msk.bf16.vlgmr.msra.gmra.mrb[0].mxu1 %vm427_vm2, %v11907_v5  ;;  %v12460_v17 = vld [vmem:[%s12344_s26 + $0x8] ss:$0 sps:$4 sm:$0x11]   ;;  %v12469_v18 = vcombine.low %v1246_v14, %v12452_v15  ;;  %v11915_v20 = vld [vmem:[%s12344_s26 + $0x6c] sm:$0xff]   ;;  %v9459_v21 = vld [vmem:[%s12349_s24 + $0x4] sm:$0xf] }
  0x40   : > { %10416 = vmatpush3.bf16.msra.mxu0 %v12396_v3  ;;  %10422 = vmatpush3.bf16.msra.mxu1 %v12396_v3  ;;  %v1305_v22 = vshll.u32 %v12457_v16, 16  ;;  %v1310_v23 = vshll.u32 %v12460_v17, 16  ;;  %v12477_v24 = vld [vmem:[%s12344_s26 + $0x14] ss:$0 sps:$4 sm:$0x11]   ;;  %v12493_v30 = vsel %vm431_vm1, %v9459_v21, 0 }
  0x41   : > { %10417 = vmatprep.mubr.msk.bf16.mxu0 %vm12212_vm3, %v14301_v2  ;;  %10423 = vmatprep.mubr.msk.bf16.mxu1 %vm12212_vm3, %v14301_v2  ;;  %v1249_v25 = vld [vmem:[%s12344_s26 + $0x18] sm:$0xf]  ;;  %v12481_v26 = vld [vmem:[%s12344_s26 + $0x1c] sm:$0xf]  ;;  %v1372_v27 = vshll.u32 %v12469_v18, 16  ;;  %v1303_v31 = vshrl.u32 %v12457_v16, 16 }
  0x42   : > { %10427 = vmatprep.subr.bf16.mxu0 %v14301_v2  ;;  %10433 = vmatprep.subr.bf16.mxu1 %v14301_v2  ;;  %v1252_v28 = vld [vmem:[%s12344_s26 + $0x24] sm:$0xf]  ;;  %v12488_v29 = vld [vmem:[%s12344_s26 + $0x28] sm:$0xf]  ;;  %v1377_v32 = vshll.u32 %v12477_v24, 16  ;;  %v12498_v33 = vcombine.low %v1249_v25, %v12481_v26  ;;  %v11916_v35 = vld [vmem:[%s12344_s26 + $0x78] sm:$0xff]  }
  0x43   : > { %v12501_v34 = vld [vmem:[%s12344_s26 + $0x20] ss:$0 sps:$4 sm:$0x11]   ;;  %v11917_v36 = vld [vmem:[%s12344_s26 + $0x84] sm:$0xff]   ;;  %v1307_v37 = vrot.slane %v1305_v22, 1  ;;  %v12509_v38 = vrot.slane %v1310_v23, 1  ;;  %v12519_v42 = vcombine.low %v1252_v28, %v12488_v29 }
  0x44   : > { %v12512_v39 = vld [vmem:[%s12344_s26 + $0x2c] ss:$0 sps:$4 sm:$0x11]   ;;  %v2376_v40 = vrot.slane %v12460_v17, 1  ;;  %v1370_v41 = vshrl.u32 %v12469_v18, 16  ;;  %v1374_v44 = vrot.slane %v1372_v27, 1 }
  0x45   : > { %v12522_v43 = vld [vmem:[%s12344_s26 + $0x38] ss:$0 sps:$4 sm:$0x11]   ;;  %v1255_v45 = vld [vmem:[%s12344_s26 + $0x30] sm:$0xf]  ;;  %v2429_v47 = vrot.slane %v12477_v24, 1  ;;  %v1308_v5 = vor.u32 %v1307_v37, %v1303_v31 }
  0x46   : > { %v12526_v46 = vld [vmem:[%s12344_s26 + $0x34] sm:$0xf]  ;;  %v1379_v48 = vrot.slane %v1377_v32, 1  ;;  %v1434_v49 = vshrl.u32 %v12498_v33, 16  ;;  %v1436_v50 = vshll.u32 %v12498_v33, 16  ;;  %v1441_v51 = vshll.u32 %v12501_v34, 16 }
  0x47   : > { %10418 = vmatmul.mubr.msk.bf16.vlgmr.msra.gmra.mrb[4].mxu0 %vm427_vm2, %v11908_v6  ;;  %10424 = vmatmul.mubr.msk.bf16.vlgmr.msra.gmra.mrb[4].mxu1 %vm427_vm2, %v11909_v7  ;;  %v1258_v52 = vld [vmem:[%s12344_s26 + $0x3c] sm:$0xf]  ;;  %v12534_v53 = vld [vmem:[%s12344_s26 + $0x40] sm:$0xf]  ;;  %v1500_v54 = vshll.u32 %v12519_v42, 16  ;;  %v1505_v55 = vshll.u32 %v12512_v39, 16  ;;  %v12539_v56 = vcombine.low %v1255_v45, %v12526_v46  ;;  %v1375_v14 = vor.u32 %v1374_v44, %v1370_v41 }
  0x48   : > { %10428 = vmatpush3.bf16.msra.mxu0 %v12396_v3  ;;  %10434 = vmatpush3.bf16.msra.mxu1 %v12396_v3  ;;  %v1569_v57 = vshll.u32 %v12522_v43, 16  ;;  %v1261_v58 = vld [vmem:[%s12344_s26 + $0x48] sm:$0xf]  ;;  %v12546_v59 = vld [vmem:[%s12344_s26 + $0x4c] sm:$0xf]  ;;  %v12550_v60 = vrot.slane %v1436_v50, 1  ;;  %v12555_v62 = vcombine.low %v1258_v52, %v12534_v53  ;;  %v12611_v41 = vsel %vm1301_vm4, %v1308_v5, %v12509_v38 }
  0x49   : > { %10429 = vmatprep.mubr.msk.bf16.mxu0 %vm12212_vm3, %v14301_v2  ;;  %10435 = vmatprep.mubr.msk.bf16.mxu1 %vm12212_vm3, %v14301_v2  ;;  %v12552_v61 = vrot.slane %v1441_v51, 1  ;;  %v12558_v63 = vld [vmem:[%s12344_s26 + $0x44] ss:$0 sps:$4 sm:$0x11]   ;;  %v2479_v0 = vrot.slane %v12501_v34, 1  ;;  %v11918_v1 = vld [vmem:[%s12344_s26 + $0x90] sm:$0xff]  }
  0x4a   : > { %10439 = vmatprep.subr.bf16.mxu0 %v14301_v2  ;;  %10445 = vmatprep.subr.bf16.mxu1 %v14301_v2  ;;  %v11919_v4 = vld [vmem:[%s12344_s26 + $0x9c] sm:$0xff]   ;;  %v1264_v6 = vld [vmem:[%s12344_s26 + $0x54] sm:$0xf]  ;;  %v12569_v7 = vld [vmem:[%s12344_s26 + $0x58] sm:$0xf]  ;;  %v12581_v16 = vrot.slane %v1505_v55, 1 }
  0x4b   : > { %v12579_v12 = vld [vmem:[%s12344_s26 + $0x50] ss:$0 sps:$4 sm:$0x11]   ;;  %v1628_v22 = vshll.u32 %v12555_v62, 16  ;;  %v12592_v23 = vcombine.low %v1264_v6, %v12569_v7  ;;  %v1267_v25 = vld [vmem:[%s12344_s26 + $0x60] sm:$0xf] }
  0x4c   : > { %v1633_v27 = vshll.u32 %v12558_v63, 16  ;;  %v12597_v28 = vld [vmem:[%s12344_s26 + $0x64] sm:$0xf]  ;;  %v12600_v31 = vld [vmem:[%s12344_s26 + $0x68] ss:$0 sps:$4 sm:$0x11]  }
  0x4d   : > { %v2529_v37 = vrot.slane %v12512_v39, 1  ;;  %v1270_v44 = vld [vmem:[%s12344_s26 + $0x6c] sm:$0xf]  ;;  %v12618_v45 = vld [vmem:[%s12344_s26 + $0x70] sm:$0xf]  ;;  %v12622_v50 = vrot.slane %v1628_v22, 1  ;;  %v12627_v38 = vcombine.low %v1267_v25, %v12597_v28 }
  0x4e   : > { %v1756_v51 = vshll.u32 %v12592_v23, 16  ;;  %v12647_v5 = vcombine.low %v1270_v44, %v12618_v45  ;;  %v12650_v6 = vld [vmem:[%s12344_s26 + $0x74] ss:$0 sps:$4 sm:$0x11]   ;;  %v2356_v18 = vld [vmem:[%s12344_s26 + $0x24] sm:$0xe] }
  0x4f   : > { %10430 = vmatmul.mubr.msk.bf16.vlgmr.msra.gmra.mrb[8].mxu0 %vm427_vm2, %v11910_v8  ;;  %10436 = vmatmul.mubr.msk.bf16.vlgmr.msra.gmra.mrb[8].mxu1 %vm427_vm2, %v11911_v9  ;;  %v1498_v8 = vshrl.u32 %v12519_v42, 16  ;;  %v1502_v9 = vrot.slane %v1500_v54, 1  ;;  %v12614_v42 = vsel %vm1301_vm4, %v1375_v14, %v1379_v48  ;;  %v11920_v48 = vld [vmem:[%s12344_s26 + $0xa8] sm:$0xff]   ;;  %v11921_v54 = vld [vmem:[%s12344_s26 + $0xb4] sm:$0xff]   ;;  %v12656_v14 = vor.u32 %v12550_v60, %v1434_v49 }
  0x50   : > { %10440 = vmatpush3.bf16.msra.mxu0 %v12396_v3  ;;  %10446 = vmatpush3.bf16.msra.mxu1 %v12396_v3  ;;  %v12664_v44 = vrot.slane %v1756_v51, 1  ;;  %v2355_v60 = vld [vmem:[%s12344_s26 + $0x18] sm:$0xe]  ;;  %v2357_v51 = vld [vmem:[%s12344_s26 + $0x30] sm:$0xe]  ;;  %v9515_v49 = vcombine.low %v2356_v18, %v12488_v29 }
  0x51   : > { %10441 = vmatprep.mubr.msk.bf16.mxu0 %vm12212_vm3, %v14301_v2  ;;  %10447 = vmatprep.mubr.msk.bf16.mxu1 %vm12212_vm3, %v14301_v2  ;;  %v12658_v22 = vor.u32 %v1502_v9, %v1498_v8  ;;  %v9513_v33 = vcombine.low %v2355_v60, %v12481_v26  ;;  %v2361_v60 = vld [vmem:[%s12344_s26 + $0x60] sm:$0xe]  ;;  %v12722_v17 = vld [vmem:[%s12344_s26 + $0x88] sm:$0xf] }
  0x52   : > { %10451 = vmatprep.subr.bf16.mxu0 %v14301_v2  ;;  %10457 = vmatprep.subr.bf16.mxu1 %v14301_v2 }
  0x53   : > { %v2478_v29 = vrot.slane %v9513_v33, 1 }
  0x55   : > { %v12727_v24 = vsel %vm2374_vm5, %v2478_v29, %v2479_v0  ;;  %v12752_v29 = vld [vmem:[%s12344_s26 + $0xa4] ss:$0 sps:$4 sm:$0x11]  }
  0x57   : > { %10442 = vmatmul.mubr.msk.bf16.vlgmr.msra.gmra.mrb[12].mxu0 %vm427_vm2, %v11912_v10  ;;  %10448 = vmatmul.mubr.msk.bf16.vlgmr.msra.gmra.mrb[12].mxu1 %vm427_vm2, %v11913_v11  ;;  %v1564_v10 = vshll.u32 %v12539_v56, 16  ;;  %v12576_v11 = vcombine.low %v1261_v58, %v12546_v59  ;;  %v2579_v58 = vrot.slane %v12522_v43, 1  ;;  %v9525_v43 = vcombine.low %v2361_v60, %v12597_v28  ;;  %v1273_v28 = vld [vmem:[%s12344_s26 + $0x78] sm:$0xf]  ;;  %v12769_v60 = vld [vmem:[%s12344_s26 + $0xa0] sm:$0xf] }
  0x58   : > { %10452 = vmatpush3.bf16.msra.mxu0 %v12396_v3  ;;  %10458 = vmatpush3.bf16.msra.mxu1 %v12396_v3 }
  0x59   : > { %10453 = vmatprep.mubr.msk.bf16.mxu0 %vm12212_vm3, %v14301_v2  ;;  %10459 = vmatprep.mubr.msk.bf16.mxu1 %vm12212_vm3, %v14301_v2  ;;  %v12602_v32 = vrot.slane %v1564_v10, 1  ;;  %v2358_v10 = vld [vmem:[%s12344_s26 + $0x3c] sm:$0xe] }
  0x5a   : > { %10463 = vmatprep.subr.bf16.mxu0 %v14301_v2  ;;  %10469 = vmatprep.subr.bf16.mxu1 %v14301_v2 }
  0x5f   : > { %10454 = vmatmul.mubr.msk.bf16.vlgmr.msra.gmra.mrb[16].mxu0 %vm427_vm2, %v11914_v19  ;;  %10460 = vmatmul.mubr.msk.bf16.vlgmr.msra.gmra.mrb[16].mxu1 %vm427_vm2, %v11915_v20  ;;  %v12584_v19 = vrot.slane %v1569_v57, 1  ;;  %v12587_v20 = vld [vmem:[%s12344_s26 + $0x5c] ss:$0 sps:$4 sm:$0x11]   ;;  %v1825_v57 = vshll.u32 %v12600_v31, 16 }
  0x60   : > { %10464 = vmatpush3.bf16.msra.mxu0 %v12396_v3  ;;  %10470 = vmatpush3.bf16.msra.mxu1 %v12396_v3  ;;  %v1761_v52 = vshll.u32 %v12587_v20, 16  ;;  %v2729_v26 = vrot.slane %v12587_v20, 1  ;;  %v12700_v20 = vld [vmem:[%s12344_s26 + $0x7c] sm:$0xf] }
  0x61   : > { %10465 = vmatprep.mubr.msk.bf16.mxu0 %vm12212_vm3, %v14301_v2  ;;  %10471 = vmatprep.mubr.msk.bf16.mxu1 %vm12212_vm3, %v14301_v2  ;;  %v12671_v21 = vrot.slane %v1825_v57, 1  ;;  %v9517_v57 = vcombine.low %v2357_v51, %v12526_v46  ;;  %v2528_v46 = vrot.slane %v9515_v49, 1  ;;  %v9519_v49 = vcombine.low %v2358_v10, %v12534_v53  ;;  %v2363_v51 = vld [vmem:[%s12344_s26 + $0x78] sm:$0xe]  ;;  %v2364_v10 = vld [vmem:[%s12344_s26 + $0x84] sm:$0xe] }
  0x62   : > { %10475 = vmatprep.subr.bf16.mxu0 %v14301_v2  ;;  %10481 = vmatprep.subr.bf16.mxu1 %v14301_v2  ;;  %v12666_v55 = vrot.slane %v1761_v52, 1  ;;  %v12680_v52 = vld [vmem:[%s12344_s26 + $0x80] ss:$0 sps:$4 sm:$0x11]  }
  0x63   : > { %v2578_v18 = vrot.slane %v9517_v57, 1  ;;  %v2879_v53 = vrot.slane %v12680_v52, 1  ;;  %v12738_v57 = vld [vmem:[%s12344_s26 + $0x98] ss:$0 sps:$4 sm:$0x11]   ;;  %v2628_v0 = vrot.slane %v9519_v49, 1 }
  0x65   : > { %v12743_v34 = vsel %vm2374_vm5, %v2578_v18, %v2579_v58  ;;  %v2367_v18 = vld [vmem:[%s12344_s26 + $0xa8] sm:$0xe] }
  0x67   : > { %10466 = vmatmul.mubr.msk.bf16.vlgmr.msra.gmra.mrb[20].mxu0 %vm427_vm2, %v11916_v35  ;;  %10472 = vmatmul.mubr.msk.bf16.vlgmr.msra.gmra.mrb[20].mxu1 %vm427_vm2, %v11917_v36  ;;  %v1692_v35 = vshll.u32 %v12576_v11, 16  ;;  %v1697_v36 = vshll.u32 %v12579_v12, 16 }
  0x68   : > { %10476 = vmatpush3.bf16.msra.mxu0 %v12396_v3  ;;  %10482 = vmatpush3.bf16.msra.mxu1 %v12396_v3 }
  0x69   : > { %10477 = vmatprep.mubr.msk.bf16.mxu0 %vm12212_vm3, %v14301_v2  ;;  %10483 = vmatprep.mubr.msk.bf16.mxu1 %vm12212_vm3, %v14301_v2 }
  0x6a   : > { %10487 = vmatprep.subr.bf16.mxu0 %v14301_v2  ;;  %10493 = vmatprep.subr.bf16.mxu1 %v14301_v2 }
  0x6f   : > { %10478 = vmatmul.mubr.msk.bf16.vlgmr.msra.gmra.mrb[24].mxu0 %vm427_vm2, %v11918_v1  ;;  %10484 = vmatmul.mubr.msk.bf16.vlgmr.msra.gmra.mrb[24].mxu1 %vm427_vm2, %v11919_v4  ;;  %v12642_v1 = vrot.slane %v1692_v35, 1  ;;  %v12644_v4 = vrot.slane %v1697_v36, 1  ;;  %v2354_v35 = vld [vmem:[%s12344_s26 + $0xc] sm:$0xe]  ;;  %v2368_v36 = vld [vmem:[%s12344_s26 + $0xb4] sm:$0xe] }
  0x70   : > { %10488 = vmatpush3.bf16.msra.mxu0 %v12396_v3  ;;  %10494 = vmatpush3.bf16.msra.mxu1 %v12396_v3  ;;  %v12635_v3 = vrot.slane %v1633_v27, 1  ;;  %v2353_v27 = vld [vmem:[%s12344_s26] sm:$0xe]  ;;  %v9511_v25 = vcombine.low %v2354_v35, %v12452_v15  ;;  %v2359_v35 = vld [vmem:[%s12344_s26 + $0x48] sm:$0xe] }
  0x71   : > { %10489 = vmatprep.mubr.msk.bf16.mxu0 %vm12212_vm3, %v14301_v2  ;;  %10495 = vmatprep.mubr.msk.bf16.mxu1 %vm12212_vm3, %v14301_v2  ;;  %v9509_v9 = vcombine.low %v2353_v27, %v12446_v13  ;;  %v9521_v39 = vcombine.low %v2359_v35, %v12546_v59  ;;  %v9531_v59 = vcombine.low %v2364_v10, %v12722_v17  ;;  %v2366_v35 = vld [vmem:[%s12344_s26 + $0x9c] sm:$0xe]  ;;  %v2778_v10 = vrot.slane %v9525_v43, 1 }
  0x72   : > { %10499 = vmatprep.subr.bf16.mxu0 %v14301_v2  ;;  %10505 = vmatprep.subr.bf16.mxu1 %v14301_v2  ;;  %v2428_v27 = vrot.slane %v9511_v25, 1  ;;  %v12703_v25 = vld [vmem:[%s12344_s26 + $0x8c] ss:$0 sps:$4 sm:$0x11]  }
  0x73   : > { %v2375_v15 = vrot.slane %v9509_v9, 1  ;;  %v2362_v9 = vld [vmem:[%s12344_s26 + $0x6c] sm:$0xe]  ;;  %v2678_v49 = vrot.slane %v9521_v39, 1  ;;  %v2929_v13 = vrot.slane %v12703_v25, 1 }
  0x74   : > { %v9527_v58 = vcombine.low %v2362_v9, %v12618_v45  ;;  %v12772_v45 = vld [vmem:[%s12344_s26 + $0xac] sm:$0xf]  ;;  %v12775_v9 = vld [vmem:[%s12344_s26 + $0xb0] ss:$0 sps:$4 sm:$0x11]  }
  0x75   : > { %v12708_v33 = vsel %vm2374_vm5, %v2375_v15, %v2376_v40  ;;  %v12732_v40 = vsel %vm2374_vm5, %v2528_v46, %v2529_v37  ;;  %v2365_v15 = vld [vmem:[%s12344_s26 + $0x90] sm:$0xe]  ;;  %v9529_v46 = vcombine.low %v2363_v51, %v12700_v20  ;;  %v12778_v51 = vld [vmem:[%s12344_s26 + $0xbc] ss:$0 sps:$4 sm:$0x11]  }
  0x76   : > { %v12785_v39 = vld [vmem:[%s12344_s26 + $0xb8] sm:$0xf] }
  0x77   : > { %10490 = vmatmul.mubr.msk.bf16.vlgmr.msra.gmra.mrb[28].mxu0 %vm427_vm2, %v11920_v48  ;;  %10496 = vmatmul.mubr.msk.bf16.vlgmr.msra.gmra.mrb[28].mxu1 %vm427_vm2, %v11921_v54  ;;  %v2360_v48 = vld [vmem:[%s12344_s26 + $0x54] sm:$0xe]  ;;  %v2779_v54 = vrot.slane %v12600_v31, 1  ;;  %v12713_v31 = vsel %vm2374_vm5, %v2428_v27, %v2429_v47  ;;  %v2829_v47 = vrot.slane %v12650_v6, 1 }
  0x78   : > { %10500 = vmatpush3.bf16.msra.mxu0 %v12493_v30  ;;  %10506 = vmatpush3.bf16.msra.mxu1 %v12493_v30  ;;  %v9523_v37 = vcombine.low %v2360_v48, %v12569_v7  ;;  %v12749_v27 = vld [vmem:[%s12344_s26 + $0x94] sm:$0xf]  ;;  %v14316_v7 = vrot.slane %v12558_v63, 1  ;;  %v2828_v63 = vrot.slane %v9527_v58, 1  ;;  %v2979_v58 = vrot.slane %v12738_v57, 1 }
  0x79   : > { %10501 = vmatprep.mubr.msk.bf16.mxu0 %vm12212_vm3, %v14301_v2  ;;  %10507 = vmatprep.mubr.msk.bf16.mxu1 %vm12212_vm3, %v14301_v2  ;;  %v9533_v43 = vcombine.low %v2365_v15, %v12749_v27 }
  0x7a   : > { %10511 = vmatprep.subr.bf16.mxu0 %v14301_v2  ;;  %10517 = vmatprep.subr.bf16.mxu1 %v14301_v2  ;;  %v12763_v48 = vsel %vm2374_vm5, %v2628_v0, %v14316_v7  ;;  %v2728_v8 = vrot.slane %v9523_v37, 1  ;;  %v2878_v2 = vrot.slane %v9529_v46, 1  ;;  %v2928_v0 = vrot.slane %v9531_v59, 1 }
  0x7b   : > { %14317 = vst [vmem:[#allocation17_spill] sm:$0xff] %v12763_v48  ;;  %v14318_v37 = vrot.slane %v12579_v12, 1  ;;  %v2978_v46 = vrot.slane %v9533_v43, 1  ;;  %v3079_v59 = vrot.slane %v12775_v9, 1 }
  0x7c   : > { %v12793_v48 = vsel %vm2374_vm5, %v2728_v8, %v2729_v26  ;;  %v12806_v12 = vsel %vm2374_vm5, %v2878_v2, %v2879_v53  ;;  %v3029_v8 = vrot.slane %v12752_v29, 1  ;;  %v14319_v26 = vmov 0.0  }
  0x7d   : > { %v12790_v7 = vsel %vm2374_vm5, %v2678_v49, %v14318_v37  ;;  %v12814_v15 = vsel %vm2374_vm5, %v2928_v0, %v2929_v13  ;;  %v14320_v2 = vshll.u32 %v12627_v38, 16  ;;  %v9539_v49 = vcombine.low %v2368_v36, %v12785_v39 }
  0x7e   : > { %v12826_v13 = vcombine.low %v1273_v28, %v12700_v20  ;;  %v1444_v0 = vsel %vm1301_vm4, %v12656_v14, %v12552_v61  ;;  %v1508_v37 = vsel %vm1301_vm4, %v12658_v22, %v12581_v16  ;;  %v14321_v36 = vshll.u32 %v12647_v5, 16 }
  0x7f   : > { %10502 = vmatmul.mubr.msk.bf16.vlgmr.msra.gmra.mrb[0].mxu0 %vm427_vm2, %v12611_v41  ;;  %10508 = vmatmul.mubr.msk.bf16.vlgmr.msra.gmra.mrb[0].mxu1 %vm427_vm2, %v12614_v42  ;;  %v12800_v41 = vsel %vm2374_vm5, %v2778_v10, %v2779_v54  ;;  %v12803_v42 = vsel %vm2374_vm5, %v2828_v63, %v2829_v47  ;;  %v9535_v54 = vcombine.low %v2366_v35, %v12769_v60  ;;  %v1822_v53 = vrot.slane %v14320_v2, 1 }
  0x80   : > { %10512 = vmatpush3.bf16.msra.mxu0 %v12493_v30  ;;  %10518 = vmatpush3.bf16.msra.mxu1 %v12493_v30  ;;  %v9537_v47 = vcombine.low %v2367_v18, %v12772_v45  ;;  %v3129_v10 = vrot.slane %v12778_v51, 1  ;;  %v12829_v35 = vsel %vm2374_vm5, %v2978_v46, %v2979_v58  ;;  %v1886_v43 = vrot.slane %v14321_v36, 1 }
  0x81   : > { %10513 = vmatprep.mubr.msk.bf16.mxu0 %vm12212_vm3, %v14319_v26  ;;  %10519 = vmatprep.mubr.msk.bf16.mxu1 %vm12212_vm3, %v14319_v26  ;;  %v3028_v18 = vrot.slane %v9535_v54, 1  ;;  %v3128_v2 = vrot.slane %v9539_v49, 1  ;;  %v14322_v20 = vshll.u32 %v12650_v6, 16  ;;  %v1946_v58 = vshrl.u32 %v12826_v13, 16 }
  0x82   : > { %10523 = vmatprep.subr.bf16.mxu0 %v14319_v26  ;;  %10529 = vmatprep.subr.bf16.mxu1 %v14319_v26  ;;  %v3078_v63 = vrot.slane %v9537_v47, 1  ;;  %v14323_v16 = vshrl.u32 %v12539_v56, 16  ;;  %v14324_v14 = vshrl.u32 %v12555_v62, 16  ;;  %v1948_v47 = vshll.u32 %v12826_v13, 16 }
  0x83   : > { %v1891_v28 = vrot.slane %v14322_v20, 1  ;;  %v12843_v46 = vsel %vm2374_vm5, %v3028_v18, %v3029_v8  ;;  %v12849_v61 = vsel %vm2374_vm5, %v3128_v2, %v3129_v10  ;;  %v1276_v8 = vld [vmem:[%s12344_s26 + $0x84] sm:$0xf]  ;;  %v2081_v2 = vshll.u32 %v12738_v57, 16 }
  0x84   : > { %v12846_v54 = vsel %vm2374_vm5, %v3078_v63, %v3079_v59  ;;  %v1567_v6 = vor.u32 %v12602_v32, %v14323_v16  ;;  %v1631_v22 = vor.u32 %v12622_v50, %v14324_v14  ;;  %v1953_v59 = vshll.u32 %v12680_v52, 16 }
  0x85   : > { %v1950_v32 = vrot.slane %v1948_v47, 1  ;;  %v9493_v49 = vcombine.low %v1276_v8, %v12722_v17  ;;  %v14325_v52 = vshrl.u32 %v12576_v11, 16  ;;  %v2017_v63 = vshll.u32 %v12703_v25, 16 }
  0x86   : > { %v1572_v56 = vsel %vm1301_vm4, %v1567_v6, %v12584_v19  ;;  %v1636_v62 = vsel %vm1301_vm4, %v1631_v22, %v12635_v3  ;;  %v1955_v50 = vrot.slane %v1953_v59, 1  ;;  %v14326_v3 = vshrl.u32 %v12592_v23, 16  ;;  %v1285_v6 = vld [vmem:[%s12344_s26 + $0xa8] sm:$0xf] }
  0x87   : > { %10514 = vmatmul.mubr.msk.bf16.vlgmr.msra.gmra.mrb[4].mxu0 %vm427_vm2, %v1444_v0  ;;  %10520 = vmatmul.mubr.msk.bf16.vlgmr.msra.gmra.mrb[4].mxu1 %vm427_vm2, %v1508_v37  ;;  %v1695_v19 = vor.u32 %v12642_v1, %v14325_v52  ;;  %v2010_v17 = vshrl.u32 %v9493_v49, 16  ;;  %v2012_v13 = vshll.u32 %v9493_v49, 16  ;;  %v1279_v1 = vld [vmem:[%s12344_s26 + $0x90] sm:$0xf]  ;;  %v14327_v0 = vshrl.u32 %v12627_v38, 16 }
  0x88   : > { %10524 = vmatpush3.bf16.msra.mxu0 %v12493_v30  ;;  %10530 = vmatpush3.bf16.msra.mxu1 %v12493_v30  ;;  %v1759_v10 = vor.u32 %v12664_v44, %v14326_v3  ;;  %v1282_v44 = vld [vmem:[%s12344_s26 + $0x9c] sm:$0xf]  ;;  %v14328_v37 = vshrl.u32 %v12647_v5, 16  ;;  %v2019_v25 = vrot.slane %v2017_v63, 1  ;;  %v9496_v36 = vcombine.low %v1279_v1, %v12749_v27  ;;  %v9606_v63 = vld [vmem:[%s12344_s26 + $0xc] sm:$0xf] }
  0x89   : > { %10525 = vmatprep.mubr.msk.bf16.mxu0 %vm12212_vm3, %v14319_v26  ;;  %10531 = vmatprep.mubr.msk.bf16.mxu1 %vm12212_vm3, %v14319_v26  ;;  %v1700_v11 = vsel %vm1301_vm4, %v1695_v19, %v12644_v4  ;;  %v2014_v18 = vrot.slane %v2012_v13, 1  ;;  %v1823_v4 = vor.u32 %v1822_v53, %v14327_v0  ;;  %v9499_v20 = vcombine.low %v1282_v44, %v12769_v60  ;;  %v13123_v0 = vld [vmem:[%s12344_s26 + $0x10] sm:$0xf] }
  0x8a   : > { %10535 = vmatprep.subr.bf16.mxu0 %v14319_v26  ;;  %10541 = vmatprep.subr.bf16.mxu1 %v14319_v26  ;;  %v1764_v23 = vsel %vm1301_vm4, %v1759_v10, %v12666_v55  ;;  %v1887_v55 = vor.u32 %v1886_v43, %v14328_v37  ;;  %v2076_v53 = vshll.u32 %v9496_v36, 16  ;;  %v1951_v16 = vor.u32 %v1950_v32, %v1946_v58  ;;  %v13129_v37 = vld [vmem:[%s12344_s26 + $0x1c] sm:$0xf] }
  0x8b   : > { %v1828_v38 = vsel %vm1301_vm4, %v1823_v4, %v12671_v21  ;;  %v2140_v43 = vshll.u32 %v9499_v20, 16  ;;  %v2015_v57 = vor.u32 %v2014_v18, %v2010_v17  ;;  %v1288_v21 = vld [vmem:[%s12344_s26 + $0xb4] sm:$0xf]  ;;  %v2074_v60 = vshrl.u32 %v9496_v36, 16  ;;  %v9609_v4 = vld [vmem:[%s12344_s26 + $0x18] sm:$0xf] }
  0x8c   : > { %v1892_v5 = vsel %vm1301_vm4, %v1887_v55, %v1891_v28  ;;  %v1956_v27 = vsel %vm1301_vm4, %v1951_v16, %v1955_v50  ;;  %v2078_v28 = vrot.slane %v2076_v53, 1  ;;  %v2138_v58 = vshrl.u32 %v9499_v20, 16  ;;  %v11983_v36 = vld [vmem:[%s12344_s26 + $0xa8] sm:$0xff]   ;;  %v13142_v20 = vld [vmem:[%s12344_s26 + $0x14] ss:$0 sps:$4 sm:$0x11]  }
  0x8d   : > { %v9502_v14 = vcombine.low %v1285_v6, %v12772_v45  ;;  %v2020_v22 = vsel %vm1301_vm4, %v2015_v57, %v2019_v25  ;;  %v2142_v8 = vrot.slane %v2140_v43, 1  ;;  %v2145_v47 = vshll.u32 %v12752_v29, 16  ;;  %v11982_v25 = vld [vmem:[%s12344_s26 + $0x9c] sm:$0xff]   ;;  %v9612_v43 = vld [vmem:[%s12344_s26 + $0x24] sm:$0xf] }
  0x8e   : > { %v9505_v59 = vcombine.low %v1288_v21, %v12785_v39  ;;  %v2209_v19 = vshll.u32 %v12775_v9, 16  ;;  %v2273_v13 = vshll.u32 %v12778_v51, 16  ;;  %v9508_v9 = vld [vmem:[%s12349_s24 + $0x8] sm:$0xf]  ;;  %v9655_v55 = vcombine.low %v9606_v63, %v13123_v0  ;;  %v9615_v57 = vld [vmem:[%s12344_s26 + $0x30] sm:$0xf] }
  0x8f   : > { %10526 = vmatmul.mubr.msk.bf16.vlgmr.msra.gmra.mrb[8].mxu0 %vm427_vm2, %v1572_v56  ;;  %10532 = vmatmul.mubr.msk.bf16.vlgmr.msra.gmra.mrb[8].mxu1 %vm427_vm2, %v1636_v62  ;;  %v2079_v56 = vor.u32 %v2078_v28, %v2074_v60  ;;  %v2083_v62 = vrot.slane %v2081_v2, 1  ;;  %v2204_v32 = vshll.u32 %v9502_v14, 16  ;;  %v2143_v50 = vor.u32 %v2142_v8, %v2138_v58  ;;  %v13153_v16 = vld [vmem:[%s12344_s26 + $0x28] sm:$0xf]  ;;  %v13162_v21 = vld [vmem:[%s12344_s26 + $0x34] sm:$0xf] }
  0x90   : > { %10536 = vmatpush3.bf16.msra.mxu0 %v12493_v30  ;;  %10542 = vmatpush3.bf16.msra.mxu1 %v12493_v30  ;;  %v2147_v45 = vrot.slane %v2145_v47, 1  ;;  %v2268_v49 = vshll.u32 %v9505_v59, 16  ;;  %v2202_v39 = vshrl.u32 %v9502_v14, 16  ;;  %v2266_v10 = vshrl.u32 %v9505_v59, 16  ;;  %v11984_v58 = vld [vmem:[%s12344_s26 + $0xb4] sm:$0xff]   ;;  %v11985_v14 = vld [vmem:[%s12344_s26 + $0xc0] sm:$0xff]  }
  0x91   : > { %10537 = vmatprep.mubr.msk.bf16.mxu0 %vm12212_vm3, %v14319_v26  ;;  %10543 = vmatprep.mubr.msk.bf16.mxu1 %vm12212_vm3, %v14319_v26  ;;  %v2084_v29 = vsel %vm1301_vm4, %v2079_v56, %v2083_v62  ;;  %v2206_v52 = vrot.slane %v2204_v32, 1  ;;  %v2275_v44 = vrot.slane %v2273_v13, 1  ;;  %v9658_v2 = vcombine.low %v9609_v4, %v13129_v37  ;;  %v13191_v13 = vld [vmem:[%s12344_s26 + $0x4c] sm:$0xf] }
  0x92   : > { %10547 = vmatprep.subr.bf16.mxu0 %v14319_v26  ;;  %10553 = vmatprep.subr.bf16.mxu1 %v14319_v26  ;;  %v2148_v3 = vsel %vm1301_vm4, %v2143_v50, %v2147_v45  ;;  %v2270_v17 = vrot.slane %v2268_v49, 1  ;;  %v4127_v6 = vshll.u32 %v13142_v20, 16  ;;  %v4120_v60 = vshrl.u32 %v9655_v55, 16  ;;  %v13176_v45 = vld [vmem:[%s12344_s26 + $0x2c] ss:$0 sps:$4 sm:$0x11]  }
  0x93   : > { %v4189_v53 = vshll.u32 %v9658_v2, 16  ;;  %v9661_v59 = vcombine.low %v9612_v43, %v13153_v16  ;;  %v9664_v56 = vcombine.low %v9615_v57, %v13162_v21  ;;  %v13179_v49 = vld [vmem:[%s12344_s26 + $0x38] ss:$0 sps:$4 sm:$0x11]  }
  0x94   : > { %v2271_v1 = vor.u32 %v2270_v17, %v2266_v10  ;;  %v4129_v32 = vrot.slane %v4127_v6, 1  ;;  %v9621_v17 = vld [vmem:[%s12344_s26 + $0x48] sm:$0xf] }
  0x95   : > { %v4191_v8 = vrot.slane %v4189_v53, 1  ;;  %v4317_v10 = vshll.u32 %v9664_v56, 16 }
  0x96   : > { %v2276_v18 = vsel %vm1301_vm4, %v2271_v1, %v2275_v44  ;;  %v4251_v44 = vshrl.u32 %v9661_v59, 16 }
  0x97   : > { %10538 = vmatmul.mubr.msk.bf16.vlgmr.msra.gmra.mrb[12].mxu0 %vm427_vm2, %v1700_v11  ;;  %10544 = vmatmul.mubr.msk.bf16.vlgmr.msra.gmra.mrb[12].mxu1 %vm427_vm2, %v1764_v23  ;;  %v2207_v11 = vor.u32 %v2206_v52, %v2202_v39  ;;  %v2211_v23 = vrot.slane %v2209_v19, 1  ;;  %v4253_v52 = vshll.u32 %v9661_v59, 16  ;;  %v9618_v19 = vld [vmem:[%s12344_s26 + $0x3c] sm:$0xf]  ;;  %v9633_v59 = vld [vmem:[%s12344_s26 + $0x78] sm:$0xf] }
  0x98   : > { %10548 = vmatpush3.bf16.msra.mxu0 %v12493_v30  ;;  %10554 = vmatpush3.bf16.msra.mxu1 %v12493_v30 }
  0x99   : > { %10549 = vmatprep.mubr.msk.bf16.mxu0 %vm12212_vm3, %v14319_v26  ;;  %10555 = vmatprep.mubr.msk.bf16.mxu1 %vm12212_vm3, %v14319_v26  ;;  %v2212_v51 = vsel %vm1301_vm4, %v2207_v11, %v2211_v23 }
  0x9a   : > { %10559 = vmatprep.subr.bf16.mxu0 %v14319_v26  ;;  %10565 = vmatprep.subr.bf16.mxu1 %v14319_v26 }
  0x9f   : > { %10550 = vmatmul.mubr.msk.bf16.vlgmr.msra.gmra.mrb[16].mxu0 %vm427_vm2, %v1828_v38  ;;  %10556 = vmatmul.mubr.msk.bf16.vlgmr.msra.gmra.mrb[16].mxu1 %vm427_vm2, %v1892_v5  ;;  %v4122_v38 = vshll.u32 %v9655_v55, 16  ;;  %v13147_v5 = vld [vmem:[%s12344_s26 + $0x20] ss:$0 sps:$4 sm:$0x11]  }
  0xa0   : > { %10560 = vmatpush3.bf16.msra.mxu0 %v12493_v30  ;;  %10566 = vmatpush3.bf16.msra.mxu1 %v12493_v30  ;;  %v4194_v47 = vshll.u32 %v13147_v5, 16 }
  0xa1   : > { %10561 = vmatprep.mubr.msk.bf16.mxu0 %vm12212_vm3, %v14319_v26  ;;  %10567 = vmatprep.mubr.msk.bf16.mxu1 %vm12212_vm3, %v14319_v26  ;;  %v4124_v28 = vrot.slane %v4122_v38, 1 }
  0xa2   : > { %10571 = vmatprep.subr.bf16.mxu0 %v14319_v26  ;;  %10577 = vmatprep.subr.bf16.mxu1 %v14319_v26  ;;  %v4196_v39 = vrot.slane %v4194_v47, 1 }
  0xa3   : > { %v4125_v50 = vor.u32 %v4124_v28, %v4120_v60  ;;  %v13239_v60 = vld [vmem:[%s12344_s26 + $0x68] ss:$0 sps:$4 sm:$0x11]  }
  0xa5   : > { %v4130_v11 = vsel %vm1301_vm4, %v4125_v50, %v4129_v32 }
  0xa7   : > { %10562 = vmatmul.mubr.msk.bf16.vlgmr.msra.gmra.mrb[20].mxu0 %vm427_vm2, %v1956_v27  ;;  %10568 = vmatmul.mubr.msk.bf16.vlgmr.msra.gmra.mrb[20].mxu1 %vm427_vm2, %v2020_v22  ;;  %v9654_v27 = vld [vmem:[%s12349_s24 + $0x10] sm:$0xf]  ;;  %v4187_v22 = vshrl.u32 %v9658_v2, 16 }
  0xa8   : > { %10572 = vmatpush3.bf16.msra.mxu0 %v12493_v30  ;;  %10578 = vmatpush3.bf16.msra.mxu1 %v12493_v30  ;;  %v13173_v62 = vsel %vm431_vm1, %v9654_v27, 0  ;;  %v13236_v27 = vld [vmem:[%s12344_s26 + $0x5c] ss:$0 sps:$4 sm:$0x11]  }
  0xa9   : > { %10573 = vmatprep.mubr.msk.bf16.mxu0 %vm12212_vm3, %v14319_v26  ;;  %10579 = vmatprep.mubr.msk.bf16.mxu1 %vm12212_vm3, %v14319_v26 }
  0xaa   : > { %10583 = vmatprep.subr.bf16.mxu0 %v14319_v26  ;;  %10589 = vmatprep.subr.bf16.mxu1 %v14319_v26 }
  0xaf   : > { %10574 = vmatmul.mubr.msk.bf16.vlgmr.msra.gmra.mrb[24].mxu0 %vm427_vm2, %v2084_v29  ;;  %10580 = vmatmul.mubr.msk.bf16.vlgmr.msra.gmra.mrb[24].mxu1 %vm427_vm2, %v2148_v3  ;;  %v4192_v29 = vor.u32 %v4191_v8, %v4187_v22  ;;  %v13185_v3 = vld [vmem:[%s12344_s26 + $0x40] sm:$0xf]  ;;  %v9630_v22 = vld [vmem:[%s12344_s26 + $0x6c] sm:$0xf]  ;;  %v13245_v8 = vld [vmem:[%s12344_s26 + $0x70] sm:$0xf] }
  0xb0   : > { %10584 = vmatpush3.bf16.msra.mxu0 %v12493_v30  ;;  %10590 = vmatpush3.bf16.msra.mxu1 %v12493_v30  ;;  %v2382_v30 = vsel %vm431_vm1, %v9508_v9, 0  ;;  %v9667_v23 = vcombine.low %v9618_v19, %v13185_v3  ;;  %v4255_v9 = vrot.slane %v4253_v52, 1  ;;  %v9679_v50 = vcombine.low %v9630_v22, %v13245_v8 }
  0xb1   : > { %10585 = vmatprep.mubr.msk.bf16.mxu0 %vm12212_vm3, %v14319_v26  ;;  %10591 = vmatprep.mubr.msk.bf16.mxu1 %vm12212_vm3, %v14319_v26  ;;  %v4197_v1 = vsel %vm1301_vm4, %v4192_v29, %v4196_v39 }
  0xb2   : > { %10595 = vmatprep.subr.bf16.mxu0 %v14319_v26  ;;  %10601 = vmatprep.subr.bf16.mxu1 %v14319_v26  ;;  %v4379_v63 = vshrl.u32 %v9667_v23, 16 }
  0xb7   : > { %10586 = vmatmul.mubr.msk.bf16.vlgmr.msra.gmra.mrb[28].mxu0 %vm427_vm2, %v2212_v51  ;;  %10592 = vmatmul.mubr.msk.bf16.vlgmr.msra.gmra.mrb[28].mxu1 %vm427_vm2, %v2276_v18  ;;  %v9670_v51 = vcombine.low %v9621_v17, %v13191_v13  ;;  %v4258_v18 = vshll.u32 %v13176_v45, 16 }
  0xb8   : > { %10596 = vmatpush3.bf16.msra.mxu0 %v2382_v30  ;;  %10602 = vmatpush3.bf16.msra.mxu1 %v2382_v30 }
  0xb9   : > { %10597 = vmatprep.mubr.msk.bf16.mxu0 %vm12212_vm3, %v14319_v26  ;;  %10603 = vmatprep.mubr.msk.bf16.mxu1 %vm12212_vm3, %v14319_v26  ;;  %v4443_v55 = vshrl.u32 %v9670_v51, 16 }
  0xba   : > { %10607 = vmatprep.subr.bf16.mxu0 %v14319_v26  ;;  %10613 = vmatprep.subr.bf16.mxu1 %v14319_v26 }
  0xbf   : > { %10598 = vmatmul.mubr.msk.bf16.vlgmr.msra.gmra.mrb[0].mxu0 %vm427_vm2, %v12708_v33  ;;  %10604 = vmatmul.mubr.msk.bf16.vlgmr.msra.gmra.mrb[0].mxu1 %vm427_vm2, %v12713_v31  ;;  %v14329_v33 = vld [vmem:[#allocation17_spill] sm:$0xff]  ;;  %v9573_v31 = vld [vmem:[%s12349_s24 + $0xc] sm:$0xf] }
  0xc0   : > { %10608 = vmatpush3.bf16.msra.mxu0 %v2382_v30  ;;  %10614 = vmatpush3.bf16.msra.mxu1 %v2382_v30 }
  0xc1   : > { %10609 = vmatprep.mubr.msk.bf16.mxu0 %vm12212_vm3, %v14319_v26  ;;  %10615 = vmatprep.mubr.msk.bf16.mxu1 %vm12212_vm3, %v14319_v26 }
  0xc2   : > { %10619 = vmatprep.subr.bf16.mxu0 %v14319_v26  ;;  %10625 = vmatprep.subr.bf16.mxu1 %v14319_v26 }
  0xc7   : > { %10610 = vmatmul.mubr.msk.bf16.vlgmr.msra.gmra.mrb[4].mxu0 %vm427_vm2, %v12727_v24  ;;  %10616 = vmatmul.mubr.msk.bf16.vlgmr.msra.gmra.mrb[4].mxu1 %vm427_vm2, %v12732_v40  ;;  %v13043_v24 = vsel %vm431_vm1, %v9573_v31, 0  ;;  %v11970_v40 = vld [vmem:[%s12344_s26 + $0xc] sm:$0xff]   ;;  %v4322_v31 = vshll.u32 %v13179_v49, 16 }
  0xc8   : > { %10620 = vmatpush3.bf16.msra.mxu0 %v2382_v30  ;;  %10626 = vmatpush3.bf16.msra.mxu1 %v2382_v30 }
  0xc9   : > { %10621 = vmatprep.mubr.msk.bf16.mxu0 %vm12212_vm3, %v14319_v26  ;;  %10627 = vmatprep.mubr.msk.bf16.mxu1 %vm12212_vm3, %v14319_v26 }
  0xca   : > { %10631 = vmatprep.subr.bf16.mxu0 %v14319_v26  ;;  %10637 = vmatprep.subr.bf16.mxu1 %v14319_v26 }
  0xcf   : > { %10622 = vmatmul.mubr.msk.bf16.vlgmr.msra.gmra.mrb[8].mxu0 %vm427_vm2, %v12743_v34  ;;  %10628 = vmatmul.mubr.msk.bf16.vlgmr.msra.gmra.mrb[8].mxu1 %vm427_vm2, %v14329_v33  ;;  %v11971_v34 = vld [vmem:[%s12344_s26 + $0x18] sm:$0xff]   ;;  %v4319_v33 = vrot.slane %v4317_v10, 1  ;;  %v4514_v10 = vshll.u32 %v13236_v27, 16 }
  0xd0   : > { %10632 = vmatpush3.bf16.msra.mxu0 %v2382_v30  ;;  %10638 = vmatpush3.bf16.msra.mxu1 %v2382_v30 }
  0xd1   : > { %10633 = vmatprep.mubr.msk.bf16.mxu0 %vm12212_vm3, %v14319_v26  ;;  %10639 = vmatprep.mubr.msk.bf16.mxu1 %vm12212_vm3, %v14319_v26 }
  0xd2   : > { %10643 = vmatprep.subr.bf16.mxu0 %v14319_v26  ;;  %10649 = vmatprep.subr.bf16.mxu1 %v14319_v26 }
  0xd7   : > { %10634 = vmatmul.mubr.msk.bf16.vlgmr.msra.gmra.mrb[12].mxu0 %vm427_vm2, %v12790_v7  ;;  %10640 = vmatmul.mubr.msk.bf16.vlgmr.msra.gmra.mrb[12].mxu1 %vm427_vm2, %v12793_v48  ;;  %v11972_v48 = vld [vmem:[%s12344_s26 + $0x24] sm:$0xff]   ;;  %v11973_v7 = vld [vmem:[%s12344_s26 + $0x30] sm:$0xff]  }
  0xd8   : > { %10644 = vmatpush3.bf16.msra.mxu0 %v2382_v30  ;;  %10650 = vmatpush3.bf16.msra.mxu1 %v2382_v30 }
  0xd9   : > { %10645 = vmatprep.mubr.msk.bf16.mxu0 %vm12212_vm3, %v14319_v26  ;;  %10651 = vmatprep.mubr.msk.bf16.mxu1 %vm12212_vm3, %v14319_v26 }
  0xda   : > { %10655 = vmatprep.subr.bf16.mxu0 %v14319_v26  ;;  %10661 = vmatprep.subr.bf16.mxu1 %v14319_v26 }
  0xdf   : > { %10646 = vmatmul.mubr.msk.bf16.vlgmr.msra.gmra.mrb[16].mxu0 %vm427_vm2, %v12800_v41  ;;  %10652 = vmatmul.mubr.msk.bf16.vlgmr.msra.gmra.mrb[16].mxu1 %vm427_vm2, %v12803_v42  ;;  %v11974_v41 = vld [vmem:[%s12344_s26 + $0x3c] sm:$0xff]   ;;  %v11975_v42 = vld [vmem:[%s12344_s26 + $0x48] sm:$0xff]  }
  0xe0   : > { %10656 = vmatpush3.bf16.msra.mxu0 %v2382_v30  ;;  %10662 = vmatpush3.bf16.msra.mxu1 %v2382_v30 }
  0xe1   : > { %10657 = vmatprep.mubr.msk.bf16.mxu0 %vm12212_vm3, %v14319_v26  ;;  %10663 = vmatprep.mubr.msk.bf16.mxu1 %vm12212_vm3, %v14319_v26 }
  0xe2   : > { %10667 = vmatprep.subr.bf16.mxu0 %v14319_v26  ;;  %10673 = vmatprep.subr.bf16.mxu1 %v14319_v26 }
  0xe7   : > { %10658 = vmatmul.mubr.msk.bf16.vlgmr.msra.gmra.mrb[20].mxu0 %vm427_vm2, %v12806_v12  ;;  %10664 = vmatmul.mubr.msk.bf16.vlgmr.msra.gmra.mrb[20].mxu1 %vm427_vm2, %v12814_v15  ;;  %v11976_v12 = vld [vmem:[%s12344_s26 + $0x54] sm:$0xff]   ;;  %v11977_v15 = vld [vmem:[%s12344_s26 + $0x60] sm:$0xff]  }
  0xe8   : > { %10668 = vmatpush3.bf16.msra.mxu0 %v2382_v30  ;;  %10674 = vmatpush3.bf16.msra.mxu1 %v2382_v30 }
  0xe9   : > { %10669 = vmatprep.mubr.msk.bf16.mxu0 %vm12212_vm3, %v14319_v26  ;;  %10675 = vmatprep.mubr.msk.bf16.mxu1 %vm12212_vm3, %v14319_v26 }
  0xea   : > { %10679 = vmatprep.subr.bf16.mxu0 %v14319_v26  ;;  %10685 = vmatprep.subr.bf16.mxu1 %v14319_v26 }
  0xef   : > { %10670 = vmatmul.mubr.msk.bf16.vlgmr.msra.gmra.mrb[24].mxu0 %vm427_vm2, %v12829_v35  ;;  %10676 = vmatmul.mubr.msk.bf16.vlgmr.msra.gmra.mrb[24].mxu1 %vm427_vm2, %v12843_v46  ;;  %v11978_v35 = vld [vmem:[%s12344_s26 + $0x6c] sm:$0xff]   ;;  %v11979_v46 = vld [vmem:[%s12344_s26 + $0x78] sm:$0xff]  }
  0xf0   : > { %10680 = vmatpush3.bf16.msra.mxu0 %v2382_v30  ;;  %10686 = vmatpush3.bf16.msra.mxu1 %v2382_v30  ;;  %v4315_v30 = vshrl.u32 %v9664_v56, 16  ;;  %v13251_v56 = vld [vmem:[%s12344_s26 + $0x7c] sm:$0xf] }
  0xf1   : > { %10681 = vmatprep.mubr.msk.bf16.mxu0 %vm12212_vm3, %v14319_v26  ;;  %10687 = vmatprep.mubr.msk.bf16.mxu1 %vm12212_vm3, %v14319_v26  ;;  %v9682_v19 = vcombine.low %v9633_v59, %v13251_v56  ;;  %v13311_v59 = vld [vmem:[%s12344_s26 + $0xac] sm:$0xf] }
  0xf2   : > { %10691 = vmatprep.subr.bf16.mxu0 %v14319_v26  ;;  %10697 = vmatprep.subr.bf16.mxu1 %v14319_v26 }
  0xf7   : > { %10682 = vmatmul.mubr.msk.bf16.vlgmr.msra.gmra.mrb[28].mxu0 %vm427_vm2, %v12846_v54  ;;  %10688 = vmatmul.mubr.msk.bf16.vlgmr.msra.gmra.mrb[28].mxu1 %vm427_vm2, %v12849_v61  ;;  %v11980_v54 = vld [vmem:[%s12344_s26 + $0x84] sm:$0xff]   ;;  %v11981_v61 = vld [vmem:[%s12344_s26 + $0x90] sm:$0xff]  }
  0xf8   : > { %10692 = vmatpush3.bf16.msra.mxu0 %v13043_v24  ;;  %10698 = vmatpush3.bf16.msra.mxu1 %v13043_v24 }
  0xf9   : > { %10693 = vmatprep.mubr.msk.bf16.mxu0 %vm12212_vm3, %v14319_v26  ;;  %10699 = vmatprep.mubr.msk.bf16.mxu1 %vm12212_vm3, %v14319_v26 }
  0xfa   : > { %10703 = vmatprep.subr.bf16.mxu0 %v14319_v26  ;;  %10709 = vmatprep.subr.bf16.mxu1 %v14319_v26 }
  0xff   : > { %10694 = vmatmul.mubr.msk.bf16.vlgmr.msra.gmra.mrb[0].mxu0 %vm427_vm2, %v11970_v40  ;;  %10700 = vmatmul.mubr.msk.bf16.vlgmr.msra.gmra.mrb[0].mxu1 %vm427_vm2, %v11971_v34  ;;  %v4381_v40 = vshll.u32 %v9667_v23, 16  ;;  %v13211_v34 = vld [vmem:[%s12344_s26 + $0x50] ss:$0 sps:$4 sm:$0x11]   ;;  %v4578_v23 = vshll.u32 %v13239_v60, 16 }
 0x100   : > { %10704 = vmatpush3.bf16.msra.mxu0 %v13043_v24  ;;  %10710 = vmatpush3.bf16.msra.mxu1 %v13043_v24 }
 0x101   : > { %10705 = vmatprep.mubr.msk.bf16.mxu0 %vm12212_vm3, %v14319_v26  ;;  %10711 = vmatprep.mubr.msk.bf16.mxu1 %vm12212_vm3, %v14319_v26  ;;  %v4383_v4 = vrot.slane %v4381_v40, 1  ;;  %v9636_v40 = vld [vmem:[%s12344_s26 + $0x84] sm:$0xf] }
 0x102   : > { %10715 = vmatprep.subr.bf16.mxu0 %v14319_v26  ;;  %10721 = vmatprep.subr.bf16.mxu1 %v14319_v26 }
 0x103   : > { %v4384_v57 = vor.u32 %v4383_v4, %v4379_v63 }
 0x107   : > { %10706 = vmatmul.mubr.msk.bf16.vlgmr.msra.gmra.mrb[4].mxu0 %vm427_vm2, %v11972_v48  ;;  %10712 = vmatmul.mubr.msk.bf16.vlgmr.msra.gmra.mrb[4].mxu1 %vm427_vm2, %v11973_v7  ;;  %v4445_v48 = vshll.u32 %v9670_v51, 16  ;;  %v4256_v7 = vor.u32 %v4255_v9, %v4251_v44  ;;  %v4637_v44 = vshll.u32 %v9679_v50, 16  ;;  %v13271_v9 = vld [vmem:[%s12344_s26 + $0x80] ss:$0 sps:$4 sm:$0x11]   ;;  %v4701_v51 = vshll.u32 %v9682_v19, 16 }
 0x108   : > { %10716 = vmatpush3.bf16.msra.mxu0 %v13043_v24  ;;  %10722 = vmatpush3.bf16.msra.mxu1 %v13043_v24  ;;  %v4706_v63 = vshll.u32 %v13271_v9, 16 }
 0x109   : > { %10717 = vmatprep.mubr.msk.bf16.mxu0 %vm12212_vm3, %v14319_v26  ;;  %10723 = vmatprep.mubr.msk.bf16.mxu1 %vm12212_vm3, %v14319_v26 }
 0x10a   : > { %10727 = vmatprep.subr.bf16.mxu0 %v14319_v26  ;;  %10733 = vmatprep.subr.bf16.mxu1 %v14319_v26 }
 0x10f   : > { %10718 = vmatmul.mubr.msk.bf16.vlgmr.msra.gmra.mrb[8].mxu0 %vm427_vm2, %v11974_v41  ;;  %10724 = vmatmul.mubr.msk.bf16.vlgmr.msra.gmra.mrb[8].mxu1 %vm427_vm2, %v11975_v42  ;;  %v4260_v41 = vrot.slane %v4258_v18, 1  ;;  %v4320_v42 = vor.u32 %v4319_v33, %v4315_v30  ;;  %v4516_v30 = vrot.slane %v4514_v10, 1 }
 0x110   : > { %10728 = vmatpush3.bf16.msra.mxu0 %v13043_v24  ;;  %10734 = vmatpush3.bf16.msra.mxu1 %v13043_v24 }
 0x111   : > { %10729 = vmatprep.mubr.msk.bf16.mxu0 %vm12212_vm3, %v14319_v26  ;;  %10735 = vmatprep.mubr.msk.bf16.mxu1 %vm12212_vm3, %v14319_v26  ;;  %v4261_v38 = vsel %vm1301_vm4, %v4256_v7, %v4260_v41  ;;  %v9639_v41 = vld [vmem:[%s12344_s26 + $0x90] sm:$0xf] }
 0x112   : > { %10739 = vmatprep.subr.bf16.mxu0 %v14319_v26  ;;  %10745 = vmatprep.subr.bf16.mxu1 %v14319_v26 }
 0x117   : > { %10730 = vmatmul.mubr.msk.bf16.vlgmr.msra.gmra.mrb[12].mxu0 %vm427_vm2, %v11976_v12  ;;  %10736 = vmatmul.mubr.msk.bf16.vlgmr.msra.gmra.mrb[12].mxu1 %vm427_vm2, %v11977_v15  ;;  %v4324_v12 = vrot.slane %v4322_v31, 1  ;;  %v9624_v15 = vld [vmem:[%s12344_s26 + $0x54] sm:$0xf]  ;;  %v4580_v31 = vrot.slane %v4578_v23, 1 }
 0x118   : > { %10740 = vmatpush3.bf16.msra.mxu0 %v13043_v24  ;;  %10746 = vmatpush3.bf16.msra.mxu1 %v13043_v24 }
 0x119   : > { %10741 = vmatprep.mubr.msk.bf16.mxu0 %vm12212_vm3, %v14319_v26  ;;  %10747 = vmatprep.mubr.msk.bf16.mxu1 %vm12212_vm3, %v14319_v26  ;;  %v4325_v53 = vsel %vm1301_vm4, %v4320_v42, %v4324_v12  ;;  %v13286_v42 = vld [vmem:[%s12344_s26 + $0x94] sm:$0xf]  ;;  %v4635_v12 = vshrl.u32 %v9679_v50, 16 }
 0x11a   : > { %10751 = vmatprep.subr.bf16.mxu0 %v14319_v26  ;;  %10757 = vmatprep.subr.bf16.mxu1 %v14319_v26 }
 0x11f   : > { %10742 = vmatmul.mubr.msk.bf16.vlgmr.msra.gmra.mrb[16].mxu0 %vm427_vm2, %v11978_v35  ;;  %10748 = vmatmul.mubr.msk.bf16.vlgmr.msra.gmra.mrb[16].mxu1 %vm427_vm2, %v11979_v46  ;;  %v13217_v35 = vld [vmem:[%s12344_s26 + $0x58] sm:$0xf] }
 0x120   : > { %10752 = vmatpush3.bf16.msra.mxu0 %v13043_v24  ;;  %10758 = vmatpush3.bf16.msra.mxu1 %v13043_v24  ;;  %v9673_v2 = vcombine.low %v9624_v15, %v13217_v35  ;;  %v4639_v15 = vrot.slane %v4637_v44, 1  ;;  %v13326_v44 = vld [vmem:[%s12344_s26 + $0xa4] ss:$0 sps:$4 sm:$0x11]  }
 0x121   : > { %10753 = vmatprep.mubr.msk.bf16.mxu0 %vm12212_vm3, %v14319_v26  ;;  %10759 = vmatprep.mubr.msk.bf16.mxu1 %vm12212_vm3, %v14319_v26 }
 0x122   : > { %10763 = vmatprep.subr.bf16.mxu0 %v14319_v26  ;;  %10769 = vmatprep.subr.bf16.mxu1 %v14319_v26  ;;  %v4507_v39 = vshrl.u32 %v9673_v2, 16 }
 0x127   : > { %10754 = vmatmul.mubr.msk.bf16.vlgmr.msra.gmra.mrb[20].mxu0 %vm427_vm2, %v11980_v54  ;;  %10760 = vmatmul.mubr.msk.bf16.vlgmr.msra.gmra.mrb[20].mxu1 %vm427_vm2, %v11981_v61  ;;  %v9627_v54 = vld [vmem:[%s12344_s26 + $0x60] sm:$0xf]  ;;  %v13226_v61 = vld [vmem:[%s12344_s26 + $0x64] sm:$0xf] }
 0x128   : > { %10764 = vmatpush3.bf16.msra.mxu0 %v13043_v24  ;;  %10770 = vmatpush3.bf16.msra.mxu1 %v13043_v24  ;;  %v9676_v43 = vcombine.low %v9627_v54, %v13226_v61  ;;  %v4703_v54 = vrot.slane %v4701_v51, 1 }
 0x129   : > { %10765 = vmatprep.mubr.msk.bf16.mxu0 %vm12212_vm3, %v14319_v26  ;;  %10771 = vmatprep.mubr.msk.bf16.mxu1 %vm12212_vm3, %v14319_v26 }
 0x12a   : > { %10775 = vmatprep.subr.bf16.mxu0 %v14319_v26  ;;  %10781 = vmatprep.subr.bf16.mxu1 %v14319_v26  ;;  %v4573_v47 = vshll.u32 %v9676_v43, 16  ;;  %v4571_v17 = vshrl.u32 %v9676_v43, 16  ;;  %v13299_v43 = vld [vmem:[%s12344_s26 + $0x98] ss:$0 sps:$4 sm:$0x11]  }
 0x12b   : > { %v4834_v23 = vshll.u32 %v13299_v43, 16 }
 0x12f   : > { %10766 = vmatmul.mubr.msk.bf16.vlgmr.msra.gmra.mrb[24].mxu0 %vm427_vm2, %v11982_v25  ;;  %10772 = vmatmul.mubr.msk.bf16.vlgmr.msra.gmra.mrb[24].mxu1 %vm427_vm2, %v11983_v36  ;;  %v4447_v25 = vrot.slane %v4445_v48, 1  ;;  %v4450_v36 = vshll.u32 %v13211_v34, 16  ;;  %v13277_v48 = vld [vmem:[%s12344_s26 + $0x88] sm:$0xf] }
 0x130   : > { %10776 = vmatpush3.bf16.msra.mxu0 %v13043_v24  ;;  %10782 = vmatpush3.bf16.msra.mxu1 %v13043_v24  ;;  %v13206_v24 = vld [vmem:[%s12344_s26 + $0x44] ss:$0 sps:$4 sm:$0x11]   ;;  %v9685_v4 = vcombine.low %v9636_v40, %v13277_v48 }
 0x131   : > { %10777 = vmatprep.mubr.msk.bf16.mxu0 %vm12212_vm3, %v14319_v26  ;;  %10783 = vmatprep.mubr.msk.bf16.mxu1 %vm12212_vm3, %v14319_v26  ;;  %v4386_v46 = vshll.u32 %v13206_v24, 16  ;;  %v4448_v28 = vor.u32 %v4447_v25, %v4443_v55 }
 0x132   : > { %10787 = vmatprep.subr.bf16.mxu0 %v14319_v26  ;;  %10793 = vmatprep.subr.bf16.mxu1 %v14319_v26 }
 0x133   : > { %v4388_v6 = vrot.slane %v4386_v46, 1  ;;  %v4699_v46 = vshrl.u32 %v9682_v19, 16 }
 0x135   : > { %v4389_v32 = vsel %vm1301_vm4, %v4384_v57, %v4388_v6  ;;  %v4704_v6 = vor.u32 %v4703_v54, %v4699_v46  ;;  %v4708_v57 = vrot.slane %v4706_v63, 1  ;;  %v13345_v46 = vld [vmem:[%s12344_s26 + $0xc4] sm:$0xf] }
 0x137   : > { %10778 = vmatmul.mubr.msk.bf16.vlgmr.msra.gmra.mrb[28].mxu0 %vm427_vm2, %v11984_v58  ;;  %10784 = vmatmul.mubr.msk.bf16.vlgmr.msra.gmra.mrb[28].mxu1 %vm427_vm2, %v11985_v14  ;;  %v4452_v58 = vrot.slane %v4450_v36, 1  ;;  %v4509_v14 = vshll.u32 %v9673_v2, 16  ;;  %v9688_v36 = vcombine.low %v9639_v41, %v13286_v42  ;;  %v9648_v41 = vld [vmem:[%s12344_s26 + $0xb4] sm:$0xf] }
 0x138   : > { %10788 = vmatpush3.bf16.msra.mxu0 %v13173_v62  ;;  %10794 = vmatpush3.bf16.msra.mxu1 %v13173_v62 }
 0x139   : > { %10789 = vmatprep.mubr.msk.bf16.mxu0 %vm12212_vm3, %v14319_v26  ;;  %10795 = vmatprep.mubr.msk.bf16.mxu1 %vm12212_vm3, %v14319_v26  ;;  %v4453_v29 = vsel %vm1301_vm4, %v4448_v28, %v4452_v58  ;;  %v4511_v52 = vrot.slane %v4509_v14, 1  ;;  %v4765_v28 = vshll.u32 %v9685_v4, 16  ;;  %v9642_v58 = vld [vmem:[%s12344_s26 + $0x9c] sm:$0xf]  ;;  %v13305_v14 = vld [vmem:[%s12344_s26 + $0xa0] sm:$0xf] }
 0x13a   : > { %10799 = vmatprep.subr.bf16.mxu0 %v14319_v26  ;;  %10805 = vmatprep.subr.bf16.mxu1 %v14319_v26  ;;  %v4829_v22 = vshll.u32 %v9688_v36, 16  ;;  %v9691_v50 = vcombine.low %v9642_v58, %v13305_v14 }
 0x13b   : > { %v4512_v18 = vor.u32 %v4511_v52, %v4507_v39  ;;  %v4763_v39 = vshrl.u32 %v9685_v4, 16  ;;  %v4767_v52 = vrot.slane %v4765_v28, 1  ;;  %v4898_v4 = vshll.u32 %v13326_v44, 16 }
 0x13c   : > { %v4893_v51 = vshll.u32 %v9691_v50, 16  ;;  %v4891_v54 = vshrl.u32 %v9691_v50, 16 }
 0x13d   : > { %v4517_v55 = vsel %vm1301_vm4, %v4512_v18, %v4516_v30  ;;  %v13331_v18 = vld [vmem:[%s12344_s26 + $0xb0] ss:$0 sps:$4 sm:$0x11]   ;;  %v4900_v58 = vrot.slane %v4898_v4, 1 }
 0x13e   : > { %v4895_v63 = vrot.slane %v4893_v51, 1 }
 0x13f   : > { %10790 = vmatmul.mubr.msk.bf16.vlgmr.msra.gmra.mrb[0].mxu0 %vm427_vm2, %v4130_v11  ;;  %10796 = vmatmul.mubr.msk.bf16.vlgmr.msra.gmra.mrb[0].mxu1 %vm427_vm2, %v4197_v1  ;;  %v4575_v11 = vrot.slane %v4573_v47, 1  ;;  %v13266_v1 = vld [vmem:[%s12344_s26 + $0x74] ss:$0 sps:$4 sm:$0x11]   ;;  %v9645_v47 = vld [vmem:[%s12344_s26 + $0xa8] sm:$0xf] }
 0x140   : > { %10800 = vmatpush3.bf16.msra.mxu0 %v13173_v62  ;;  %10806 = vmatpush3.bf16.msra.mxu1 %v13173_v62  ;;  %v4642_v7 = vshll.u32 %v13266_v1, 16  ;;  %v9694_v19 = vcombine.low %v9645_v47, %v13311_v59  ;;  %v4896_v28 = vor.u32 %v4895_v63, %v4891_v54  ;;  %v9719_v54 = vld [vmem:[%s12349_s24 + $0x14] sm:$0xf] }
 0x141   : > { %10801 = vmatprep.mubr.msk.bf16.mxu0 %vm12212_vm3, %v14319_v26  ;;  %10807 = vmatprep.mubr.msk.bf16.mxu1 %vm12212_vm3, %v14319_v26  ;;  %v4576_v33 = vor.u32 %v4575_v11, %v4571_v17  ;;  %v4827_v17 = vshrl.u32 %v9688_v36, 16  ;;  %v4831_v11 = vrot.slane %v4829_v22, 1  ;;  %v4962_v36 = vshll.u32 %v13331_v18, 16 }
 0x142   : > { %10811 = vmatprep.subr.bf16.mxu0 %v14319_v26  ;;  %10817 = vmatprep.subr.bf16.mxu1 %v14319_v26  ;;  %v4644_v2 = vrot.slane %v4642_v7, 1  ;;  %v4957_v30 = vshll.u32 %v9694_v19, 16  ;;  %v4836_v7 = vrot.slane %v4834_v23, 1 }
 0x143   : > { %v4581_v25 = vsel %vm1301_vm4, %v4576_v33, %v4580_v31  ;;  %v4768_v33 = vor.u32 %v4767_v52, %v4763_v39  ;;  %v4832_v40 = vor.u32 %v4831_v11, %v4827_v17  ;;  %v4964_v47 = vrot.slane %v4962_v36, 1 }
 0x144   : > { %v4901_v52 = vsel %vm1301_vm4, %v4896_v28, %v4900_v58 }
 0x147   : > { %10802 = vmatmul.mubr.msk.bf16.vlgmr.msra.gmra.mrb[4].mxu0 %vm427_vm2, %v4261_v38  ;;  %10808 = vmatmul.mubr.msk.bf16.vlgmr.msra.gmra.mrb[4].mxu1 %vm427_vm2, %v4325_v53  ;;  %v4640_v38 = vor.u32 %v4639_v15, %v4635_v12  ;;  %v13296_v53 = vld [vmem:[%s12344_s26 + $0x8c] ss:$0 sps:$4 sm:$0x11]   ;;  %v13337_v12 = vld [vmem:[%s12344_s26 + $0xb8] sm:$0xf] }
 0x148   : > { %10812 = vmatpush3.bf16.msra.mxu0 %v13173_v62  ;;  %10818 = vmatpush3.bf16.msra.mxu1 %v13173_v62  ;;  %v4770_v10 = vshll.u32 %v13296_v53, 16  ;;  %v9651_v15 = vld [vmem:[%s12344_s26 + $0xc0] sm:$0xf] }
 0x149   : > { %10813 = vmatprep.mubr.msk.bf16.mxu0 %vm12212_vm3, %v14319_v26  ;;  %10819 = vmatprep.mubr.msk.bf16.mxu1 %vm12212_vm3, %v14319_v26 }
 0x14a   : > { %10823 = vmatprep.subr.bf16.mxu0 %v14319_v26  ;;  %10829 = vmatprep.subr.bf16.mxu1 %v14319_v26  ;;  %v4772_v31 = vrot.slane %v4770_v10, 1 }
 0x14f   : > { %10814 = vmatmul.mubr.msk.bf16.vlgmr.msra.gmra.mrb[8].mxu0 %vm427_vm2, %v4389_v32  ;;  %10820 = vmatmul.mubr.msk.bf16.vlgmr.msra.gmra.mrb[8].mxu1 %vm427_vm2, %v4453_v29  ;;  %v4645_v32 = vsel %vm1301_vm4, %v4640_v38, %v4644_v2  ;;  %v4709_v29 = vsel %vm1301_vm4, %v4704_v6, %v4708_v57  ;;  %v9697_v2 = vcombine.low %v9648_v41, %v13337_v12  ;;  %v9703_v41 = vld [vmem:[%s12344_s26 + $0xc] sm:$0xe] }
 0x150   : > { %10824 = vmatpush3.bf16.msra.mxu0 %v13173_v62  ;;  %10830 = vmatpush3.bf16.msra.mxu1 %v13173_v62  ;;  %v4773_v38 = vsel %vm1301_vm4, %v4768_v33, %v4772_v31  ;;  %v4837_v6 = vsel %vm1301_vm4, %v4832_v40, %v4836_v7  ;;  %v9700_v57 = vcombine.low %v9651_v15, %v13345_v46  ;;  %v9704_v15 = vld [vmem:[%s12344_s26 + $0x18] sm:$0xe] }
 0x151   : > { %10825 = vmatprep.mubr.msk.bf16.mxu0 %vm12212_vm3, %v14319_v26  ;;  %10831 = vmatprep.mubr.msk.bf16.mxu1 %vm12212_vm3, %v14319_v26  ;;  %v5021_v50 = vshll.u32 %v9697_v2, 16  ;;  %v5019_v10 = vshrl.u32 %v9697_v2, 16  ;;  %v9720_v4 = vcombine.low %v9703_v41, %v13123_v0  ;;  %v5192_v2 = vrot.slane %v13142_v20, 1  ;;  %v9705_v0 = vld [vmem:[%s12344_s26 + $0x24] sm:$0xe] }
 0x152   : > { %10835 = vmatprep.subr.bf16.mxu0 %v14319_v26  ;;  %10841 = vmatprep.subr.bf16.mxu1 %v14319_v26  ;;  %v5085_v39 = vshll.u32 %v9700_v57, 16  ;;  %v5083_v23 = vshrl.u32 %v9700_v57, 16 }
 0x153   : > { %v5023_v17 = vrot.slane %v5021_v50, 1  ;;  %v5191_v36 = vrot.slane %v9720_v4, 1  ;;  %v5345_v50 = vrot.slane %v13179_v49, 1 }
 0x154   : > { %v5087_v51 = vrot.slane %v5085_v39, 1 }
 0x155   : > { %v5024_v33 = vor.u32 %v5023_v17, %v5019_v10  ;;  %v5193_v57 = vsel %vm2374_vm5, %v5191_v36, %v5192_v2  ;;  %v5395_v10 = vrot.slane %v13206_v24, 1  ;;  %v5695_v2 = vrot.slane %v13296_v53, 1 }
 0x156   : > { %v5088_v40 = vor.u32 %v5087_v51, %v5083_v23 }
 0x157   : > { %10826 = vmatmul.mubr.msk.bf16.vlgmr.msra.gmra.mrb[12].mxu0 %vm427_vm2, %v4517_v55  ;;  %10832 = vmatmul.mubr.msk.bf16.vlgmr.msra.gmra.mrb[12].mxu1 %vm427_vm2, %v4581_v25  ;;  %v4955_v55 = vshrl.u32 %v9694_v19, 16  ;;  %v4959_v25 = vrot.slane %v4957_v30, 1 }
 0x158   : > { %10836 = vmatpush3.bf16.msra.mxu0 %v13173_v62  ;;  %10842 = vmatpush3.bf16.msra.mxu1 %v13173_v62 }
 0x159   : > { %10837 = vmatprep.mubr.msk.bf16.mxu0 %vm12212_vm3, %v14319_v26  ;;  %10843 = vmatprep.mubr.msk.bf16.mxu1 %vm12212_vm3, %v14319_v26  ;;  %v4960_v22 = vor.u32 %v4959_v25, %v4955_v55  ;;  %v9722_v55 = vcombine.low %v9704_v15, %v13129_v37  ;;  %v13393_v25 = vsel %vm431_vm1, %v9719_v54, 0  ;;  %v9706_v37 = vld [vmem:[%s12344_s26 + $0x30] sm:$0xe]  ;;  %v5595_v54 = vrot.slane %v13266_v1, 1 }
 0x15a   : > { %10847 = vmatprep.subr.bf16.mxu0 %v14319_v26  ;;  %10853 = vmatprep.subr.bf16.mxu1 %v14319_v26  ;;  %v9726_v28 = vcombine.low %v9706_v37, %v13162_v21  ;;  %v9708_v21 = vld [vmem:[%s12344_s26 + $0x48] sm:$0xe] }
 0x15b   : > { %v4965_v19 = vsel %vm1301_vm4, %v4960_v22, %v4964_v47  ;;  %v5295_v22 = vrot.slane %v13176_v45, 1 }
 0x15c   : > { %v5344_v47 = vrot.slane %v9726_v28, 1  ;;  %v5845_v28 = vrot.slane %v13331_v18, 1 }
 0x15e   : > { %v5346_v45 = vsel %vm2374_vm5, %v5344_v47, %v5345_v50 }
 0x15f   : > { %10838 = vmatmul.mubr.msk.bf16.vlgmr.msra.gmra.mrb[16].mxu0 %vm427_vm2, %v4645_v32  ;;  %10844 = vmatmul.mubr.msk.bf16.vlgmr.msra.gmra.mrb[16].mxu1 %vm427_vm2, %v4709_v29  ;;  %v13358_v32 = vld [vmem:[%s12344_s26 + $0xbc] ss:$0 sps:$4 sm:$0x11]   ;;  %v13363_v29 = vld [vmem:[%s12344_s26 + $0xc8] ss:$0 sps:$4 sm:$0x11]  }
 0x160   : > { %10848 = vmatpush3.bf16.msra.mxu0 %v13173_v62  ;;  %10854 = vmatpush3.bf16.msra.mxu1 %v13173_v62  ;;  %v5026_v11 = vshll.u32 %v13358_v32, 16  ;;  %v5090_v30 = vshll.u32 %v13363_v29, 16  ;;  %v5895_v50 = vrot.slane %v13358_v32, 1 }
 0x161   : > { %10849 = vmatprep.mubr.msk.bf16.mxu0 %vm12212_vm3, %v14319_v26  ;;  %10855 = vmatprep.mubr.msk.bf16.mxu1 %vm12212_vm3, %v14319_v26 }
 0x162   : > { %10859 = vmatprep.subr.bf16.mxu0 %v14319_v26  ;;  %10865 = vmatprep.subr.bf16.mxu1 %v14319_v26  ;;  %v5028_v31 = vrot.slane %v5026_v11, 1  ;;  %v5092_v7 = vrot.slane %v5090_v30, 1  ;;  %v5445_v11 = vrot.slane %v13211_v34, 1 }
 0x164   : > { %v5093_v63 = vsel %vm1301_vm4, %v5088_v40, %v5092_v7  ;;  %v5545_v40 = vrot.slane %v13239_v60, 1 }
 0x167   : > { %10850 = vmatmul.mubr.msk.bf16.vlgmr.msra.gmra.mrb[20].mxu0 %vm427_vm2, %v4773_v38  ;;  %10856 = vmatmul.mubr.msk.bf16.vlgmr.msra.gmra.mrb[20].mxu1 %vm427_vm2, %v4837_v6  ;;  %v5244_v38 = vrot.slane %v9722_v55, 1  ;;  %v5245_v6 = vrot.slane %v13147_v5, 1  ;;  %v9724_v5 = vcombine.low %v9705_v0, %v13153_v16  ;;  %v9707_v16 = vld [vmem:[%s12344_s26 + $0x3c] sm:$0xe] }
 0x168   : > { %10860 = vmatpush3.bf16.msra.mxu0 %v13173_v62  ;;  %10866 = vmatpush3.bf16.msra.mxu1 %v13173_v62  ;;  %v9728_v49 = vcombine.low %v9707_v16, %v13185_v3  ;;  %v9709_v3 = vld [vmem:[%s12344_s26 + $0x54] sm:$0xe] }
 0x169   : > { %10861 = vmatprep.mubr.msk.bf16.mxu0 %vm12212_vm3, %v14319_v26  ;;  %10867 = vmatprep.mubr.msk.bf16.mxu1 %vm12212_vm3, %v14319_v26  ;;  %v5246_v20 = vsel %vm2374_vm5, %v5244_v38, %v5245_v6  ;;  %v5294_v58 = vrot.slane %v9724_v5, 1  ;;  %v9732_v34 = vcombine.low %v9709_v3, %v13217_v35  ;;  %v9711_v35 = vld [vmem:[%s12344_s26 + $0x6c] sm:$0xe]  ;;  %v5745_v6 = vrot.slane %v13299_v43, 1  ;;  %v12043_v3 = vld [vmem:[%s12344_s26 + $0x84] sm:$0xff]  }
 0x16a   : > { %10871 = vmatprep.subr.bf16.mxu0 %v14319_v26  ;;  %10877 = vmatprep.subr.bf16.mxu1 %v14319_v26  ;;  %v9736_v60 = vcombine.low %v9711_v35, %v13245_v8  ;;  %v9713_v8 = vld [vmem:[%s12344_s26 + $0x84] sm:$0xe] }
 0x16b   : > { %v5296_v39 = vsel %vm2374_vm5, %v5294_v58, %v5295_v22  ;;  %v5494_v30 = vrot.slane %v9732_v34, 1  ;;  %v13615_v34 = vld [vmem:[%s12344_s26 + $0x1c] sm:$0xf] }
 0x16c   : > { %v5594_v15 = vrot.slane %v9736_v60, 1 }
 0x16e   : > { %v5596_v4 = vsel %vm2374_vm5, %v5594_v15, %v5595_v54  ;;  %v13645_v15 = vld [vmem:[%s12344_s26 + $0x34] sm:$0xf] }
 0x16f   : > { %10862 = vmatmul.mubr.msk.bf16.vlgmr.msra.gmra.mrb[24].mxu0 %vm427_vm2, %v4901_v52  ;;  %10868 = vmatmul.mubr.msk.bf16.vlgmr.msra.gmra.mrb[24].mxu1 %vm427_vm2, %v4965_v19  ;;  %v9730_v52 = vcombine.low %v9708_v21, %v13191_v13  ;;  %v5394_v19 = vrot.slane %v9728_v49, 1  ;;  %v9710_v13 = vld [vmem:[%s12344_s26 + $0x60] sm:$0xe]  ;;  %v5945_v21 = vrot.slane %v13363_v29, 1  ;;  %v12034_v29 = vld [vmem:[%s12344_s26 + $0x18] sm:$0xff]  }
 0x170   : > { %10872 = vmatpush3.bf16.msra.mxu0 %v13173_v62  ;;  %10878 = vmatpush3.bf16.msra.mxu1 %v13173_v62  ;;  %v5029_v62 = vsel %vm1301_vm4, %v5024_v33, %v5028_v31  ;;  %v9734_v51 = vcombine.low %v9710_v13, %v13226_v61  ;;  %v5495_v33 = vrot.slane %v13236_v27, 1  ;;  %v9712_v61 = vld [vmem:[%s12344_s26 + $0x78] sm:$0xe]  ;;  %v12037_v49 = vld [vmem:[%s12344_s26 + $0x3c] sm:$0xff]   ;;  %v12044_v13 = vld [vmem:[%s12344_s26 + $0x90] sm:$0xff]  }
 0x171   : > { %10873 = vmatprep.mubr.msk.bf16.mxu0 %vm12212_vm3, %v14319_v26  ;;  %10879 = vmatprep.mubr.msk.bf16.mxu1 %vm12212_vm3, %v14319_v26  ;;  %v5444_v17 = vrot.slane %v9730_v52, 1  ;;  %v5396_v23 = vsel %vm2374_vm5, %v5394_v19, %v5395_v10  ;;  %v9738_v41 = vcombine.low %v9712_v61, %v13251_v56  ;;  %v9714_v56 = vld [vmem:[%s12344_s26 + $0x90] sm:$0xe]  ;;  %v12038_v52 = vld [vmem:[%s12344_s26 + $0x48] sm:$0xff]   ;;  %v12039_v19 = vld [vmem:[%s12344_s26 + $0x54] sm:$0xff]  }
 0x172   : > { %10883 = vmatprep.subr.bf16.mxu0 %v14319_v26  ;;  %10889 = vmatprep.subr.bf16.mxu1 %v14319_v26  ;;  %v5544_v31 = vrot.slane %v9734_v51, 1  ;;  %v5496_v7 = vsel %vm2374_vm5, %v5494_v30, %v5495_v33  ;;  %v9742_v55 = vcombine.low %v9714_v56, %v13286_v42  ;;  %v9716_v42 = vld [vmem:[%s12344_s26 + $0xa8] sm:$0xe]  ;;  %v12040_v10 = vld [vmem:[%s12344_s26 + $0x60] sm:$0xff]  }
 0x173   : > { %v5446_v24 = vsel %vm2374_vm5, %v5444_v17, %v5445_v11  ;;  %v9746_v37 = vcombine.low %v9716_v42, %v13311_v59  ;;  %v9718_v59 = vld [vmem:[%s12344_s26 + $0xc0] sm:$0xe]  ;;  %v12041_v17 = vld [vmem:[%s12344_s26 + $0x6c] sm:$0xff]   ;;  %v12042_v11 = vld [vmem:[%s12344_s26 + $0x78] sm:$0xff]  }
 0x174   : > { %v5546_v27 = vsel %vm2374_vm5, %v5544_v31, %v5545_v40  ;;  %v5744_v38 = vrot.slane %v9742_v55, 1  ;;  %v9750_v18 = vcombine.low %v9718_v59, %v13345_v46  ;;  %v9820_v51 = vld [vmem:[%s12344_s26 + $0x24] sm:$0xf]  ;;  %v13621_v30 = vld [vmem:[%s12344_s26 + $0x28] sm:$0xf]  ;;  %v12047_v40 = vld [vmem:[%s12344_s26 + $0xb4] sm:$0xff]  }
 0x175   : > { %v5844_v5 = vrot.slane %v9746_v37, 1  ;;  %v12046_v31 = vld [vmem:[%s12344_s26 + $0xa8] sm:$0xff]   ;;  %v9869_v35 = vcombine.low %v9820_v51, %v13621_v30  ;;  %v13634_v61 = vld [vmem:[%s12344_s26 + $0x20] ss:$0 sps:$4 sm:$0x11]  }
 0x176   : > { %v5746_v53 = vsel %vm2374_vm5, %v5744_v38, %v5745_v6  ;;  %v5944_v16 = vrot.slane %v9750_v18, 1  ;;  %v6943_v54 = vshll.u32 %v13634_v61, 16  ;;  %v9832_v59 = vld [vmem:[%s12344_s26 + $0x54] sm:$0xf] }
 0x177   : > { %10874 = vmatmul.mubr.msk.bf16.vlgmr.msra.gmra.mrb[28].mxu0 %vm427_vm2, %v5029_v62  ;;  %10880 = vmatmul.mubr.msk.bf16.vlgmr.msra.gmra.mrb[28].mxu1 %vm427_vm2, %v5093_v63  ;;  %v5644_v62 = vrot.slane %v9738_v41, 1  ;;  %v5645_v63 = vrot.slane %v13271_v9, 1  ;;  %v9740_v9 = vcombine.low %v9713_v8, %v13277_v48  ;;  %v9715_v48 = vld [vmem:[%s12344_s26 + $0x9c] sm:$0xe]  ;;  %v7005_v60 = vshll.u32 %v9869_v35, 16 }
 0x178   : > { %10884 = vmatpush3.bf16.msra.mxu0 %v13393_v25  ;;  %10890 = vmatpush3.bf16.msra.mxu1 %v13393_v25  ;;  %v9744_v43 = vcombine.low %v9715_v48, %v13305_v14  ;;  %v9717_v14 = vld [vmem:[%s12344_s26 + $0xb4] sm:$0xe]  ;;  %v5946_v32 = vsel %vm2374_vm5, %v5944_v16, %v5945_v21  ;;  %v9823_v41 = vld [vmem:[%s12344_s26 + $0x30] sm:$0xf]  ;;  %v9865_v8 = vld [vmem:[%s12349_s24 + $0x1c] sm:$0xf] }
 0x179   : > { %10885 = vmatprep.mubr.msk.bf16.mxu0 %vm12212_vm3, %v14319_v26  ;;  %10891 = vmatprep.mubr.msk.bf16.mxu1 %vm12212_vm3, %v14319_v26  ;;  %v5646_v1 = vsel %vm2374_vm5, %v5644_v62, %v5645_v63  ;;  %v5694_v36 = vrot.slane %v9740_v9, 1  ;;  %v9748_v22 = vcombine.low %v9717_v14, %v13337_v12  ;;  %v9784_v12 = vld [vmem:[%s12349_s24 + $0x18] sm:$0xf]  ;;  %v9826_v62 = vld [vmem:[%s12344_s26 + $0x3c] sm:$0xf]  ;;  %v12049_v9 = vld [vmem:[%s12344_s26 + $0xcc] sm:$0xff]   ;;  %v9872_v38 = vcombine.low %v9823_v41, %v13645_v15 }
 0x17a   : > { %10895 = vmatprep.subr.bf16.mxu0 %v14319_v26  ;;  %10901 = vmatprep.subr.bf16.mxu1 %v14319_v26  ;;  %v13654_v63 = vld [vmem:[%s12344_s26 + $0x40] sm:$0xf]  ;;  %v7003_v55 = vshrl.u32 %v9869_v35, 16  ;;  %v13665_v48 = vsel %vm431_vm1, %v9865_v8, 0  ;;  %v6945_v42 = vrot.slane %v6943_v54, 1 }
 0x17b   : > { %v5696_v0 = vsel %vm2374_vm5, %v5694_v36, %v5695_v2  ;;  %v5894_v47 = vrot.slane %v9748_v22, 1  ;;  %v7007_v36 = vrot.slane %v7005_v60, 1  ;;  %v9875_v6 = vcombine.low %v9826_v62, %v13654_v63  ;;  %v13728_v8 = vld [vmem:[%s12344_s26 + $0x68] ss:$0 sps:$4 sm:$0x11]  }
 0x17d   : > { %v5896_v46 = vsel %vm2374_vm5, %v5894_v47, %v5895_v50  ;;  %v7008_v37 = vor.u32 %v7007_v36, %v7003_v55  ;;  %v7133_v14 = vshll.u32 %v9875_v6, 16  ;;  %v7067_v47 = vshrl.u32 %v9872_v38, 16  ;;  %v9841_v55 = vld [vmem:[%s12344_s26 + $0x78] sm:$0xf]  ;;  %v13737_v36 = vld [vmem:[%s12344_s26 + $0x7c] sm:$0xf] }
 0x17f   : > { %10886 = vmatmul.mubr.msk.bf16.vlgmr.msra.gmra.mrb[0].mxu0 %vm427_vm2, %v5193_v57  ;;  %10892 = vmatmul.mubr.msk.bf16.vlgmr.msra.gmra.mrb[0].mxu1 %vm427_vm2, %v5246_v20  ;;  %v5794_v57 = vrot.slane %v9744_v43, 1  ;;  %v5795_v20 = vrot.slane %v13326_v44, 1  ;;  %v5846_v44 = vsel %vm2374_vm5, %v5844_v5, %v5845_v28  ;;  %v13671_v43 = vld [vmem:[%s12344_s26 + $0x44] ss:$0 sps:$4 sm:$0x11]  }
 0x180   : > { %10896 = vmatpush3.bf16.msra.mxu0 %v13393_v25  ;;  %10902 = vmatpush3.bf16.msra.mxu1 %v13393_v25  ;;  %v9829_v5 = vld [vmem:[%s12344_s26 + $0x48] sm:$0xf]  ;;  %v13677_v28 = vld [vmem:[%s12344_s26 + $0x4c] sm:$0xf] }
 0x181   : > { %10897 = vmatprep.mubr.msk.bf16.mxu0 %vm12212_vm3, %v14319_v26  ;;  %10903 = vmatprep.mubr.msk.bf16.mxu1 %vm12212_vm3, %v14319_v26  ;;  %v5796_v58 = vsel %vm2374_vm5, %v5794_v57, %v5795_v20  ;;  %v7069_v20 = vshll.u32 %v9872_v38, 16  ;;  %v9878_v22 = vcombine.low %v9829_v5, %v13677_v28  ;;  %v9844_v38 = vld [vmem:[%s12344_s26 + $0x84] sm:$0xf] }
 0x182   : > { %10907 = vmatprep.subr.bf16.mxu0 %v14319_v26  ;;  %10913 = vmatprep.subr.bf16.mxu1 %v14319_v26 }
 0x183   : > { %v7071_v50 = vrot.slane %v7069_v20, 1 }
 0x187   : > { %10898 = vmatmul.mubr.msk.bf16.vlgmr.msra.gmra.mrb[4].mxu0 %vm427_vm2, %v5296_v39  ;;  %10904 = vmatmul.mubr.msk.bf16.vlgmr.msra.gmra.mrb[4].mxu1 %vm427_vm2, %v5346_v45  ;;  %v12035_v39 = vld [vmem:[%s12344_s26 + $0x24] sm:$0xff]   ;;  %v12036_v45 = vld [vmem:[%s12344_s26 + $0x30] sm:$0xff]  }
 0x188   : > { %10908 = vmatpush3.bf16.msra.mxu0 %v13393_v25  ;;  %10914 = vmatpush3.bf16.msra.mxu1 %v13393_v25 }
 0x189   : > { %10909 = vmatprep.mubr.msk.bf16.mxu0 %vm12212_vm3, %v14319_v26  ;;  %10915 = vmatprep.mubr.msk.bf16.mxu1 %vm12212_vm3, %v14319_v26 }
 0x18a   : > { %10919 = vmatprep.subr.bf16.mxu0 %v14319_v26  ;;  %10925 = vmatprep.subr.bf16.mxu1 %v14319_v26 }
 0x18f   : > { %10910 = vmatmul.mubr.msk.bf16.vlgmr.msra.gmra.mrb[8].mxu0 %vm427_vm2, %v5396_v23  ;;  %10916 = vmatmul.mubr.msk.bf16.vlgmr.msra.gmra.mrb[8].mxu1 %vm427_vm2, %v5446_v24  ;;  %v12045_v23 = vld [vmem:[%s12344_s26 + $0x9c] sm:$0xff]   ;;  %v9817_v24 = vld [vmem:[%s12344_s26 + $0x18] sm:$0xf] }
 0x190   : > { %10920 = vmatpush3.bf16.msra.mxu0 %v13393_v25  ;;  %10926 = vmatpush3.bf16.msra.mxu1 %v13393_v25  ;;  %v9866_v33 = vcombine.low %v9817_v24, %v13615_v34  ;;  %v7195_v24 = vshrl.u32 %v9878_v22, 16 }
 0x191   : > { %10921 = vmatprep.mubr.msk.bf16.mxu0 %vm12212_vm3, %v14319_v26  ;;  %10927 = vmatprep.mubr.msk.bf16.mxu1 %vm12212_vm3, %v14319_v26 }
 0x192   : > { %10931 = vmatprep.subr.bf16.mxu0 %v14319_v26  ;;  %10937 = vmatprep.subr.bf16.mxu1 %v14319_v26  ;;  %v6936_v56 = vshrl.u32 %v9866_v33, 16 }
 0x197   : > { %10922 = vmatmul.mubr.msk.bf16.vlgmr.msra.gmra.mrb[12].mxu0 %vm427_vm2, %v5496_v7  ;;  %10928 = vmatmul.mubr.msk.bf16.vlgmr.msra.gmra.mrb[12].mxu1 %vm427_vm2, %v5546_v27  ;;  %v6938_v7 = vshll.u32 %v9866_v33, 16  ;;  %v13639_v27 = vld [vmem:[%s12344_s26 + $0x2c] ss:$0 sps:$4 sm:$0x11]  }
 0x198   : > { %10932 = vmatpush3.bf16.msra.mxu0 %v13393_v25  ;;  %10938 = vmatpush3.bf16.msra.mxu1 %v13393_v25  ;;  %v7010_v2 = vshll.u32 %v13639_v27, 16 }
 0x199   : > { %10933 = vmatprep.mubr.msk.bf16.mxu0 %vm12212_vm3, %v14319_v26  ;;  %10939 = vmatprep.mubr.msk.bf16.mxu1 %vm12212_vm3, %v14319_v26 }
 0x19a   : > { %10943 = vmatprep.subr.bf16.mxu0 %v14319_v26  ;;  %10949 = vmatprep.subr.bf16.mxu1 %v14319_v26  ;;  %v7012_v57 = vrot.slane %v7010_v2, 1 }
 0x19c   : > { %v7013_v18 = vsel %vm1301_vm4, %v7008_v37, %v7012_v57 }
 0x19f   : > { %10934 = vmatmul.mubr.msk.bf16.vlgmr.msra.gmra.mrb[16].mxu0 %vm427_vm2, %v5596_v4  ;;  %10940 = vmatmul.mubr.msk.bf16.vlgmr.msra.gmra.mrb[16].mxu1 %vm427_vm2, %v5646_v1  ;;  %v6940_v4 = vrot.slane %v6938_v7, 1  ;;  %v12048_v1 = vld [vmem:[%s12344_s26 + $0xc0] sm:$0xff]  }
 0x1a0   : > { %10944 = vmatpush3.bf16.msra.mxu0 %v13393_v25  ;;  %10950 = vmatpush3.bf16.msra.mxu1 %v13393_v25 }
 0x1a1   : > { %10945 = vmatprep.mubr.msk.bf16.mxu0 %vm12212_vm3, %v14319_v26  ;;  %10951 = vmatprep.mubr.msk.bf16.mxu1 %vm12212_vm3, %v14319_v26 }
 0x1a2   : > { %10955 = vmatprep.subr.bf16.mxu0 %v14319_v26  ;;  %10961 = vmatprep.subr.bf16.mxu1 %v14319_v26 }
 0x1a7   : > { %10946 = vmatmul.mubr.msk.bf16.vlgmr.msra.gmra.mrb[20].mxu0 %vm427_vm2, %v5696_v0  ;;  %10952 = vmatmul.mubr.msk.bf16.vlgmr.msra.gmra.mrb[20].mxu1 %vm427_vm2, %v5746_v53  ;;  %v6941_v0 = vor.u32 %v6940_v4, %v6936_v56  ;;  %v13668_v53 = vld [vmem:[%s12344_s26 + $0x38] ss:$0 sps:$4 sm:$0x11]   ;;  %v13731_v56 = vld [vmem:[%s12344_s26 + $0x74] ss:$0 sps:$4 sm:$0x11]  }
 0x1a8   : > { %10956 = vmatpush3.bf16.msra.mxu0 %v13393_v25  ;;  %10962 = vmatpush3.bf16.msra.mxu1 %v13393_v25  ;;  %v7074_v21 = vshll.u32 %v13668_v53, 16 }
 0x1a9   : > { %10957 = vmatprep.mubr.msk.bf16.mxu0 %vm12212_vm3, %v14319_v26  ;;  %10963 = vmatprep.mubr.msk.bf16.mxu1 %vm12212_vm3, %v14319_v26 }
 0x1aa   : > { %10967 = vmatprep.subr.bf16.mxu0 %v14319_v26  ;;  %10973 = vmatprep.subr.bf16.mxu1 %v14319_v26 }
 0x1af   : > { %10958 = vmatmul.mubr.msk.bf16.vlgmr.msra.gmra.mrb[24].mxu0 %vm427_vm2, %v5796_v58  ;;  %10964 = vmatmul.mubr.msk.bf16.vlgmr.msra.gmra.mrb[24].mxu1 %vm427_vm2, %v5846_v44  ;;  %v13683_v58 = vld [vmem:[%s12344_s26 + $0x58] sm:$0xf]  ;;  %v6946_v44 = vsel %vm1301_vm4, %v6941_v0, %v6945_v42  ;;  %v9890_v0 = vcombine.low %v9841_v55, %v13737_v36 }
 0x1b0   : > { %10968 = vmatpush3.bf16.msra.mxu0 %v13393_v25  ;;  %10974 = vmatpush3.bf16.msra.mxu1 %v13393_v25  ;;  %v13537_v25 = vsel %vm431_vm1, %v9784_v12, 0  ;;  %v9881_v16 = vcombine.low %v9832_v59, %v13683_v58  ;;  %v7131_v12 = vshrl.u32 %v9875_v6, 16  ;;  %v13743_v6 = vld [vmem:[%s12344_s26 + $0x88] sm:$0xf] }
 0x1b1   : > { %10969 = vmatprep.mubr.msk.bf16.mxu0 %vm12212_vm3, %v14319_v26  ;;  %10975 = vmatprep.mubr.msk.bf16.mxu1 %vm12212_vm3, %v14319_v26  ;;  %v9893_v5 = vcombine.low %v9844_v38, %v13743_v6  ;;  %v13803_v38 = vld [vmem:[%s12344_s26 + $0xb8] sm:$0xf] }
 0x1b2   : > { %10979 = vmatprep.subr.bf16.mxu0 %v14319_v26  ;;  %10985 = vmatprep.subr.bf16.mxu1 %v14319_v26  ;;  %v7259_v33 = vshrl.u32 %v9881_v16, 16 }
 0x1b7   : > { %10970 = vmatmul.mubr.msk.bf16.vlgmr.msra.gmra.mrb[28].mxu0 %vm427_vm2, %v5896_v46  ;;  %10976 = vmatmul.mubr.msk.bf16.vlgmr.msra.gmra.mrb[28].mxu1 %vm427_vm2, %v5946_v32  ;;  %v7135_v46 = vrot.slane %v7133_v14, 1  ;;  %v7138_v32 = vshll.u32 %v13671_v43, 16  ;;  %v7330_v14 = vshll.u32 %v13728_v8, 16 }
 0x1b8   : > { %10980 = vmatpush3.bf16.msra.mxu0 %v13537_v25  ;;  %10986 = vmatpush3.bf16.msra.mxu1 %v13537_v25 }
 0x1b9   : > { %10981 = vmatprep.mubr.msk.bf16.mxu0 %vm12212_vm3, %v14319_v26  ;;  %10987 = vmatprep.mubr.msk.bf16.mxu1 %vm12212_vm3, %v14319_v26 }
 0x1ba   : > { %10991 = vmatprep.subr.bf16.mxu0 %v14319_v26  ;;  %10997 = vmatprep.subr.bf16.mxu1 %v14319_v26 }
 0x1bf   : > { %10982 = vmatmul.mubr.msk.bf16.vlgmr.msra.gmra.mrb[0].mxu0 %vm427_vm2, %v12034_v29  ;;  %10988 = vmatmul.mubr.msk.bf16.vlgmr.msra.gmra.mrb[0].mxu1 %vm427_vm2, %v12035_v39  ;;  %v7197_v29 = vshll.u32 %v9878_v22, 16  ;;  %v13703_v39 = vld [vmem:[%s12344_s26 + $0x5c] ss:$0 sps:$4 sm:$0x11]   ;;  %v7394_v22 = vshll.u32 %v13731_v56, 16 }
 0x1c0   : > { %10992 = vmatpush3.bf16.msra.mxu0 %v13537_v25  ;;  %10998 = vmatpush3.bf16.msra.mxu1 %v13537_v25 }
 0x1c1   : > { %10993 = vmatprep.mubr.msk.bf16.mxu0 %vm12212_vm3, %v14319_v26  ;;  %10999 = vmatprep.mubr.msk.bf16.mxu1 %vm12212_vm3, %v14319_v26  ;;  %v7199_v51 = vrot.slane %v7197_v29, 1  ;;  %v9847_v29 = vld [vmem:[%s12344_s26 + $0x90] sm:$0xf] }
 0x1c2   : > { %11003 = vmatprep.subr.bf16.mxu0 %v14319_v26  ;;  %11009 = vmatprep.subr.bf16.mxu1 %v14319_v26 }
 0x1c3   : > { %v7200_v62 = vor.u32 %v7199_v51, %v7195_v24 }
 0x1c7   : > { %10994 = vmatmul.mubr.msk.bf16.vlgmr.msra.gmra.mrb[4].mxu0 %vm427_vm2, %v12036_v45  ;;  %11000 = vmatmul.mubr.msk.bf16.vlgmr.msra.gmra.mrb[4].mxu1 %vm427_vm2, %v12037_v49  ;;  %v7261_v45 = vshll.u32 %v9881_v16, 16  ;;  %v7072_v49 = vor.u32 %v7071_v50, %v7067_v47  ;;  %v7453_v47 = vshll.u32 %v9890_v0, 16  ;;  %v13763_v50 = vld [vmem:[%s12344_s26 + $0x8c] ss:$0 sps:$4 sm:$0x11]   ;;  %v7517_v16 = vshll.u32 %v9893_v5, 16 }
 0x1c8   : > { %11004 = vmatpush3.bf16.msra.mxu0 %v13537_v25  ;;  %11010 = vmatpush3.bf16.msra.mxu1 %v13537_v25  ;;  %v7522_v24 = vshll.u32 %v13763_v50, 16 }
 0x1c9   : > { %11005 = vmatprep.mubr.msk.bf16.mxu0 %vm12212_vm3, %v14319_v26  ;;  %11011 = vmatprep.mubr.msk.bf16.mxu1 %vm12212_vm3, %v14319_v26 }
 0x1ca   : > { %11015 = vmatprep.subr.bf16.mxu0 %v14319_v26  ;;  %11021 = vmatprep.subr.bf16.mxu1 %v14319_v26 }
 0x1cf   : > { %11006 = vmatmul.mubr.msk.bf16.vlgmr.msra.gmra.mrb[8].mxu0 %vm427_vm2, %v12038_v52  ;;  %11012 = vmatmul.mubr.msk.bf16.vlgmr.msra.gmra.mrb[8].mxu1 %vm427_vm2, %v12039_v19  ;;  %v7076_v52 = vrot.slane %v7074_v21, 1  ;;  %v7136_v19 = vor.u32 %v7135_v46, %v7131_v12  ;;  %v7332_v12 = vrot.slane %v7330_v14, 1 }
 0x1d0   : > { %11016 = vmatpush3.bf16.msra.mxu0 %v13537_v25  ;;  %11022 = vmatpush3.bf16.msra.mxu1 %v13537_v25 }
 0x1d1   : > { %11017 = vmatprep.mubr.msk.bf16.mxu0 %vm12212_vm3, %v14319_v26  ;;  %11023 = vmatprep.mubr.msk.bf16.mxu1 %vm12212_vm3, %v14319_v26  ;;  %v7077_v7 = vsel %vm1301_vm4, %v7072_v49, %v7076_v52  ;;  %v9850_v52 = vld [vmem:[%s12344_s26 + $0x9c] sm:$0xf] }
 0x1d2   : > { %11027 = vmatprep.subr.bf16.mxu0 %v14319_v26  ;;  %11033 = vmatprep.subr.bf16.mxu1 %v14319_v26 }
 0x1d7   : > { %11018 = vmatmul.mubr.msk.bf16.vlgmr.msra.gmra.mrb[12].mxu0 %vm427_vm2, %v12040_v10  ;;  %11024 = vmatmul.mubr.msk.bf16.vlgmr.msra.gmra.mrb[12].mxu1 %vm427_vm2, %v12041_v17  ;;  %v7140_v10 = vrot.slane %v7138_v32, 1  ;;  %v9835_v17 = vld [vmem:[%s12344_s26 + $0x60] sm:$0xf]  ;;  %v7396_v32 = vrot.slane %v7394_v22, 1 }
 0x1d8   : > { %11028 = vmatpush3.bf16.msra.mxu0 %v13537_v25  ;;  %11034 = vmatpush3.bf16.msra.mxu1 %v13537_v25 }
 0x1d9   : > { %11029 = vmatprep.mubr.msk.bf16.mxu0 %vm12212_vm3, %v14319_v26  ;;  %11035 = vmatprep.mubr.msk.bf16.mxu1 %vm12212_vm3, %v14319_v26  ;;  %v7141_v60 = vsel %vm1301_vm4, %v7136_v19, %v7140_v10  ;;  %v13778_v19 = vld [vmem:[%s12344_s26 + $0xa0] sm:$0xf]  ;;  %v7451_v10 = vshrl.u32 %v9890_v0, 16 }
 0x1da   : > { %11039 = vmatprep.subr.bf16.mxu0 %v14319_v26  ;;  %11045 = vmatprep.subr.bf16.mxu1 %v14319_v26 }
 0x1df   : > { %11030 = vmatmul.mubr.msk.bf16.vlgmr.msra.gmra.mrb[16].mxu0 %vm427_vm2, %v12042_v11  ;;  %11036 = vmatmul.mubr.msk.bf16.vlgmr.msra.gmra.mrb[16].mxu1 %vm427_vm2, %v12043_v3  ;;  %v13709_v11 = vld [vmem:[%s12344_s26 + $0x64] sm:$0xf] }
 0x1e0   : > { %11040 = vmatpush3.bf16.msra.mxu0 %v13537_v25  ;;  %11046 = vmatpush3.bf16.msra.mxu1 %v13537_v25  ;;  %v9884_v35 = vcombine.low %v9835_v17, %v13709_v11  ;;  %v7455_v17 = vrot.slane %v7453_v47, 1  ;;  %v13818_v47 = vld [vmem:[%s12344_s26 + $0xb0] ss:$0 sps:$4 sm:$0x11]  }
 0x1e1   : > { %11041 = vmatprep.mubr.msk.bf16.mxu0 %vm12212_vm3, %v14319_v26  ;;  %11047 = vmatprep.mubr.msk.bf16.mxu1 %vm12212_vm3, %v14319_v26 }
 0x1e2   : > { %11051 = vmatprep.subr.bf16.mxu0 %v14319_v26  ;;  %11057 = vmatprep.subr.bf16.mxu1 %v14319_v26  ;;  %v7323_v57 = vshrl.u32 %v9884_v35, 16 }
 0x1e7   : > { %11042 = vmatmul.mubr.msk.bf16.vlgmr.msra.gmra.mrb[20].mxu0 %vm427_vm2, %v12044_v13  ;;  %11048 = vmatmul.mubr.msk.bf16.vlgmr.msra.gmra.mrb[20].mxu1 %vm427_vm2, %v12045_v23  ;;  %v9838_v13 = vld [vmem:[%s12344_s26 + $0x6c] sm:$0xf]  ;;  %v13718_v23 = vld [vmem:[%s12344_s26 + $0x70] sm:$0xf] }
 0x1e8   : > { %11052 = vmatpush3.bf16.msra.mxu0 %v13537_v25  ;;  %11058 = vmatpush3.bf16.msra.mxu1 %v13537_v25  ;;  %v9887_v41 = vcombine.low %v9838_v13, %v13718_v23  ;;  %v7519_v13 = vrot.slane %v7517_v16, 1 }
 0x1e9   : > { %11053 = vmatprep.mubr.msk.bf16.mxu0 %vm12212_vm3, %v14319_v26  ;;  %11059 = vmatprep.mubr.msk.bf16.mxu1 %vm12212_vm3, %v14319_v26 }
 0x1ea   : > { %11063 = vmatprep.subr.bf16.mxu0 %v14319_v26  ;;  %11069 = vmatprep.subr.bf16.mxu1 %v14319_v26  ;;  %v7389_v2 = vshll.u32 %v9887_v41, 16  ;;  %v7387_v59 = vshrl.u32 %v9887_v41, 16  ;;  %v13791_v41 = vld [vmem:[%s12344_s26 + $0xa4] ss:$0 sps:$4 sm:$0x11]  }
 0x1eb   : > { %v7650_v22 = vshll.u32 %v13791_v41, 16 }
 0x1ef   : > { %11054 = vmatmul.mubr.msk.bf16.vlgmr.msra.gmra.mrb[24].mxu0 %vm427_vm2, %v12046_v31  ;;  %11060 = vmatmul.mubr.msk.bf16.vlgmr.msra.gmra.mrb[24].mxu1 %vm427_vm2, %v12047_v40  ;;  %v7263_v31 = vrot.slane %v7261_v45, 1  ;;  %v7266_v40 = vshll.u32 %v13703_v39, 16  ;;  %v13769_v45 = vld [vmem:[%s12344_s26 + $0x94] sm:$0xf] }
 0x1f0   : > { %11064 = vmatpush3.bf16.msra.mxu0 %v13537_v25  ;;  %11070 = vmatpush3.bf16.msra.mxu1 %v13537_v25  ;;  %v13698_v25 = vld [vmem:[%s12344_s26 + $0x50] ss:$0 sps:$4 sm:$0x11]   ;;  %v9896_v51 = vcombine.low %v9847_v29, %v13769_v45 }
 0x1f1   : > { %11065 = vmatprep.mubr.msk.bf16.mxu0 %vm12212_vm3, %v14319_v26  ;;  %11071 = vmatprep.mubr.msk.bf16.mxu1 %vm12212_vm3, %v14319_v26  ;;  %v7202_v3 = vshll.u32 %v13698_v25, 16  ;;  %v7264_v4 = vor.u32 %v7263_v31, %v7259_v33 }
 0x1f2   : > { %11075 = vmatprep.subr.bf16.mxu0 %v14319_v26  ;;  %11081 = vmatprep.subr.bf16.mxu1 %v14319_v26 }
 0x1f3   : > { %v7204_v54 = vrot.slane %v7202_v3, 1  ;;  %v7515_v3 = vshrl.u32 %v9893_v5, 16 }
 0x1f5   : > { %v7205_v42 = vsel %vm1301_vm4, %v7200_v62, %v7204_v54  ;;  %v7520_v54 = vor.u32 %v7519_v13, %v7515_v3  ;;  %v7524_v62 = vrot.slane %v7522_v24, 1  ;;  %v13837_v3 = vld [vmem:[%s12344_s26 + $0xd0] sm:$0xf] }
 0x1f7   : > { %11066 = vmatmul.mubr.msk.bf16.vlgmr.msra.gmra.mrb[28].mxu0 %vm427_vm2, %v12048_v1  ;;  %11072 = vmatmul.mubr.msk.bf16.vlgmr.msra.gmra.mrb[28].mxu1 %vm427_vm2, %v12049_v9  ;;  %v7268_v1 = vrot.slane %v7266_v40, 1  ;;  %v7325_v9 = vshll.u32 %v9884_v35, 16  ;;  %v9899_v40 = vcombine.low %v9850_v52, %v13778_v19  ;;  %v9859_v52 = vld [vmem:[%s12344_s26 + $0xc0] sm:$0xf] }
 0x1f8   : > { %11076 = vmatpush3.bf16.msra.mxu0 %v13665_v48  ;;  %11082 = vmatpush3.bf16.msra.mxu1 %v13665_v48 }
 0x1f9   : > { %11077 = vmatprep.mubr.msk.bf16.mxu0 %vm12212_vm3, %v14319_v26  ;;  %11083 = vmatprep.mubr.msk.bf16.mxu1 %vm12212_vm3, %v14319_v26  ;;  %v7269_v37 = vsel %vm1301_vm4, %v7264_v4, %v7268_v1  ;;  %v7327_v20 = vrot.slane %v7325_v9, 1  ;;  %v7581_v4 = vshll.u32 %v9896_v51, 16  ;;  %v9853_v1 = vld [vmem:[%s12344_s26 + $0xa8] sm:$0xf]  ;;  %v13797_v9 = vld [vmem:[%s12344_s26 + $0xac] sm:$0xf] }
 0x1fa   : > { %11087 = vmatprep.subr.bf16.mxu0 %v14319_v26  ;;  %11093 = vmatprep.subr.bf16.mxu1 %v14319_v26  ;;  %v7645_v55 = vshll.u32 %v9899_v40, 16  ;;  %v9902_v0 = vcombine.low %v9853_v1, %v13797_v9 }
 0x1fb   : > { %v7328_v21 = vor.u32 %v7327_v20, %v7323_v57  ;;  %v7579_v57 = vshrl.u32 %v9896_v51, 16  ;;  %v7583_v20 = vrot.slane %v7581_v4, 1  ;;  %v7714_v51 = vshll.u32 %v13818_v47, 16 }
 0x1fc   : > { %v7709_v16 = vshll.u32 %v9902_v0, 16  ;;  %v7707_v13 = vshrl.u32 %v9902_v0, 16 }
 0x1fd   : > { %v7333_v33 = vsel %vm1301_vm4, %v7328_v21, %v7332_v12  ;;  %v13823_v21 = vld [vmem:[%s12344_s26 + $0xbc] ss:$0 sps:$4 sm:$0x11]   ;;  %v7716_v1 = vrot.slane %v7714_v51, 1 }
 0x1fe   : > { %v7711_v24 = vrot.slane %v7709_v16, 1 }
 0x1ff   : > { %11078 = vmatmul.mubr.msk.bf16.vlgmr.msra.gmra.mrb[0].mxu0 %vm427_vm2, %v6946_v44  ;;  %11084 = vmatmul.mubr.msk.bf16.vlgmr.msra.gmra.mrb[0].mxu1 %vm427_vm2, %v7013_v18  ;;  %v7391_v44 = vrot.slane %v7389_v2, 1  ;;  %v13758_v18 = vld [vmem:[%s12344_s26 + $0x80] ss:$0 sps:$4 sm:$0x11]   ;;  %v9856_v2 = vld [vmem:[%s12344_s26 + $0xb4] sm:$0xf] }
 0x200   : > { %11088 = vmatpush3.bf16.msra.mxu0 %v13665_v48  ;;  %11094 = vmatpush3.bf16.msra.mxu1 %v13665_v48  ;;  %v7458_v49 = vshll.u32 %v13758_v18, 16  ;;  %v9905_v5 = vcombine.low %v9856_v2, %v13803_v38  ;;  %v7712_v4 = vor.u32 %v7711_v24, %v7707_v13  ;;  %v9930_v13 = vld [vmem:[%s12349_s24 + $0x20] sm:$0xf] }
 0x201   : > { %11089 = vmatprep.mubr.msk.bf16.mxu0 %vm12212_vm3, %v14319_v26  ;;  %11095 = vmatprep.mubr.msk.bf16.mxu1 %vm12212_vm3, %v14319_v26  ;;  %v7392_v46 = vor.u32 %v7391_v44, %v7387_v59  ;;  %v7643_v59 = vshrl.u32 %v9899_v40, 16  ;;  %v7647_v44 = vrot.slane %v7645_v55, 1  ;;  %v7778_v40 = vshll.u32 %v13823_v21, 16 }
 0x202   : > { %11099 = vmatprep.subr.bf16.mxu0 %v14319_v26  ;;  %11105 = vmatprep.subr.bf16.mxu1 %v14319_v26  ;;  %v7460_v35 = vrot.slane %v7458_v49, 1  ;;  %v7773_v12 = vshll.u32 %v9905_v5, 16  ;;  %v7652_v49 = vrot.slane %v7650_v22, 1 }
 0x203   : > { %v7397_v31 = vsel %vm1301_vm4, %v7392_v46, %v7396_v32  ;;  %v7584_v46 = vor.u32 %v7583_v20, %v7579_v57  ;;  %v7648_v29 = vor.u32 %v7647_v44, %v7643_v59  ;;  %v7780_v2 = vrot.slane %v7778_v40, 1 }
 0x204   : > { %v7717_v20 = vsel %vm1301_vm4, %v7712_v4, %v7716_v1 }
 0x207   : > { %11090 = vmatmul.mubr.msk.bf16.vlgmr.msra.gmra.mrb[4].mxu0 %vm427_vm2, %v7077_v7  ;;  %11096 = vmatmul.mubr.msk.bf16.vlgmr.msra.gmra.mrb[4].mxu1 %vm427_vm2, %v7141_v60  ;;  %v7456_v7 = vor.u32 %v7455_v17, %v7451_v10  ;;  %v13788_v60 = vld [vmem:[%s12344_s26 + $0x98] ss:$0 sps:$4 sm:$0x11]   ;;  %v13829_v10 = vld [vmem:[%s12344_s26 + $0xc4] sm:$0xf] }
 0x208   : > { %11100 = vmatpush3.bf16.msra.mxu0 %v13665_v48  ;;  %11106 = vmatpush3.bf16.msra.mxu1 %v13665_v48  ;;  %v7586_v14 = vshll.u32 %v13788_v60, 16  ;;  %v9862_v17 = vld [vmem:[%s12344_s26 + $0xcc] sm:$0xf] }
 0x209   : > { %11101 = vmatprep.mubr.msk.bf16.mxu0 %vm12212_vm3, %v14319_v26  ;;  %11107 = vmatprep.mubr.msk.bf16.mxu1 %vm12212_vm3, %v14319_v26 }
 0x20a   : > { %11111 = vmatprep.subr.bf16.mxu0 %v14319_v26  ;;  %11117 = vmatprep.subr.bf16.mxu1 %v14319_v26  ;;  %v7588_v32 = vrot.slane %v7586_v14, 1 }
 0x20f   : > { %11102 = vmatmul.mubr.msk.bf16.vlgmr.msra.gmra.mrb[8].mxu0 %vm427_vm2, %v7205_v42  ;;  %11108 = vmatmul.mubr.msk.bf16.vlgmr.msra.gmra.mrb[8].mxu1 %vm427_vm2, %v7269_v37  ;;  %v7461_v42 = vsel %vm1301_vm4, %v7456_v7, %v7460_v35  ;;  %v7525_v37 = vsel %vm1301_vm4, %v7520_v54, %v7524_v62  ;;  %v9908_v35 = vcombine.low %v9859_v52, %v13829_v10  ;;  %v9914_v52 = vld [vmem:[%s12344_s26 + $0x18] sm:$0xe] }
 0x210   : > { %11112 = vmatpush3.bf16.msra.mxu0 %v13665_v48  ;;  %11118 = vmatpush3.bf16.msra.mxu1 %v13665_v48  ;;  %v7589_v7 = vsel %vm1301_vm4, %v7584_v46, %v7588_v32  ;;  %v7653_v54 = vsel %vm1301_vm4, %v7648_v29, %v7652_v49  ;;  %v9911_v62 = vcombine.low %v9862_v17, %v13837_v3  ;;  %v9915_v17 = vld [vmem:[%s12344_s26 + $0x24] sm:$0xe] }
 0x211   : > { %11113 = vmatprep.mubr.msk.bf16.mxu0 %vm12212_vm3, %v14319_v26  ;;  %11119 = vmatprep.mubr.msk.bf16.mxu1 %vm12212_vm3, %v14319_v26  ;;  %v7837_v0 = vshll.u32 %v9908_v35, 16  ;;  %v7835_v14 = vshrl.u32 %v9908_v35, 16  ;;  %v9931_v51 = vcombine.low %v9914_v52, %v13615_v34  ;;  %v8008_v35 = vrot.slane %v13634_v61, 1  ;;  %v9916_v34 = vld [vmem:[%s12344_s26 + $0x30] sm:$0xe] }
 0x212   : > { %11123 = vmatprep.subr.bf16.mxu0 %v14319_v26  ;;  %11129 = vmatprep.subr.bf16.mxu1 %v14319_v26  ;;  %v7901_v57 = vshll.u32 %v9911_v62, 16  ;;  %v7899_v22 = vshrl.u32 %v9911_v62, 16 }
 0x213   : > { %v7839_v59 = vrot.slane %v7837_v0, 1  ;;  %v8007_v40 = vrot.slane %v9931_v51, 1  ;;  %v8161_v0 = vrot.slane %v13671_v43, 1 }
 0x214   : > { %v7903_v16 = vrot.slane %v7901_v57, 1 }
 0x215   : > { %v7840_v46 = vor.u32 %v7839_v59, %v7835_v14  ;;  %v8009_v62 = vsel %vm2374_vm5, %v8007_v40, %v8008_v35  ;;  %v8211_v14 = vrot.slane %v13698_v25, 1  ;;  %v8511_v35 = vrot.slane %v13788_v60, 1 }
 0x216   : > { %v7904_v29 = vor.u32 %v7903_v16, %v7899_v22 }
 0x217   : > { %11114 = vmatmul.mubr.msk.bf16.vlgmr.msra.gmra.mrb[12].mxu0 %vm427_vm2, %v7333_v33  ;;  %11120 = vmatmul.mubr.msk.bf16.vlgmr.msra.gmra.mrb[12].mxu1 %vm427_vm2, %v7397_v31  ;;  %v7771_v33 = vshrl.u32 %v9905_v5, 16  ;;  %v7775_v31 = vrot.slane %v7773_v12, 1 }
 0x218   : > { %11124 = vmatpush3.bf16.msra.mxu0 %v13665_v48  ;;  %11130 = vmatpush3.bf16.msra.mxu1 %v13665_v48 }
 0x219   : > { %11125 = vmatprep.mubr.msk.bf16.mxu0 %vm12212_vm3, %v14319_v26  ;;  %11131 = vmatprep.mubr.msk.bf16.mxu1 %vm12212_vm3, %v14319_v26  ;;  %v7776_v55 = vor.u32 %v7775_v31, %v7771_v33  ;;  %v9933_v33 = vcombine.low %v9915_v17, %v13621_v30  ;;  %v13885_v31 = vsel %vm431_vm1, %v9930_v13, 0  ;;  %v9917_v30 = vld [vmem:[%s12344_s26 + $0x3c] sm:$0xe]  ;;  %v8411_v13 = vrot.slane %v13758_v18, 1 }
 0x21a   : > { %11135 = vmatprep.subr.bf16.mxu0 %v14319_v26  ;;  %11141 = vmatprep.subr.bf16.mxu1 %v14319_v26  ;;  %v9937_v4 = vcombine.low %v9917_v30, %v13654_v63  ;;  %v9919_v63 = vld [vmem:[%s12344_s26 + $0x54] sm:$0xe] }
 0x21b   : > { %v7781_v5 = vsel %vm1301_vm4, %v7776_v55, %v7780_v2  ;;  %v8111_v55 = vrot.slane %v13668_v53, 1 }
 0x21c   : > { %v8160_v2 = vrot.slane %v9937_v4, 1  ;;  %v8661_v4 = vrot.slane %v13823_v21, 1 }
 0x21e   : > { %v8162_v53 = vsel %vm2374_vm5, %v8160_v2, %v8161_v0 }
 0x21f   : > { %11126 = vmatmul.mubr.msk.bf16.vlgmr.msra.gmra.mrb[16].mxu0 %vm427_vm2, %v7461_v42  ;;  %11132 = vmatmul.mubr.msk.bf16.vlgmr.msra.gmra.mrb[16].mxu1 %vm427_vm2, %v7525_v37  ;;  %v13850_v42 = vld [vmem:[%s12344_s26 + $0xc8] ss:$0 sps:$4 sm:$0x11]   ;;  %v13855_v37 = vld [vmem:[%s12344_s26 + $0xd4] ss:$0 sps:$4 sm:$0x11]  }
 0x220   : > { %11136 = vmatpush3.bf16.msra.mxu0 %v13665_v48  ;;  %11142 = vmatpush3.bf16.msra.mxu1 %v13665_v48  ;;  %v7842_v44 = vshll.u32 %v13850_v42, 16  ;;  %v7906_v12 = vshll.u32 %v13855_v37, 16  ;;  %v8711_v0 = vrot.slane %v13850_v42, 1 }
 0x221   : > { %11137 = vmatprep.mubr.msk.bf16.mxu0 %vm12212_vm3, %v14319_v26  ;;  %11143 = vmatprep.mubr.msk.bf16.mxu1 %vm12212_vm3, %v14319_v26 }
 0x222   : > { %11147 = vmatprep.subr.bf16.mxu0 %v14319_v26  ;;  %11153 = vmatprep.subr.bf16.mxu1 %v14319_v26  ;;  %v7844_v32 = vrot.slane %v7842_v44, 1  ;;  %v7908_v49 = vrot.slane %v7906_v12, 1  ;;  %v8261_v44 = vrot.slane %v13703_v39, 1 }
 0x224   : > { %v7909_v24 = vsel %vm1301_vm4, %v7904_v29, %v7908_v49  ;;  %v8361_v29 = vrot.slane %v13731_v56, 1 }
 0x227   : > { %11138 = vmatmul.mubr.msk.bf16.vlgmr.msra.gmra.mrb[20].mxu0 %vm427_vm2, %v7589_v7  ;;  %11144 = vmatmul.mubr.msk.bf16.vlgmr.msra.gmra.mrb[20].mxu1 %vm427_vm2, %v7653_v54  ;;  %v8060_v7 = vrot.slane %v9933_v33, 1  ;;  %v8061_v54 = vrot.slane %v13639_v27, 1  ;;  %v9935_v27 = vcombine.low %v9916_v34, %v13645_v15  ;;  %v9918_v15 = vld [vmem:[%s12344_s26 + $0x48] sm:$0xe] }
 0x228   : > { %11148 = vmatpush3.bf16.msra.mxu0 %v13665_v48  ;;  %11154 = vmatpush3.bf16.msra.mxu1 %v13665_v48  ;;  %v9939_v43 = vcombine.low %v9918_v15, %v13677_v28  ;;  %v9920_v28 = vld [vmem:[%s12344_s26 + $0x60] sm:$0xe] }
 0x229   : > { %11149 = vmatprep.mubr.msk.bf16.mxu0 %vm12212_vm3, %v14319_v26  ;;  %11155 = vmatprep.mubr.msk.bf16.mxu1 %vm12212_vm3, %v14319_v26  ;;  %v8062_v61 = vsel %vm2374_vm5, %v8060_v7, %v8061_v54  ;;  %v8110_v1 = vrot.slane %v9935_v27, 1  ;;  %v9943_v39 = vcombine.low %v9920_v28, %v13709_v11  ;;  %v9922_v11 = vld [vmem:[%s12344_s26 + $0x78] sm:$0xe]  ;;  %v8561_v54 = vrot.slane %v13791_v41, 1 }
 0x22a   : > { %11159 = vmatprep.subr.bf16.mxu0 %v14319_v26  ;;  %11165 = vmatprep.subr.bf16.mxu1 %v14319_v26  ;;  %v9947_v56 = vcombine.low %v9922_v11, %v13737_v36  ;;  %v9924_v36 = vld [vmem:[%s12344_s26 + $0x90] sm:$0xe] }
 0x22b   : > { %v8112_v57 = vsel %vm2374_vm5, %v8110_v1, %v8111_v55  ;;  %v8310_v12 = vrot.slane %v9943_v39, 1  ;;  %v361_v39 = vld [vmem:[#allocation2 + $0x20] sm:$0xff] }
 0x22c   : > { %v8410_v17 = vrot.slane %v9947_v56, 1 }
 0x22e   : > { %v8412_v51 = vsel %vm2374_vm5, %v8410_v17, %v8411_v13 }
 0x22f   : > { %11150 = vmatmul.mubr.msk.bf16.vlgmr.msra.gmra.mrb[24].mxu0 %vm427_vm2, %v7717_v20  ;;  %11156 = vmatmul.mubr.msk.bf16.vlgmr.msra.gmra.mrb[24].mxu1 %vm427_vm2, %v7781_v5  ;;  %v9941_v20 = vcombine.low %v9919_v63, %v13683_v58  ;;  %v8210_v5 = vrot.slane %v9939_v43, 1  ;;  %v9921_v58 = vld [vmem:[%s12344_s26 + $0x6c] sm:$0xe]  ;;  %v8761_v63 = vrot.slane %v13855_v37, 1  ;;  %v360_v43 = vld [vmem:[#allocation2 + $0x18] sm:$0xff] }
 0x230   : > { %11160 = vmatpush3.bf16.msra.mxu0 %v13665_v48  ;;  %11166 = vmatpush3.bf16.msra.mxu1 %v13665_v48  ;;  %v7845_v48 = vsel %vm1301_vm4, %v7840_v46, %v7844_v32  ;;  %v9945_v16 = vcombine.low %v9921_v58, %v13718_v23  ;;  %v8311_v46 = vrot.slane %v13728_v8, 1  ;;  %v9923_v23 = vld [vmem:[%s12344_s26 + $0x84] sm:$0xe]  ;;  %v358_v37 = vld [vmem:[#allocation2 + $0x8] sm:$0xff] }
 0x231   : > { %11161 = vmatprep.mubr.msk.bf16.mxu0 %vm12212_vm3, %v14319_v26  ;;  %11167 = vmatprep.mubr.msk.bf16.mxu1 %vm12212_vm3, %v14319_v26  ;;  %v8260_v59 = vrot.slane %v9941_v20, 1  ;;  %v8212_v22 = vsel %vm2374_vm5, %v8210_v5, %v8211_v14  ;;  %v9949_v52 = vcombine.low %v9923_v23, %v13743_v6  ;;  %v9925_v6 = vld [vmem:[%s12344_s26 + $0x9c] sm:$0xe] }
 0x232   : > { %11171 = vmatprep.subr.bf16.mxu0 %v14319_v26  ;;  %11177 = vmatprep.subr.bf16.mxu1 %v14319_v26  ;;  %v8360_v32 = vrot.slane %v9945_v16, 1  ;;  %v8312_v49 = vsel %vm2374_vm5, %v8310_v12, %v8311_v46  ;;  %v9953_v33 = vcombine.low %v9925_v6, %v13778_v19  ;;  %v9927_v19 = vld [vmem:[%s12344_s26 + $0xb4] sm:$0xe] }
 0x233   : > { %v8262_v25 = vsel %vm2374_vm5, %v8260_v59, %v8261_v44  ;;  %v9957_v30 = vcombine.low %v9927_v19, %v13803_v38  ;;  %v9929_v38 = vld [vmem:[%s12344_s26 + $0xcc] sm:$0xe]  ;;  %v363_v16 = vld [vmem:[#allocation2 + $0x30] sm:$0xff] }
 0x234   : > { %v8362_v8 = vsel %vm2374_vm5, %v8360_v32, %v8361_v29  ;;  %v8560_v7 = vrot.slane %v9953_v33, 1  ;;  %v9961_v21 = vcombine.low %v9929_v38, %v13837_v3  ;;  %v362_v32 = vld [vmem:[#allocation2 + $0x28] sm:$0xff]  ;;  %v364_v29 = vld [vmem:[#allocation2 + $0x38] sm:$0xff]  ;;  %v367_v6 = vld [vmem:[#allocation2 + $0x50] sm:$0xff] }
 0x235   : > { %v8660_v27 = vrot.slane %v9957_v30, 1  ;;  %v368_v33 = vld [vmem:[#allocation2 + $0x58] sm:$0xff] }
 0x236   : > { %v8562_v60 = vsel %vm2374_vm5, %v8560_v7, %v8561_v54  ;;  %v8760_v15 = vrot.slane %v9961_v21, 1  ;;  %v372_v38 = vld [vmem:[#allocation2 + $0x78] sm:$0xff] }
 0x237   : > { %11162 = vmatmul.mubr.msk.bf16.vlgmr.msra.gmra.mrb[28].mxu0 %vm427_vm2, %v7845_v48  ;;  %11168 = vmatmul.mubr.msk.bf16.vlgmr.msra.gmra.mrb[28].mxu1 %vm427_vm2, %v7909_v24  ;;  %v8460_v48 = vrot.slane %v9949_v52, 1  ;;  %v8461_v24 = vrot.slane %v13763_v50, 1  ;;  %v9951_v50 = vcombine.low %v9924_v36, %v13769_v45  ;;  %v9926_v45 = vld [vmem:[%s12344_s26 + $0xa8] sm:$0xe]  ;;  %v8662_v55 = vsel %vm2374_vm5, %v8660_v27, %v8661_v4  ;;  %v365_v36 = vld [vmem:[#allocation2 + $0x40] sm:$0xff] }
 0x238   : > { %11172 = vmatpush3.bf16.msra.mxu0 %v13885_v31  ;;  %11178 = vmatpush3.bf16.msra.mxu1 %v13885_v31  ;;  %v9955_v41 = vcombine.low %v9926_v45, %v13797_v9  ;;  %v9928_v9 = vld [vmem:[%s12344_s26 + $0xc0] sm:$0xe]  ;;  %v8762_v3 = vsel %vm2374_vm5, %v8760_v15, %v8761_v63 }
 0x239   : > { %11173 = vmatprep.mubr.msk.bf16.mxu0 %vm12212_vm3, %v14319_v26  ;;  %11179 = vmatprep.mubr.msk.bf16.mxu1 %vm12212_vm3, %v14319_v26  ;;  %v8462_v18 = vsel %vm2374_vm5, %v8460_v48, %v8461_v24  ;;  %v8510_v40 = vrot.slane %v9951_v50, 1  ;;  %v366_v50 = vld [vmem:[#allocation2 + $0x48] sm:$0xff] }
 0x23a   : > { %11183 = vmatprep.subr.bf16.mxu0 %v14319_v26  ;;  %11189 = vmatprep.subr.bf16.mxu1 %v14319_v26 }
 0x23b   : > { %v8512_v34 = vsel %vm2374_vm5, %v8510_v40, %v8511_v35 }
 0x23f   : > { %11174 = vmatmul.mubr.msk.bf16.vlgmr.msra.gmra.mrb[0].mxu0 %vm427_vm2, %v8009_v62  ;;  %11180 = vmatmul.mubr.msk.bf16.vlgmr.msra.gmra.mrb[0].mxu1 %vm427_vm2, %v8062_v61  ;;  %v8610_v62 = vrot.slane %v9955_v41, 1  ;;  %v8611_v61 = vrot.slane %v13818_v47, 1  ;;  %v9959_v47 = vcombine.low %v9928_v9, %v13829_v10  ;;  %v370_v9 = vld [vmem:[#allocation2 + $0x68] sm:$0xff] }
 0x240   : > { %11184 = vmatpush3.bf16.msra.mxu0 %v13885_v31  ;;  %11190 = vmatpush3.bf16.msra.mxu1 %v13885_v31 }
 0x241   : > { %11185 = vmatprep.mubr.msk.bf16.mxu0 %vm12212_vm3, %v14319_v26  ;;  %11191 = vmatprep.mubr.msk.bf16.mxu1 %vm12212_vm3, %v14319_v26  ;;  %v8612_v1 = vsel %vm2374_vm5, %v8610_v62, %v8611_v61  ;;  %v8710_v2 = vrot.slane %v9959_v47, 1  ;;  %v369_v62 = vld [vmem:[#allocation2 + $0x60] sm:$0xff]  ;;  %v371_v61 = vld [vmem:[#allocation2 + $0x70] sm:$0xff] }
 0x242   : > { %11195 = vmatprep.subr.bf16.mxu0 %v14319_v26  ;;  %11201 = vmatprep.subr.bf16.mxu1 %v14319_v26 }
 0x243   : > { %v8712_v10 = vsel %vm2374_vm5, %v8710_v2, %v8711_v0 }
 0x247   : > { %11186 = vmatmul.mubr.msk.bf16.vlgmr.msra.gmra.mrb[4].mxu0 %vm427_vm2, %v8112_v57  ;;  %11192 = vmatmul.mubr.msk.bf16.vlgmr.msra.gmra.mrb[4].mxu1 %vm427_vm2, %v8162_v53  ;;  %v359_v57 = vld [vmem:[#allocation2 + $0x10] sm:$0xff] }
 0x248   : > { %11196 = vmatpush3.bf16.msra.mxu0 %v13885_v31  ;;  %11202 = vmatpush3.bf16.msra.mxu1 %v13885_v31 }
 0x249   : > { %11197 = vmatprep.mubr.msk.bf16.mxu0 %vm12212_vm3, %v14319_v26  ;;  %11203 = vmatprep.mubr.msk.bf16.mxu1 %vm12212_vm3, %v14319_v26 }
 0x24a   : > { %11207 = vmatprep.subr.bf16.mxu0 %v14319_v26  ;;  %11213 = vmatprep.subr.bf16.mxu1 %v14319_v26 }
 0x24f   : > { %11198 = vmatmul.mubr.msk.bf16.vlgmr.msra.gmra.mrb[8].mxu0 %vm427_vm2, %v8212_v22  ;;  %11204 = vmatmul.mubr.msk.bf16.vlgmr.msra.gmra.mrb[8].mxu1 %vm427_vm2, %v8262_v25 }
 0x250   : > { %11208 = vmatpush3.bf16.msra.mxu0 %v13885_v31  ;;  %11214 = vmatpush3.bf16.msra.mxu1 %v13885_v31 }
 0x251   : > { %11209 = vmatprep.mubr.msk.bf16.mxu0 %vm12212_vm3, %v14319_v26  ;;  %11215 = vmatprep.mubr.msk.bf16.mxu1 %vm12212_vm3, %v14319_v26 }
 0x252   : > { %11219 = vmatprep.subr.bf16.mxu0 %v14319_v26  ;;  %11225 = vmatprep.subr.bf16.mxu1 %v14319_v26 }
 0x257   : > { %11210 = vmatmul.mubr.msk.bf16.vlgmr.msra.gmra.mrb[12].mxu0 %vm427_vm2, %v8312_v49  ;;  %11216 = vmatmul.mubr.msk.bf16.vlgmr.msra.gmra.mrb[12].mxu1 %vm427_vm2, %v8362_v8 }
 0x258   : > { %11220 = vmatpush3.bf16.msra.mxu0 %v13885_v31  ;;  %11226 = vmatpush3.bf16.msra.mxu1 %v13885_v31 }
 0x259   : > { %11221 = vmatprep.mubr.msk.bf16.mxu0 %vm12212_vm3, %v14319_v26  ;;  %11227 = vmatprep.mubr.msk.bf16.mxu1 %vm12212_vm3, %v14319_v26 }
 0x25a   : > { %11231 = vmatprep.subr.bf16.mxu0 %v14319_v26  ;;  %11237 = vmatprep.subr.bf16.mxu1 %v14319_v26 }
 0x25f   : > { %11222 = vmatmul.mubr.msk.bf16.vlgmr.msra.gmra.mrb[16].mxu0 %vm427_vm2, %v8412_v51  ;;  %11228 = vmatmul.mubr.msk.bf16.vlgmr.msra.gmra.mrb[16].mxu1 %vm427_vm2, %v8462_v18 }
 0x260   : > { %11232 = vmatpush3.bf16.msra.mxu0 %v13885_v31  ;;  %11238 = vmatpush3.bf16.msra.mxu1 %v13885_v31 }
 0x261   : > { %11233 = vmatprep.mubr.msk.bf16.mxu0 %vm12212_vm3, %v14319_v26  ;;  %11239 = vmatprep.mubr.msk.bf16.mxu1 %vm12212_vm3, %v14319_v26 }
 0x262   : > { %11243 = vmatprep.subr.bf16.mxu0 %v14319_v26  ;;  %11249 = vmatprep.subr.bf16.mxu1 %v14319_v26 }
 0x267   : > { %11234 = vmatmul.mubr.msk.bf16.vlgmr.msra.gmra.mrb[20].mxu0 %vm427_vm2, %v8512_v34  ;;  %11240 = vmatmul.mubr.msk.bf16.vlgmr.msra.gmra.mrb[20].mxu1 %vm427_vm2, %v8562_v60 }
 0x268   : > { %11244 = vmatpush3.bf16.msra.mxu0 %v13885_v31  ;;  %11250 = vmatpush3.bf16.msra.mxu1 %v13885_v31 }
 0x269   : > { %11245 = vmatprep.mubr.msk.bf16.mxu0 %vm12212_vm3, %v14319_v26  ;;  %11251 = vmatprep.mubr.msk.bf16.mxu1 %vm12212_vm3, %v14319_v26 }
 0x26a   : > { %11255 = vmatprep.subr.bf16.mxu0 %v14319_v26  ;;  %11261 = vmatprep.subr.bf16.mxu1 %v14319_v26 }
 0x26f   : > { %11246 = vmatmul.mubr.msk.bf16.vlgmr.msra.gmra.mrb[24].mxu0 %vm427_vm2, %v8612_v1  ;;  %11252 = vmatmul.mubr.msk.bf16.vlgmr.msra.gmra.mrb[24].mxu1 %vm427_vm2, %v8662_v55 }
 0x270   : > { %11256 = vmatpush3.bf16.msra.mxu0 %v13885_v31  ;;  %11262 = vmatpush3.bf16.msra.mxu1 %v13885_v31  ;;  %v357_v31 = vld [vmem:[#allocation2] sm:$0xff] }
 0x271   : > { %11257 = vmatprep.mubr.msk.bf16.mxu0 %vm12212_vm3, %v14319_v26  ;;  %11263 = vmatprep.mubr.msk.bf16.mxu1 %vm12212_vm3, %v14319_v26 }
 0x277   : > { %11258 = vmatmul.mubr.msk.bf16.vlgmr.msra.gmra.mrb[28].mxu0 %vm427_vm2, %v8712_v10  ;;  %11264 = vmatmul.mubr.msk.bf16.vlgmr.msra.gmra.mrb[28].mxu1 %vm427_vm2, %v8762_v3 }
 0x312   : > { %v8050_v42 = vpop.f32.mrb[0].mxu0  ;;  %v8100_v53 = vpop.f32.mrb[0].mxu1 }
 0x313   : > { %v11267_v20 = vadd.f32 %v8050_v42, %v357_v31  ;;  %v11269_v5 = vadd.f32 %v8100_v53, %v359_v57  ;;  %v11175_v14 = vpop.f32.mrb[1].mxu0  ;;  %v11181_v59 = vpop.f32.mrb[1].mxu1  ;;  %v373_v31 = vld [vmem:[#allocation2 + $0x80] sm:$0xff]  ;;  %v375_v57 = vld [vmem:[#allocation2 + $0x90] sm:$0xff] }
 0x314   : > { %v8053_v26 = vpop.f32.mrb[2].mxu0  ;;  %v8103_v44 = vpop.f32.mrb[2].mxu1 }
 0x315   : > { %8840 = vst.msk [vmem:[#allocation2] sm:$0xff] %vm8839_vm6, %v11267_v20  ;;  %8842 = vst.msk [vmem:[#allocation2 + $0x10] sm:$0xff] %vm8839_vm6, %v11269_v5  ;;  %v11268_v28 = vadd.f32 %v8053_v26, %v358_v37  ;;  %v11270_v58 = vadd.f32 %v8103_v44, %v360_v43  ;;  %v11176_v22 = vpop.f32.mrb[3].mxu0  ;;  %v11182_v25 = vpop.f32.mrb[3].mxu1  ;;  %v374_v37 = vld [vmem:[#allocation2 + $0x88] sm:$0xff]  ;;  %v376_v43 = vld [vmem:[#allocation2 + $0x98] sm:$0xff] }
 0x317   : > { %8841 = vst.msk [vmem:[#allocation2 + $0x8] sm:$0xff] %vm8839_vm6, %v11268_v28  ;;  %8843 = vst.msk [vmem:[#allocation2 + $0x18] sm:$0xff] %vm8839_vm6, %v11270_v58 }
 0x31a   : > { %v8150_v12 = vpop.f32.mrb[4].mxu0  ;;  %v8200_v46 = vpop.f32.mrb[4].mxu1 }
 0x31b   : > { %v11271_v11 = vadd.f32 %v8150_v12, %v361_v39  ;;  %v11273_v23 = vadd.f32 %v8200_v46, %v363_v16  ;;  %v11187_v49 = vpop.f32.mrb[5].mxu0  ;;  %v11193_v8 = vpop.f32.mrb[5].mxu1  ;;  %v377_v39 = vld [vmem:[#allocation2 + $0xa0] sm:$0xff]  ;;  %v379_v16 = vld [vmem:[#allocation2 + $0xb0] sm:$0xff] }
 0x31c   : > { %v8153_v56 = vpop.f32.mrb[6].mxu0  ;;  %v8203_v52 = vpop.f32.mrb[6].mxu1 }
 0x31d   : > { %8844 = vst.msk [vmem:[#allocation2 + $0x20] sm:$0xff] %vm8839_vm6, %v11271_v11  ;;  %8846 = vst.msk [vmem:[#allocation2 + $0x30] sm:$0xff] %vm8839_vm6, %v11273_v23  ;;  %v11272_v17 = vadd.f32 %v8153_v56, %v362_v32  ;;  %v11274_v13 = vadd.f32 %v8203_v52, %v364_v29  ;;  %v11188_v48 = vpop.f32.mrb[7].mxu0  ;;  %v11194_v24 = vpop.f32.mrb[7].mxu1  ;;  %v378_v32 = vld [vmem:[#allocation2 + $0xa8] sm:$0xff]  ;;  %v380_v29 = vld [vmem:[#allocation2 + $0xb8] sm:$0xff] }
 0x31f   : > { %8845 = vst.msk [vmem:[#allocation2 + $0x28] sm:$0xff] %vm8839_vm6, %v11272_v17  ;;  %8847 = vst.msk [vmem:[#allocation2 + $0x38] sm:$0xff] %vm8839_vm6, %v11274_v13 }
 0x322   : > { %v8250_v51 = vpop.f32.mrb[8].mxu0  ;;  %v8300_v18 = vpop.f32.mrb[8].mxu1 }
 0x323   : > { %v11275_v40 = vadd.f32 %v8250_v51, %v365_v36  ;;  %v11277_v35 = vadd.f32 %v8300_v18, %v367_v6  ;;  %v11199_v7 = vpop.f32.mrb[9].mxu0  ;;  %v11205_v54 = vpop.f32.mrb[9].mxu1  ;;  %v381_v36 = vld [vmem:[#allocation2 + $0xc0] sm:$0xff]  ;;  %v383_v6 = vld [vmem:[#allocation2 + $0xd0] sm:$0xff] }
 0x324   : > { %v8253_v45 = vpop.f32.mrb[10].mxu0  ;;  %v8303_v19 = vpop.f32.mrb[10].mxu1 }
 0x325   : > { %8848 = vst.msk [vmem:[#allocation2 + $0x40] sm:$0xff] %vm8839_vm6, %v11275_v40  ;;  %8850 = vst.msk [vmem:[#allocation2 + $0x50] sm:$0xff] %vm8839_vm6, %v11277_v35  ;;  %v11276_v34 = vadd.f32 %v8253_v45, %v366_v50  ;;  %v11278_v60 = vadd.f32 %v8303_v19, %v368_v33  ;;  %v11200_v41 = vpop.f32.mrb[11].mxu0  ;;  %v11206_v30 = vpop.f32.mrb[11].mxu1  ;;  %v382_v50 = vld [vmem:[#allocation2 + $0xc8] sm:$0xff]  ;;  %v384_v33 = vld [vmem:[#allocation2 + $0xd8] sm:$0xff] }
 0x327   : > { %8849 = vst.msk [vmem:[#allocation2 + $0x48] sm:$0xff] %vm8839_vm6, %v11276_v34  ;;  %8851 = vst.msk [vmem:[#allocation2 + $0x58] sm:$0xff] %vm8839_vm6, %v11278_v60 }
 0x32a   : > { %v8350_v27 = vpop.f32.mrb[12].mxu0  ;;  %v8400_v4 = vpop.f32.mrb[12].mxu1 }
 0x32b   : > { %v11279_v1 = vadd.f32 %v8350_v27, %v369_v62  ;;  %v11281_v55 = vadd.f32 %v8400_v4, %v371_v61  ;;  %v11211_v47 = vpop.f32.mrb[13].mxu0  ;;  %v11217_v21 = vpop.f32.mrb[13].mxu1  ;;  %v385_v62 = vld [vmem:[#allocation2 + $0xe0] sm:$0xff]  ;;  %v387_v61 = vld [vmem:[#allocation2 + $0xf0] sm:$0xff] }
 0x32c   : > { %v8353_v2 = vpop.f32.mrb[14].mxu0  ;;  %v8403_v0 = vpop.f32.mrb[14].mxu1 }
 0x32d   : > { %8852 = vst.msk [vmem:[#allocation2 + $0x60] sm:$0xff] %vm8839_vm6, %v11279_v1  ;;  %8854 = vst.msk [vmem:[#allocation2 + $0x70] sm:$0xff] %vm8839_vm6, %v11281_v55  ;;  %v11280_v15 = vadd.f32 %v8353_v2, %v370_v9  ;;  %v11282_v63 = vadd.f32 %v8403_v0, %v372_v38  ;;  %v11212_v10 = vpop.f32.mrb[15].mxu0  ;;  %v11218_v3 = vpop.f32.mrb[15].mxu1  ;;  %v386_v9 = vld [vmem:[#allocation2 + $0xe8] sm:$0xff]  ;;  %v388_v38 = vld [vmem:[#allocation2 + $0xf8] sm:$0xff] }
 0x32f   : > { %8853 = vst.msk [vmem:[#allocation2 + $0x68] sm:$0xff] %vm8839_vm6, %v11280_v15  ;;  %8855 = vst.msk [vmem:[#allocation2 + $0x78] sm:$0xff] %vm8839_vm6, %v11282_v63 }
 0x332   : > { %v8450_v42 = vpop.f32.mrb[16].mxu0  ;;  %v8500_v53 = vpop.f32.mrb[16].mxu1 }
 0x333   : > { %v11283_v20 = vadd.f32 %v8450_v42, %v373_v31  ;;  %v11285_v5 = vadd.f32 %v8500_v53, %v375_v57  ;;  %v11223_v14 = vpop.f32.mrb[17].mxu0  ;;  %v11229_v59 = vpop.f32.mrb[17].mxu1  ;;  %v8876_v31 = vld [vmem:[#allocation2] sm:$0xff] (!%p9963_p4) }
 0x334   : > { %v8453_v26 = vpop.f32.mrb[18].mxu0  ;;  %v8503_v44 = vpop.f32.mrb[18].mxu1  ;;  %v14063_v57 = vld [vmem:[%s14286_s2] ss:$0 sm:$0xff] (!%p9963_p4) }
 0x335   : > { %8856 = vst.msk [vmem:[#allocation2 + $0x80] sm:$0xff] %vm8839_vm6, %v11283_v20  ;;  %8858 = vst.msk [vmem:[#allocation2 + $0x90] sm:$0xff] %vm8839_vm6, %v11285_v5  ;;  %v11284_v28 = vadd.f32 %v8453_v26, %v374_v37  ;;  %v11286_v58 = vadd.f32 %v8503_v44, %v376_v43  ;;  %v11224_v22 = vpop.f32.mrb[19].mxu0  ;;  %v11230_v25 = vpop.f32.mrb[19].mxu1  ;;  %v14068_v42 = vld [vmem:[%s14287_s3] ss:$0 sm:$0xff] (!%p9963_p4)  ;;  %v8915_v53 = vmul.f32 (!%p9963_p4), %v14063_v57, %v8876_v31 }
 0x336   : > { %v10037_v37 = vld [vmem:[%s12355_s10] sm:$0xff] (!%p9963_p4)   ;;  %v8877_v43 = vld [vmem:[#allocation2 + $0x8] sm:$0xff] (!%p9963_p4)  ;;  %v8878_v20 = vld [vmem:[#allocation2 + $0x10] sm:$0xff] (!%p9963_p4) }
 0x337   : > { %8857 = vst.msk [vmem:[#allocation2 + $0x88] sm:$0xff] %vm8839_vm6, %v11284_v28  ;;  %8859 = vst.msk [vmem:[#allocation2 + $0x98] sm:$0xff] %vm8839_vm6, %v11286_v58  ;;  %v10038_v5 = vunpack.c.l.bf16 (!%p9963_p4), %v10037_v37  ;;  %v8916_v14 = vmul.f32 (!%p9963_p4), %v14063_v57, %v8877_v43  ;;  %v10039_v59 = vunpack.c.h.bf16 (!%p9963_p4), %v10037_v37  ;;  %v8917_v26 = vmul.f32 (!%p9963_p4), %v14063_v57, %v8878_v20  ;;  %v10100_v44 = vld [vmem:[%s12355_s10 + $0x8] sm:$0xff] (!%p9963_p4)   ;;  %v8879_v28 = vld [vmem:[#allocation2 + $0x18] sm:$0xff] (!%p9963_p4) }
 0x338   : > { %v8880_v58 = vld [vmem:[#allocation2 + $0x20] sm:$0xff] (!%p9963_p4)  ;;  %v8954_v22 = vadd.f32 (!%p9963_p4), %v14068_v42, %v8915_v53  ;;  %v10042_v25 = vunpack.c.l.bf16 (!%p9963_p4), %v10100_v44  ;;  %v8887_v31 = vld [vmem:[#allocation2 + $0x58] sm:$0xff] (!%p9963_p4) }
 0x33a   : > { %v8550_v12 = vpop.f32.mrb[20].mxu0  ;;  %v8600_v46 = vpop.f32.mrb[20].mxu1 }
 0x33b   : > { %v11287_v11 = vadd.f32 %v8550_v12, %v377_v39  ;;  %v11289_v23 = vadd.f32 %v8600_v46, %v379_v16  ;;  %v11235_v49 = vpop.f32.mrb[21].mxu0  ;;  %v11241_v8 = vpop.f32.mrb[21].mxu1  ;;  %v8918_v39 = vmul.f32 (!%p9963_p4), %v14063_v57, %v8879_v28  ;;  %v10043_v16 = vunpack.c.h.bf16 (!%p9963_p4), %v10100_v44  ;;  %v10101_v12 = vld [vmem:[%s12355_s10 + $0x10] sm:$0xff] (!%p9963_p4)   ;;  %v8881_v46 = vld [vmem:[#allocation2 + $0x28] sm:$0xff] (!%p9963_p4) }
 0x33c   : > { %v8553_v56 = vpop.f32.mrb[22].mxu0  ;;  %v8603_v52 = vpop.f32.mrb[22].mxu1  ;;  %v10046_v49 = vunpack.c.l.bf16 (!%p9963_p4), %v10101_v12  ;;  %v10102_v8 = vld [vmem:[%s12355_s10 + $0x18] sm:$0xff] (!%p9963_p4)  }
 0x33d   : > { %8860 = vst.msk [vmem:[#allocation2 + $0xa0] sm:$0xff] %vm8839_vm6, %v11287_v11  ;;  %8862 = vst.msk [vmem:[#allocation2 + $0xb0] sm:$0xff] %vm8839_vm6, %v11289_v23  ;;  %v11288_v17 = vadd.f32 %v8553_v56, %v378_v32  ;;  %v11290_v13 = vadd.f32 %v8603_v52, %v380_v29  ;;  %v11236_v48 = vpop.f32.mrb[23].mxu0  ;;  %v11242_v24 = vpop.f32.mrb[23].mxu1  ;;  %v8882_v32 = vld [vmem:[#allocation2 + $0x30] sm:$0xff] (!%p9963_p4)  ;;  %v8955_v29 = vadd.f32 (!%p9963_p4), %v14068_v42, %v8916_v14 }
 0x33e   : > { %v8956_v11 = vadd.f32 (!%p9963_p4), %v14068_v42, %v8917_v26  ;;  %v8919_v23 = vmul.f32 (!%p9963_p4), %v14063_v57, %v8880_v58  ;;  %v9050_v56 = vadd.f32 (!%p9963_p4), %v10038_v5, %v8954_v22  ;;  %v8957_v52 = vadd.f32 (!%p9963_p4), %v14068_v42, %v8918_v39  ;;  %v8888_v5 = vld [vmem:[#allocation2 + $0x60] sm:$0xff] (!%p9963_p4)  ;;  %v10105_v14 = vld [vmem:[%s12355_s10 + $0x30] sm:$0xff] (!%p9963_p4)   ;;  %v8889_v58 = vld [vmem:[#allocation2 + $0x68] sm:$0xff] (!%p9963_p4) }
 0x33f   : > { %8861 = vst.msk [vmem:[#allocation2 + $0xa8] sm:$0xff] %vm8839_vm6, %v11288_v17  ;;  %8863 = vst.msk [vmem:[#allocation2 + $0xb8] sm:$0xff] %vm8839_vm6, %v11290_v13  ;;  %v8920_v17 = vmul.f32 (!%p9963_p4), %v14063_v57, %v8881_v46  ;;  %v10047_v13 = vunpack.c.h.bf16 (!%p9963_p4), %v10101_v12  ;;  %v9051_v48 = vadd.f32 (!%p9963_p4), %v10039_v59, %v8955_v29  ;;  %v8926_v39 = vmul.f32 (!%p9963_p4), %v14063_v57, %v8887_v31 }
 0x340   : > { %v9052_v24 = vadd.f32 (!%p9963_p4), %v10042_v25, %v8956_v11  ;;  %v10062_v29 = vunpack.c.l.bf16 (!%p9963_p4), %v10105_v14  ;;  %v8890_v11 = vld [vmem:[#allocation2 + $0x70] sm:$0xff] (!%p9963_p4) }
 0x342   : > { %v8650_v51 = vpop.f32.mrb[24].mxu0  ;;  %v8700_v18 = vpop.f32.mrb[24].mxu1 }
 0x343   : > { %v11291_v40 = vadd.f32 %v8650_v51, %v381_v36  ;;  %v11293_v35 = vadd.f32 %v8700_v18, %v383_v6  ;;  %v11247_v7 = vpop.f32.mrb[25].mxu0  ;;  %v11253_v54 = vpop.f32.mrb[25].mxu1  ;;  %v8958_v36 = vadd.f32 (!%p9963_p4), %v14068_v42, %v8919_v23  ;;  %v8921_v6 = vmul.f32 (!%p9963_p4), %v14063_v57, %v8882_v32  ;;  %v8883_v51 = vld [vmem:[#allocation2 + $0x38] sm:$0xff] (!%p9963_p4) }
 0x344   : > { %v8653_v45 = vpop.f32.mrb[26].mxu0  ;;  %v8703_v19 = vpop.f32.mrb[26].mxu1  ;;  %v9082_v18 = vmax.f32 (!%p9963_p4), %v9050_v56, 0.0  ;;  %v9084_v7 = vmax.f32 (!%p9963_p4), %v9052_v24, 0.0  ;;  %v8927_v32 = vmul.f32 (!%p9963_p4), %v14063_v57, %v8888_v5  ;;  %v8928_v56 = vmul.f32 (!%p9963_p4), %v14063_v57, %v8889_v58 }
 0x345   : > { %8864 = vst.msk [vmem:[#allocation2 + $0xc0] sm:$0xff] %vm8839_vm6, %v11291_v40  ;;  %8866 = vst.msk [vmem:[#allocation2 + $0xd0] sm:$0xff] %vm8839_vm6, %v11293_v35  ;;  %v11292_v34 = vadd.f32 %v8653_v45, %v382_v50  ;;  %v11294_v60 = vadd.f32 %v8703_v19, %v384_v33  ;;  %v11248_v41 = vpop.f32.mrb[27].mxu0  ;;  %v11254_v30 = vpop.f32.mrb[27].mxu1  ;;  %v9053_v50 = vadd.f32 (!%p9963_p4), %v10043_v16, %v8957_v52  ;;  %v10050_v40 = vunpack.c.l.bf16 (!%p9963_p4), %v10102_v8  ;;  %v10106_v52 = vld [vmem:[%s12355_s10 + $0x38] sm:$0xff] (!%p9963_p4)  }
 0x346   : > { %v8959_v33 = vadd.f32 (!%p9963_p4), %v14068_v42, %v8920_v17  ;;  %v9083_v35 = vmax.f32 (!%p9963_p4), %v9051_v48, 0.0  ;;  %v9054_v54 = vadd.f32 (!%p9963_p4), %v10046_v49, %v8958_v36  ;;  %v8960_v45 = vadd.f32 (!%p9963_p4), %v14068_v42, %v8921_v6  ;;  %v8884_v30 = vld [vmem:[#allocation2 + $0x40] sm:$0xff] (!%p9963_p4) }
 0x347   : > { %8865 = vst.msk [vmem:[#allocation2 + $0xc8] sm:$0xff] %vm8839_vm6, %v11292_v34  ;;  %8867 = vst.msk [vmem:[#allocation2 + $0xd8] sm:$0xff] %vm8839_vm6, %v11294_v60  ;;  %v10004_v19 = vpack.c.bf16 (!%p9963_p4), %v9082_v18, %v9082_v18  ;;  %v9085_v34 = vmax.f32 (!%p9963_p4), %v9053_v50, 0.0  ;;  %v8922_v41 = vmul.f32 (!%p9963_p4), %v14063_v57, %v8883_v51  ;;  %v8966_v48 = vadd.f32 (!%p9963_p4), %v14068_v42, %v8927_v32  ;;  %v8891_v50 = vld [vmem:[#allocation2 + $0x78] sm:$0xff] (!%p9963_p4) }
 0x348   : > { %v9055_v60 = vadd.f32 (!%p9963_p4), %v10047_v13, %v8959_v33  ;;  %v10063_v24 = vunpack.c.h.bf16 (!%p9963_p4), %v10105_v14  ;;  %v8967_v51 = vadd.f32 (!%p9963_p4), %v14068_v42, %v8928_v56  ;;  %v8929_v18 = vmul.f32 (!%p9963_p4), %v14063_v57, %v8890_v11 }
 0x349   : > { %8875 = sbr.rel (%p9963_p4) target bundleno = 888 (0x378), region = 48  ;;  %9243 = vst.msk [vmem:[%s12357_s11] sm:$0xf] (!%p9963_p4), %vm9242_vm7, %v10004_v19 }
 0x34a   : > { %v8750_v27 = vpop.f32.mrb[28].mxu0  ;;  %v8800_v4 = vpop.f32.mrb[28].mxu1 }
 0x34b   : > { %v11295_v1 = vadd.f32 %v8750_v27, %v385_v62  ;;  %v11297_v55 = vadd.f32 %v8800_v4, %v387_v61  ;;  %v11259_v47 = vpop.f32.mrb[29].mxu0  ;;  %v11265_v21 = vpop.f32.mrb[29].mxu1  ;;  %v10103_v62 = vld [vmem:[%s12355_s10 + $0x20] sm:$0xff] (!%p9963_p4)   ;;  %v10005_v61 = vpack.c.bf16 (!%p9963_p4), %v9083_v35, %v9083_v35  ;;  %v10006_v27 = vpack.c.bf16 (!%p9963_p4), %v9084_v7, %v9084_v7 }
 0x34c   : > { %v8753_v2 = vpop.f32.mrb[30].mxu0  ;;  %v8803_v0 = vpop.f32.mrb[30].mxu1  ;;  %v9086_v4 = vmax.f32 (!%p9963_p4), %v9054_v54, 0.0  ;;  %v8961_v47 = vadd.f32 (!%p9963_p4), %v14068_v42, %v8922_v41  ;;  %v10051_v21 = vunpack.c.h.bf16 (!%p9963_p4), %v10102_v8  ;;  %v10055_v20 = vunpack.c.h.bf16 (!%p9963_p4), %v10103_v62  ;;  %v8892_v54 = vld [vmem:[#allocation2 + $0x80] sm:$0xff] (!%p9963_p4) }
 0x34d   : > { %8868 = vst.msk [vmem:[#allocation2 + $0xe0] sm:$0xff] %vm8839_vm6, %v11295_v1  ;;  %8870 = vst.msk [vmem:[#allocation2 + $0xf0] sm:$0xff] %vm8839_vm6, %v11297_v55  ;;  %v11296_v15 = vadd.f32 %v8753_v2, %v386_v9  ;;  %v11298_v63 = vadd.f32 %v8803_v0, %v388_v38  ;;  %v11260_v10 = vpop.f32.mrb[31].mxu0  ;;  %v11266_v3 = vpop.f32.mrb[31].mxu1  ;;  %v9056_v9 = vadd.f32 (!%p9963_p4), %v10050_v40, %v8960_v45  ;;  %v8885_v38 = vld [vmem:[#allocation2 + $0x48] sm:$0xff] (!%p9963_p4)  ;;  %v9087_v55 = vmax.f32 (!%p9963_p4), %v9055_v60, 0.0 }
 0x34e   : > { %v10007_v1 = vpack.c.bf16 (!%p9963_p4), %v9085_v34, %v9085_v34  ;;  %v8886_v2 = vld [vmem:[#allocation2 + $0x50] sm:$0xff] (!%p9963_p4)  ;;  %v10104_v0 = vld [vmem:[%s12355_s10 + $0x28] sm:$0xff] (!%p9963_p4)   ;;  %9244 = vst.msk [vmem:[%s12357_s11 + $0x4] sm:$0xf] (!%p9963_p4), %vm9242_vm7, %v10005_v61  ;;  %9245 = vst.msk [vmem:[%s12357_s11 + $0x8] sm:$0xf] (!%p9963_p4), %vm9242_vm7, %v10006_v27  ;;  %v8923_v10 = vmul.f32 (!%p9963_p4), %v14063_v57, %v8884_v30  ;;  %v10054_v3 = vunpack.c.l.bf16 (!%p9963_p4), %v10103_v62  ;;  %v9057_v37 = vadd.f32 (!%p9963_p4), %v10051_v21, %v8961_v47 }
 0x34f   : > { %8869 = vst.msk [vmem:[#allocation2 + $0xe8] sm:$0xff] %vm8839_vm6, %v11296_v15  ;;  %8871 = vst.msk [vmem:[#allocation2 + $0xf8] sm:$0xff] %vm8839_vm6, %v11298_v63  ;;  %v10008_v15 = vpack.c.bf16 (!%p9963_p4), %v9086_v4, %v9086_v4  ;;  %v9088_v63 = vmax.f32 (!%p9963_p4), %v9056_v9, 0.0  ;;  %v10009_v53 = vpack.c.bf16 (!%p9963_p4), %v9087_v55, %v9087_v55  ;;  %v8924_v43 = vmul.f32 (!%p9963_p4), %v14063_v57, %v8885_v38  ;;  %v10107_v41 = vld [vmem:[%s12355_s10 + $0x40] sm:$0xff] (!%p9963_p4)   ;;  %v8893_v30 = vld [vmem:[#allocation2 + $0x88] sm:$0xff] (!%p9963_p4) }
 0x350   : > { %9246 = vst.msk [vmem:[%s12357_s11 + $0xc] sm:$0xf] %vm9242_vm7, %v10007_v1  ;;  %v8962_v26 = vadd.f32 %v14068_v42, %v8923_v10  ;;  %v8925_v44 = vmul.f32 %v14063_v57, %v8886_v2  ;;  %v10058_v28 = vunpack.c.l.bf16 %v10104_v0  ;;  %v9089_v22 = vmax.f32 %v9057_v37, 0.0  ;;  %v8894_v47 = vld [vmem:[#allocation2 + $0x90] sm:$0xff]  ;;  %v10108_v21 = vld [vmem:[%s12355_s10 + $0x48] sm:$0xff]   ;;  %v8895_v10 = vld [vmem:[#allocation2 + $0x98] sm:$0xff] }
 0x351   : > { %9247 = vst.msk [vmem:[%s12357_s11 + $0x10] sm:$0xf] %vm9242_vm7, %v10008_v15  ;;  %v10010_v59 = vpack.c.bf16 %v9088_v63, %v9088_v63  ;;  %9248 = vst.msk [vmem:[%s12357_s11 + $0x14] sm:$0xf] %vm9242_vm7, %v10009_v53  ;;  %v8963_v25 = vadd.f32 %v14068_v42, %v8924_v43  ;;  %v10059_v16 = vunpack.c.h.bf16 %v10104_v0  ;;  %v8965_v8 = vadd.f32 %v14068_v42, %v8926_v39  ;;  %v8896_v43 = vld [vmem:[#allocation2 + $0xa0] sm:$0xff] }
 0x352   : > { %v9058_v12 = vadd.f32 %v10054_v3, %v8962_v26  ;;  %v8964_v46 = vadd.f32 %v14068_v42, %v8925_v44  ;;  %v10011_v23 = vpack.c.bf16 %v9089_v22, %v9089_v22  ;;  %v9062_v35 = vadd.f32 %v10062_v29, %v8966_v48  ;;  %v10109_v26 = vld [vmem:[%s12355_s10 + $0x50] sm:$0xff]   ;;  %v8897_v44 = vld [vmem:[#allocation2 + $0xa8] sm:$0xff]  ;;  %v8899_v48 = vld [vmem:[#allocation2 + $0xb8] sm:$0xff] }
 0x353   : > { %9249 = vst.msk [vmem:[%s12357_s11 + $0x18] sm:$0xf] %vm9242_vm7, %v10010_v59  ;;  %v9059_v49 = vadd.f32 %v10055_v20, %v8963_v25  ;;  %v9061_v6 = vadd.f32 %v10059_v16, %v8965_v8  ;;  %v10066_v7 = vunpack.c.l.bf16 %v10106_v52  ;;  %v9063_v34 = vadd.f32 %v10063_v24, %v8967_v51 }
 0x354   : > { %v9090_v17 = vmax.f32 %v9058_v12, 0.0  ;;  %v9060_v13 = vadd.f32 %v10058_v28, %v8964_v46  ;;  %9250 = vst.msk [vmem:[%s12357_s11 + $0x1c] sm:$0xf] %vm9242_vm7, %v10011_v23  ;;  %v8968_v60 = vadd.f32 %v14068_v42, %v8929_v18  ;;  %v9094_v61 = vmax.f32 %v9062_v35, 0.0  ;;  %v8900_v35 = vld [vmem:[#allocation2 + $0xc0] sm:$0xff] }
 0x355   : > { %v9091_v36 = vmax.f32 %v9059_v49, 0.0  ;;  %v9093_v19 = vmax.f32 %v9061_v6, 0.0  ;;  %v8930_v27 = vmul.f32 %v14063_v57, %v8891_v50  ;;  %v10067_v4 = vunpack.c.h.bf16 %v10106_v52  ;;  %v8898_v49 = vld [vmem:[#allocation2 + $0xb0] sm:$0xff] }
 0x356   : > { %v10012_v33 = vpack.c.bf16 %v9090_v17, %v9090_v17  ;;  %v9092_v40 = vmax.f32 %v9060_v13, 0.0  ;;  %v9095_v38 = vmax.f32 %v9063_v34, 0.0  ;;  %v9064_v1 = vadd.f32 %v10066_v7, %v8968_v60  ;;  %v10110_v13 = vld [vmem:[%s12355_s10 + $0x58] sm:$0xff]   ;;  %v10111_v34 = vld [vmem:[%s12355_s10 + $0x60] sm:$0xff]   ;;  %v8901_v60 = vld [vmem:[#allocation2 + $0xc8] sm:$0xff] }
 0x357   : > { %v10013_v45 = vpack.c.bf16 %v9091_v36, %v9091_v36  ;;  %v10015_v9 = vpack.c.bf16 %v9093_v19, %v9093_v19  ;;  %v8931_v55 = vmul.f32 %v14063_v57, %v8892_v54  ;;  %v10016_v2 = vpack.c.bf16 %v9094_v61, %v9094_v61 }
 0x358   : > { %9251 = vst.msk [vmem:[%s12357_s11 + $0x20] sm:$0xf] %vm9242_vm7, %v10012_v33  ;;  %v10014_v62 = vpack.c.bf16 %v9092_v40, %v9092_v40  ;;  %v8969_v0 = vadd.f32 %v14068_v42, %v8930_v27  ;;  %v10070_v15 = vunpack.c.l.bf16 %v10107_v41  ;;  %v8932_v63 = vmul.f32 %v14063_v57, %v8893_v30 }
 0x359   : > { %9252 = vst.msk [vmem:[%s12357_s11 + $0x24] sm:$0xf] %vm9242_vm7, %v10013_v45  ;;  %9254 = vst.msk [vmem:[%s12357_s11 + $0x2c] sm:$0xf] %vm9242_vm7, %v10015_v9  ;;  %v10017_v3 = vpack.c.bf16 %v9095_v38, %v9095_v38  ;;  %v9096_v31 = vmax.f32 %v9064_v1, 0.0  ;;  %v8970_v53 = vadd.f32 %v14068_v42, %v8931_v55  ;;  %v10071_v37 = vunpack.c.h.bf16 %v10107_v41  ;;  %v8902_v1 = vld [vmem:[#allocation2 + $0xd0] sm:$0xff] }
 0x35a   : > { %9253 = vst.msk [vmem:[%s12357_s11 + $0x28] sm:$0xf] %vm9242_vm7, %v10014_v62  ;;  %9255 = vst.msk [vmem:[%s12357_s11 + $0x30] sm:$0xf] %vm9242_vm7, %v10016_v2  ;;  %v9065_v20 = vadd.f32 %v10067_v4, %v8969_v0  ;;  %v8971_v5 = vadd.f32 %v14068_v42, %v8932_v63  ;;  %v8933_v14 = vmul.f32 %v14063_v57, %v8894_v47  ;;  %v10074_v59 = vunpack.c.l.bf16 %v10108_v21  ;;  %v10112_v55 = vld [vmem:[%s12355_s10 + $0x68] sm:$0xff]  }
 0x35b   : > { %9256 = vst.msk [vmem:[%s12357_s11 + $0x34] sm:$0xf] %vm9242_vm7, %v10017_v3  ;;  %v10018_v28 = vpack.c.bf16 %v9096_v31, %v9096_v31  ;;  %v9066_v58 = vadd.f32 %v10070_v15, %v8970_v53  ;;  %v8934_v22 = vmul.f32 %v14063_v57, %v8895_v10  ;;  %v10075_v25 = vunpack.c.h.bf16 %v10108_v21  ;;  %v8903_v15 = vld [vmem:[#allocation2 + $0xd8] sm:$0xff]  ;;  %v8904_v53 = vld [vmem:[#allocation2 + $0xe0] sm:$0xff] }
 0x35c   : > { %v9097_v39 = vmax.f32 %v9065_v20, 0.0  ;;  %v9067_v16 = vadd.f32 %v10071_v37, %v8971_v5  ;;  %v8972_v12 = vadd.f32 %v14068_v42, %v8933_v14  ;;  %v8935_v46 = vmul.f32 %v14063_v57, %v8896_v43  ;;  %v10113_v14 = vld [vmem:[%s12355_s10 + $0x70] sm:$0xff]  }
 0x35d   : > { %9257 = vst.msk [vmem:[%s12357_s11 + $0x38] sm:$0xf] %vm9242_vm7, %v10018_v28  ;;  %v9098_v32 = vmax.f32 %v9066_v58, 0.0  ;;  %v8973_v29 = vadd.f32 %v14068_v42, %v8934_v22  ;;  %v10078_v11 = vunpack.c.l.bf16 %v10109_v26  ;;  %v8936_v23 = vmul.f32 %v14063_v57, %v8897_v44  ;;  %v8905_v58 = vld [vmem:[#allocation2 + $0xe8] sm:$0xff] }
 0x35e   : > { %v10019_v8 = vpack.c.bf16 %v9097_v39, %v9097_v39  ;;  %v9099_v56 = vmax.f32 %v9067_v16, 0.0  ;;  %v9068_v52 = vadd.f32 %v10074_v59, %v8972_v12  ;;  %v8974_v17 = vadd.f32 %v14068_v42, %v8935_v46  ;;  %v8906_v12 = vld [vmem:[#allocation2 + $0xf0] sm:$0xff] }
 0x35f   : > { %v10020_v24 = vpack.c.bf16 %v9098_v32, %v9098_v32  ;;  %v9069_v36 = vadd.f32 %v10075_v25, %v8973_v29  ;;  %v8975_v6 = vadd.f32 %v14068_v42, %v8936_v23  ;;  %v10079_v51 = vunpack.c.h.bf16 %v10109_v26 }
 0x360   : > { %9258 = vst.msk [vmem:[%s12357_s11 + $0x3c] sm:$0xf] %vm9242_vm7, %v10019_v8  ;;  %v10021_v18 = vpack.c.bf16 %v9099_v56, %v9099_v56  ;;  %v9100_v50 = vmax.f32 %v9068_v52, 0.0  ;;  %v9070_v33 = vadd.f32 %v10078_v11, %v8974_v17  ;;  %v8937_v40 = vmul.f32 %v14063_v57, %v8898_v49  ;;  %v10114_v52 = vld [vmem:[%s12355_s10 + $0x78] sm:$0xff]  }
 0x361   : > { %9259 = vst.msk [vmem:[%s12357_s11 + $0x40] sm:$0xf] %vm9242_vm7, %v10020_v24  ;;  %v9101_v7 = vmax.f32 %v9069_v36, 0.0  ;;  %v9071_v54 = vadd.f32 %v10079_v51, %v8975_v6  ;;  %v10082_v45 = vunpack.c.l.bf16 %v10110_v13  ;;  %v8938_v19 = vmul.f32 %v14063_v57, %v8899_v48  ;;  %v8907_v17 = vld [vmem:[#allocation2 + $0xf8] sm:$0xff] }
 0x362   : > { %9260 = vst.msk [vmem:[%s12357_s11 + $0x44] sm:$0xf] %vm9242_vm7, %v10021_v18  ;;  %v10022_v41 = vpack.c.bf16 %v9100_v50, %v9100_v50  ;;  %v9102_v30 = vmax.f32 %v9070_v33, 0.0  ;;  %v8976_v62 = vadd.f32 %v14068_v42, %v8937_v40  ;;  %v10083_v61 = vunpack.c.h.bf16 %v10110_v13 }
 0x363   : > { %v10023_v27 = vpack.c.bf16 %v9101_v7, %v9101_v7  ;;  %v9103_v4 = vmax.f32 %v9071_v54, 0.0  ;;  %v8977_v9 = vadd.f32 %v14068_v42, %v8938_v19  ;;  %v8939_v38 = vmul.f32 %v14063_v57, %v8900_v35 }
 0x364   : > { %9261 = vst.msk [vmem:[%s12357_s11 + $0x48] sm:$0xf] %vm9242_vm7, %v10022_v41  ;;  %v10024_v47 = vpack.c.bf16 %v9102_v30, %v9102_v30  ;;  %v9072_v21 = vadd.f32 %v10082_v45, %v8976_v62  ;;  %v10086_v2 = vunpack.c.l.bf16 %v10111_v34  ;;  %v8940_v0 = vmul.f32 %v14063_v57, %v8901_v60 }
 0x365   : > { %9262 = vst.msk [vmem:[%s12357_s11 + $0x4c] sm:$0xf] %vm9242_vm7, %v10023_v27  ;;  %v10025_v63 = vpack.c.bf16 %v9103_v4, %v9103_v4  ;;  %v9073_v10 = vadd.f32 %v10083_v61, %v8977_v9  ;;  %v8978_v3 = vadd.f32 %v14068_v42, %v8939_v38  ;;  %v10087_v31 = vunpack.c.h.bf16 %v10111_v34 }
 0x366   : > { %9263 = vst.msk [vmem:[%s12357_s11 + $0x50] sm:$0xf] %vm9242_vm7, %v10024_v47  ;;  %v9104_v37 = vmax.f32 %v9072_v21, 0.0  ;;  %v8979_v43 = vadd.f32 %v14068_v42, %v8940_v0  ;;  %v8941_v20 = vmul.f32 %v14063_v57, %v8902_v1  ;;  %v10090_v5 = vunpack.c.l.bf16 %v10112_v55 }
 0x367   : > { %9264 = vst.msk [vmem:[%s12357_s11 + $0x54] sm:$0xf] %vm9242_vm7, %v10025_v63  ;;  %v9105_v59 = vmax.f32 %v9073_v10, 0.0  ;;  %v9074_v26 = vadd.f32 %v10086_v2, %v8978_v3  ;;  %v8942_v44 = vmul.f32 %v14063_v57, %v8903_v15  ;;  %v10091_v28 = vunpack.c.h.bf16 %v10112_v55 }
 0x368   : > { %v10026_v22 = vpack.c.bf16 %v9104_v37, %v9104_v37  ;;  %v9075_v25 = vadd.f32 %v10087_v31, %v8979_v43  ;;  %v8980_v39 = vadd.f32 %v14068_v42, %v8941_v20  ;;  %v8943_v16 = vmul.f32 %v14063_v57, %v8904_v53 }
 0x369   : > { %v10027_v46 = vpack.c.bf16 %v9105_v59, %v9105_v59  ;;  %v9106_v32 = vmax.f32 %v9074_v26, 0.0  ;;  %v8981_v29 = vadd.f32 %v14068_v42, %v8942_v44  ;;  %v10094_v11 = vunpack.c.l.bf16 %v10113_v14 }
 0x36a   : > { %9265 = vst.msk [vmem:[%s12357_s11 + $0x58] sm:$0xf] %vm9242_vm7, %v10026_v22  ;;  %v9107_v23 = vmax.f32 %v9075_v25, 0.0  ;;  %v9076_v49 = vadd.f32 %v10090_v5, %v8980_v39  ;;  %v8982_v8 = vadd.f32 %v14068_v42, %v8943_v16  ;;  %v8944_v56 = vmul.f32 %v14063_v57, %v8905_v58 }
 0x36b   : > { %9266 = vst.msk [vmem:[%s12357_s11 + $0x5c] sm:$0xf] %vm9242_vm7, %v10027_v46  ;;  %v10028_v13 = vpack.c.bf16 %v9106_v32, %v9106_v32  ;;  %v9077_v48 = vadd.f32 %v10091_v28, %v8981_v29  ;;  %v10095_v24 = vunpack.c.h.bf16 %v10113_v14  ;;  %v8945_v36 = vmul.f32 %v14063_v57, %v8906_v12 }
 0x36c   : > { %v10029_v6 = vpack.c.bf16 %v9107_v23, %v9107_v23  ;;  %v9108_v51 = vmax.f32 %v9076_v49, 0.0  ;;  %v9078_v18 = vadd.f32 %v10094_v11, %v8982_v8  ;;  %v8983_v50 = vadd.f32 %v14068_v42, %v8944_v56 }
 0x36d   : > { %9267 = vst.msk [vmem:[%s12357_s11 + $0x60] sm:$0xf] %vm9242_vm7, %v10028_v13  ;;  %v9109_v33 = vmax.f32 %v9077_v48, 0.0  ;;  %v8984_v40 = vadd.f32 %v14068_v42, %v8945_v36  ;;  %v10098_v35 = vunpack.c.l.bf16 %v10114_v52  ;;  %v8946_v7 = vmul.f32 %v14063_v57, %v8907_v17 }
 0x36e   : > { %9268 = vst.msk [vmem:[%s12357_s11 + $0x64] sm:$0xf] %vm9242_vm7, %v10029_v6  ;;  %v10030_v54 = vpack.c.bf16 %v9108_v51, %v9108_v51  ;;  %v9110_v45 = vmax.f32 %v9078_v18, 0.0  ;;  %v9079_v19 = vadd.f32 %v10095_v24, %v8983_v50  ;;  %v10099_v34 = vunpack.c.h.bf16 %v10114_v52 }
 0x36f   : > { %v10031_v60 = vpack.c.bf16 %v9109_v33, %v9109_v33  ;;  %v9080_v41 = vadd.f32 %v10098_v35, %v8984_v40  ;;  %v8985_v30 = vadd.f32 %v14068_v42, %v8946_v7 }
 0x370   : > { %9269 = vst.msk [vmem:[%s12357_s11 + $0x68] sm:$0xf] %vm9242_vm7, %v10030_v54  ;;  %v10032_v62 = vpack.c.bf16 %v9110_v45, %v9110_v45  ;;  %v9111_v61 = vmax.f32 %v9079_v19, 0.0 }
 0x371   : > { %9270 = vst.msk [vmem:[%s12357_s11 + $0x6c] sm:$0xf] %vm9242_vm7, %v10031_v60  ;;  %v9112_v57 = vmax.f32 %v9080_v41, 0.0  ;;  %v9081_v27 = vadd.f32 %v10099_v34, %v8985_v30 }
 0x372   : > { %9271 = vst.msk [vmem:[%s12357_s11 + $0x70] sm:$0xf] %vm9242_vm7, %v10032_v62  ;;  %v10033_v4 = vpack.c.bf16 %v9111_v61, %v9111_v61 }
 0x373   : > { %v10034_v9 = vpack.c.bf16 %v9112_v57, %v9112_v57  ;;  %v9113_v38 = vmax.f32 %v9081_v27, 0.0 }
 0x374   : > { %9272 = vst.msk [vmem:[%s12357_s11 + $0x74] sm:$0xf] %vm9242_vm7, %v10033_v4 }
 0x375   : > { %9273 = vst.msk [vmem:[%s12357_s11 + $0x78] sm:$0xf] %vm9242_vm7, %v10034_v9  ;;  %v10035_v1 = vpack.c.bf16 %v9113_v38, %v9113_v38 }
 0x377   : > { %9274 = vst.msk [vmem:[%s12357_s11 + $0x7c] sm:$0xf] %vm9242_vm7, %v10035_v1 }
 0x378 PF: > { %s9999_s21 = sshll.u32 %s12188_s22, 5  ;;  %s10000_s26 = sshll.u32 %s12192_s23, 9 }
 0x379   : > { %s9291_s27 = sshll.u32 %s12357_s11, 4  ;;  %s9288_s30 = sadd.s32 %s10000_s26, %s9999_s21  ;;  %s14217_s27 = int_to_ptr.vmem [resolvable:$true] %s9291_s27 }
 0x37a   : > { %s10001_s6 = sshll.u32 %s9288_s30, 6  ;;  %s14330_s15 = sand.u32 1, %s12176_s19  }
 0x37b   : > { %s14222_s14 = scalar_lea.hbm %s14289_s5, %s10001_s6  ;;  %s14226_s17 = scalar_lea.sflag [#allocation4], %s14330_s15 }
 0x37c   : > { %s12098_s28 = scalar_lea.vmem %s14217_s27, 2048  ;;  %s12213_s22 = smov [#allocation3]  }
 0x37d   : > { %p12099_p5 = scmp.ne.s32.totalorder %s14217_s27, %s12098_s28  ;;  %s12102_s23 = sshll.u32 %s12213_s22, 4  ;;  %s12103_s23 = int_to_ptr.vmem [resolvable:$false] %s12102_s23 }
 0x37e   : > { %s12104_s12 = scalar_lea.vmem %s12103_s23, 4096  ;;  %p12105_p10 = scmp.lt.s32.totalorder %s14217_s27, %s12103_s23 }
 0x37f   : > { %p12100_p8 = pnand %p12099_p5, %p12308_p6  ;;  %p12106_p11 = scmp.lt.s32.totalorder %s12104_s12, %s12098_s28 }
 0x381   : > { %p12101_p9 = pneg %p12100_p8  ;;  %p12107_p12 = por %p12106_p11, %p12105_p10 }
 0x383   : > { %p12108_p13 = pnand %p12107_p12, %p12101_p9 }
 0x385   : > { %12111 = shalt.err (!%p12108_p13)
}
 0x386   : > { %s12112_s13 = scalar_lea.hbm %s14222_s14, 2048  ;;  %s12116_s10 = scalar_lea.hbm %s14289_s5, 65536 }
 0x387   : > { %p12113_p0 = scmp.ne.s32.totalorder %s14222_s14, %s12112_s13  ;;  %p12117_p3 = scmp.lt.u32.totalorder %s14222_s14, %s14289_s5 }
 0x388   : > { %p12118_p4 = scmp.lt.u32.totalorder %s12116_s10, %s12112_s13  ;;  %p12120_p8 = scmp.lt.u32.totalorder %s12112_s13, %s14222_s14 }
 0x389   : > { %p12114_p1 = pnand %p12113_p0, %p12308_p6 }
 0x38a   : > { %p12119_p5 = por %p12118_p4, %p12117_p3 }
 0x38b   : > { %p12115_p2 = pneg %p12114_p1 }
 0x38c   : > { %p12121_p9 = por %p12120_p8, %p12119_p5 }
 0x38e   : > { %p12122_p10 = pnand %p12121_p9, %p12115_p2 }
 0x390   : > { %12125 = shalt.err (!%p12122_p10)
}
 0x391   : > { %s12214_s20 = smov 64   ;;  %s12215_s24 = smov 4  }
 0x392   : > { %11814 = dma.vmem_to_hbm [thread:$0]  (%p12308_p6), %s14217_s27, 2048, %s14222_s14, %s14226_s17, %s12214_s20, %s12214_s20, %s12215_s24  }
 0x393 PF: > { %s14331_s25 = sld [smem:[#allocation11_spill]]  ;;  %s14332_s21 = sld [smem:[#allocation6_spill]] }
 0x399   : > { %p11820_p11 = scmp.ge.s32.totalorder %s14331_s25, 2  ;;  %s9306_s30 = sand.u32 1, %s14332_s21  }
 0x39a   : > { %s9307_s6 = scalar_lea.sflag [#allocation4], %s9306_s30 }
 0x39b   : > { %p11817_p12 = pnand %p11820_p11, %p12315_p7 }
 0x39d   : > { %12167 = dma.done.wait (!%p11817_p12), %s9307_s6, 2048  }
 0x39e   : > { %12169 = vsyncadd (!%p11817_p12), %s9307_s6, 4294965248  ;;  %s18_s27 = sadd.s32 1, %s14331_s25   ;;  %s14334_s7 = sld [smem:[#allocation7_spill]] }
 0x39f   : > { %p15_p13 = scmp.ge.s32.totalorder %s18_s27, 98   ;;  %s14335_s20 = sld [smem:[#allocation16_spill]] }
 0x3a0   : > { %s14336_s21 = sld [smem:[#allocation8_spill]]  ;;  %s14337_s22 = sld [smem:[#allocation9_spill]] }
 0x3a1   : > { %s14338_s23 = sld [smem:[#allocation10_spill]]  ;;  %s14339_s24 = sld [smem:[#allocation12_spill]] }
 0x3a2   : > { %s14340_s25 = sld [smem:[#allocation13_spill]]  ;;  %s14341_s26 = sld [smem:[#allocation15_spill]] }
 0x3a3   : > { %s14342_s18 = smov %s12176_s19  ;;  %17 = sbr.rel (!%p15_p13) target bundleno = 6 (0x6), region = 99 }
 0x3a4   : > { %s14343_s19 = smov %s14334_s7 }
 0x3aa   :  { %9312 = vsyncpa [#allocation4], 1 }
 0x3ab   :  { %9314 = vsyncpa [#allocation4 + $0x1], 1 }

</bundles_post_ra>
